<compile_context>
chip_gen: v5e
topology: v5e:2x2
jax: 0.10.0
libtpu: 0.0.40
codegen_flags: <defaults>
</compile_context>

<pallas_src>
import functools
import math

import jax
import jax.numpy as jnp
from jax.experimental import pallas as pl
from jax.experimental.pallas import tpu as pltpu


def _round_up(x, m):
    return ((x + m - 1) // m) * m


def _cost(flops, bytes_accessed, transcendentals=0):
    return pl.CostEstimate(flops=int(flops),
                           transcendentals=int(transcendentals),
                           bytes_accessed=int(bytes_accessed))


_PAR1 = pltpu.CompilerParams(dimension_semantics=("parallel",))
_PAR1_BIG = pltpu.CompilerParams(dimension_semantics=("parallel",),
                                 vmem_limit_bytes=64 * 1024 * 1024)


# ----------------------------- Pallas kernels ------------------------------

def _linear_kernel(x_ref, w_ref, b_ref, o_ref, *, act):
    x = x_ref[...].astype(jnp.bfloat16)
    y = jnp.dot(x, w_ref[...], preferred_element_type=jnp.float32) + b_ref[...]
    if act == "relu":
        y = jnp.maximum(y, 0.0)
    o_ref[...] = y.astype(o_ref.dtype)


def _emb_kernel(ph_ref, pe_ref, w_ref, b_ref, o_ref, *, scale):
    x = ph_ref[...].astype(jnp.bfloat16)
    y = jnp.dot(x, w_ref[...], preferred_element_type=jnp.float32)
    y = (y + b_ref[...] + pe_ref[...]) * scale
    o_ref[...] = jnp.where(y >= 0.0, y, 0.1 * y)              # LeakyReLU(0.1)


def _linear_res_ln_kernel(x_ref, w_ref, b_ref, r_ref, g_ref, be_ref, o_ref,
                          *, eps):
    x = x_ref[...].astype(jnp.bfloat16)
    y = jnp.dot(x, w_ref[...], preferred_element_type=jnp.float32)
    z = r_ref[...] + y + b_ref[...]
    mu = jnp.mean(z, axis=-1, keepdims=True)
    var = jnp.mean(jnp.square(z - mu), axis=-1, keepdims=True)
    o_ref[...] = (z - mu) * jax.lax.rsqrt(var + eps) * g_ref[...] + be_ref[...]


def _ffn_conv1_kernel(lens_ref, x_ref, w_ref, b_ref, o_ref):
    # conv1(pad(x*mask)) -> relu -> *mask   (masks built from SMEM lengths)
    tpad, _ = x_ref.shape
    t_out, cout = o_ref.shape
    ks = w_ref.shape[0]
    pad_l = (ks - 1) // 2
    length = lens_ref[pl.program_id(0)]

    ti = jax.lax.broadcasted_iota(jnp.int32, (tpad, 1), 0) - pad_l
    xv = jnp.where((ti >= 0) & (ti < length), x_ref[...], 0.0)
    xv = xv.astype(jnp.bfloat16)

    acc = jnp.zeros((t_out, cout), jnp.float32)
    for tap in range(ks):
        acc = acc + jnp.dot(xv[tap:tap + t_out, :], w_ref[tap],
                            preferred_element_type=jnp.float32)
    y = jnp.maximum(acc + b_ref[...], 0.0)
    to = jax.lax.broadcasted_iota(jnp.int32, (t_out, 1), 0)
    o_ref[...] = jnp.where(to < length, y, 0.0).astype(o_ref.dtype)


def _ffn_conv2_res_ln_kernel(x_ref, w_ref, b_ref, r_ref, g_ref, be_ref, o_ref,
                             *, eps):
    # conv2(pad(h1)) + residual + LayerNorm (input h1 already masked).
    t_out, cout = o_ref.shape
    ks = w_ref.shape[0]
    xv = x_ref[...].astype(jnp.bfloat16)
    acc = jnp.zeros((t_out, cout), jnp.float32)
    for tap in range(ks):
        acc = acc + jnp.dot(xv[tap:tap + t_out, :], w_ref[tap],
                            preferred_element_type=jnp.float32)
    z = r_ref[...] + acc + b_ref[...]
    mu = jnp.mean(z, axis=-1, keepdims=True)
    var = jnp.mean(jnp.square(z - mu), axis=-1, keepdims=True)
    o_ref[...] = (z - mu) * jax.lax.rsqrt(var + eps) * g_ref[...] + be_ref[...]


def _attn_kernel(lens_ref, qkv_ref, ek_ref, ev_ref, o_ref):
    # Fused relative-position multi-head attention for one batch element.
    #   qkv_ref : [t, 3H] bf16, ek/ev : [2w+1, d] bf16, o_ref : [t, H] bf16
    # rel-key bias and rel-value terms are built in-kernel (per-diagonal
    # select/accumulate); p never leaves VMEM.
    t, hidden = o_ref.shape
    n_rel, head_dim = ek_ref.shape
    window = (n_rel - 1) // 2
    n_heads = hidden // head_dim
    scale = 1.0 / math.sqrt(head_dim)
    omax = min(window, t - 1)

    length = lens_ref[pl.program_id(0)]
    row = jax.lax.broadcasted_iota(jnp.int32, (t, t), 0)
    col = jax.lax.broadcasted_iota(jnp.int32, (t, t), 1)
    diff = col - row                      # relative offset (key - query)
    key_ok = col < length

    ek = ek_ref[...]                      # [2w+1, d] bf16
    ev = ev_ref[...].astype(jnp.float32)  # [2w+1, d] f32

    ctx_heads = []
    for h in range(n_heads):
        q = qkv_ref[:, h * head_dim:(h + 1) * head_dim] * scale
        k = qkv_ref[:, hidden + h * head_dim:hidden + (h + 1) * head_dim]
        v = qkv_ref[:, 2 * hidden + h * head_dim:2 * hidden + (h + 1) * head_dim]

        s = jax.lax.dot_general(q, k, (((1,), (1,)), ((), ())),
                                preferred_element_type=jnp.float32)    # [t,t]
        # relative-key bias: U = (q*scale) @ emb_k^T, scattered per diagonal.
        u = jax.lax.dot_general(q, ek, (((1,), (1,)), ((), ())),
                                preferred_element_type=jnp.float32)    # [t,2w+1]
        for o in range(-omax, omax + 1):
            s = s + jnp.where(diff == o, u[:, o + window:o + window + 1], 0.0)

        s = jnp.where(key_ok, s, -1e4)    # key-side mask (masked_fill style)
        mx = jnp.max(s, axis=-1, keepdims=True)
        e = jnp.exp(s - mx)
        denom = jnp.sum(e, axis=-1, keepdims=True)
        p = e * pl.reciprocal(denom, approx=True)

        ctx = jnp.dot(p.astype(jnp.bfloat16), v,
                      preferred_element_type=jnp.float32)              # [t,d]
        # relative-value term: ctx += sum_o diag_o(p) * emb_v[o+w]
        for o in range(-omax, omax + 1):
            c_o = jnp.sum(jnp.where(diff == o, p, 0.0), axis=-1, keepdims=True)
            ctx = ctx + c_o * ev[o + window:o + window + 1, :]
        ctx_heads.append(ctx)

    out = ctx_heads[0] if n_heads == 1 else jnp.concatenate(ctx_heads, axis=-1)
    o_ref[...] = out.astype(o_ref.dtype)  # single lane-dense [t, H] store


# ------------------------------ kernel wrappers -----------------------------

def linear(x2d, w, b, act=None, out_dtype=jnp.float32, block_rows=1024):
    n, cin = x2d.shape
    cout = w.shape[1]
    rb = min(block_rows, _round_up(n, 8))
    grid = (pl.cdiv(n, rb),)
    nbytes = (n * cin * x2d.dtype.itemsize + cin * cout * 2
              + n * cout * jnp.dtype(out_dtype).itemsize)
    return pl.pallas_call(
        functools.partial(_linear_kernel, act=act),
        grid=grid,
        in_specs=[
            pl.BlockSpec((rb, cin), lambda i: (i, 0)),
            pl.BlockSpec((cin, cout), lambda i: (0, 0)),
            pl.BlockSpec((1, cout), lambda i: (0, 0)),
        ],
        out_specs=pl.BlockSpec((rb, cout), lambda i: (i, 0)),
        out_shape=jax.ShapeDtypeStruct((n, cout), out_dtype),
        compiler_params=_PAR1,
        cost_estimate=_cost(2 * n * cin * cout, nbytes),
    )(x2d, w, b.reshape(1, cout))


def emb_phone_pitch(phone2d, pe2d, w, b, hidden, block_rows=1024):
    n, e = phone2d.shape
    h = w.shape[1]
    rb = min(block_rows, _round_up(n, 8))
    grid = (pl.cdiv(n, rb),)
    nbytes = n * e * 4 + n * h * 4 + e * h * 2 + n * h * 4
    return pl.pallas_call(
        functools.partial(_emb_kernel, scale=math.sqrt(hidden)),
        grid=grid,
        in_specs=[
            pl.BlockSpec((rb, e), lambda i: (i, 0)),
            pl.BlockSpec((rb, h), lambda i: (i, 0)),
            pl.BlockSpec((e, h), lambda i: (0, 0)),
            pl.BlockSpec((1, h), lambda i: (0, 0)),
        ],
        out_specs=pl.BlockSpec((rb, h), lambda i: (i, 0)),
        out_shape=jax.ShapeDtypeStruct((n, h), jnp.float32),
        compiler_params=_PAR1,
        cost_estimate=_cost(2 * n * e * h, nbytes),
    )(phone2d, pe2d, w, b.reshape(1, h))


def linear_res_ln(x2d, w, b, res2d, gamma, beta, eps=1e-5, block_rows=1024):
    n, cin = x2d.shape
    cout = w.shape[1]
    rb = min(block_rows, _round_up(n, 8))
    grid = (pl.cdiv(n, rb),)
    nbytes = (n * cin * x2d.dtype.itemsize + cin * cout * 2
              + n * cout * 4 + n * cout * 4)
    return pl.pallas_call(
        functools.partial(_linear_res_ln_kernel, eps=eps),
        grid=grid,
        in_specs=[
            pl.BlockSpec((rb, cin), lambda i: (i, 0)),
            pl.BlockSpec((cin, cout), lambda i: (0, 0)),
            pl.BlockSpec((1, cout), lambda i: (0, 0)),
            pl.BlockSpec((rb, cout), lambda i: (i, 0)),
            pl.BlockSpec((1, cout), lambda i: (0, 0)),
            pl.BlockSpec((1, cout), lambda i: (0, 0)),
        ],
        out_specs=pl.BlockSpec((rb, cout), lambda i: (i, 0)),
        out_shape=jax.ShapeDtypeStruct((n, cout), jnp.float32),
        compiler_params=_PAR1,
        cost_estimate=_cost(2 * n * cin * cout, nbytes),
    )(x2d, w, b.reshape(1, cout), res2d, gamma.reshape(1, cout),
      beta.reshape(1, cout))


def ffn_conv1(x_pad, w, b, lengths, t_out, pad_l):
    del pad_l  # derived in-kernel from the kernel size
    bsz, tpad, cin = x_pad.shape
    ks, _, cout = w.shape
    flops = 2 * bsz * t_out * ks * cin * cout
    nbytes = x_pad.size * 4 + w.size * 2 + bsz * t_out * cout * 2
    return pl.pallas_call(
        _ffn_conv1_kernel,
        grid_spec=pltpu.PrefetchScalarGridSpec(
            num_scalar_prefetch=1,
            grid=(bsz,),
            in_specs=[
                pl.BlockSpec((None, tpad, cin), lambda i, lens: (i, 0, 0)),
                pl.BlockSpec((ks, cin, cout), lambda i, lens: (0, 0, 0)),
                pl.BlockSpec((1, cout), lambda i, lens: (0, 0)),
            ],
            out_specs=pl.BlockSpec((None, t_out, cout),
                                   lambda i, lens: (i, 0, 0)),
        ),
        out_shape=jax.ShapeDtypeStruct((bsz, t_out, cout), jnp.bfloat16),
        compiler_params=_PAR1_BIG,
        cost_estimate=_cost(flops, nbytes),
    )(lengths, x_pad, w, b.reshape(1, cout))


def ffn_conv2_res_ln(h_pad, w, b, res, gamma, beta, eps=1e-5):
    bsz, tpad, cin = h_pad.shape
    ks, _, cout = w.shape
    t_out = tpad - (ks - 1)
    flops = 2 * bsz * t_out * ks * cin * cout
    nbytes = h_pad.size * 2 + w.size * 2 + res.size * 4 + bsz * t_out * cout * 4
    return pl.pallas_call(
        functools.partial(_ffn_conv2_res_ln_kernel, eps=eps),
        grid=(bsz,),
        in_specs=[
            pl.BlockSpec((None, tpad, cin), lambda i: (i, 0, 0)),
            pl.BlockSpec((ks, cin, cout), lambda i: (0, 0, 0)),
            pl.BlockSpec((1, cout), lambda i: (0, 0)),
            pl.BlockSpec((None, t_out, cout), lambda i: (i, 0, 0)),
            pl.BlockSpec((1, cout), lambda i: (0, 0)),
            pl.BlockSpec((1, cout), lambda i: (0, 0)),
        ],
        out_specs=pl.BlockSpec((None, t_out, cout), lambda i: (i, 0, 0)),
        out_shape=jax.ShapeDtypeStruct((bsz, t_out, cout), jnp.float32),
        compiler_params=_PAR1_BIG,
        cost_estimate=_cost(flops, nbytes),
    )(h_pad, w, b.reshape(1, cout), res, gamma.reshape(1, cout),
      beta.reshape(1, cout))


def rel_attention(qkv, lengths, emb_rel_k, emb_rel_v, n_heads, head_dim,
                  window):
    b, t, three_h = qkv.shape
    hidden = n_heads * head_dim
    ek = emb_rel_k.reshape(2 * window + 1, head_dim)
    ev = emb_rel_v.reshape(2 * window + 1, head_dim)
    flops = 2 * b * n_heads * (2 * t * t * head_dim
                               + t * (2 * window + 1) * head_dim)
    nbytes = qkv.size * 2 + b * t * hidden * 2 + ek.size * 2 + ev.size * 2
    return pl.pallas_call(
        _attn_kernel,
        grid_spec=pltpu.PrefetchScalarGridSpec(
            num_scalar_prefetch=1,
            grid=(b,),
            in_specs=[
                pl.BlockSpec((None, t, three_h), lambda i, lens: (i, 0, 0)),
                pl.BlockSpec((2 * window + 1, head_dim),
                             lambda i, lens: (0, 0)),
                pl.BlockSpec((2 * window + 1, head_dim),
                             lambda i, lens: (0, 0)),
            ],
            out_specs=pl.BlockSpec((None, t, hidden),
                                   lambda i, lens: (i, 0, 0)),
        ),
        out_shape=jax.ShapeDtypeStruct((b, t, hidden), jnp.bfloat16),
        compiler_params=_PAR1_BIG,
        cost_estimate=_cost(flops, nbytes,
                            transcendentals=b * n_heads * t * t),
    )(lengths, qkv, ek, ev)


# --------------------------- pure-JAX references ----------------------------

def _bf16_mm(x, w):
    return jnp.dot(x.astype(jnp.bfloat16), w.astype(jnp.bfloat16),
                   preferred_element_type=jnp.float32)


def _linear_ref(x2d, w, b, act=None, out_dtype=jnp.float32, block_rows=None):
    y = _bf16_mm(x2d, w) + b[None, :]
    if act == "relu":
        y = jnp.maximum(y, 0.0)
    return y.astype(out_dtype)


def _emb_ref(ph, pe, w, b, hidden, block_rows=None):
    y = (_bf16_mm(ph, w) + b[None, :] + pe) * math.sqrt(hidden)
    return jnp.where(y >= 0.0, y, 0.1 * y)


def _linear_res_ln_ref(x2d, w, b, res, g, be, eps=1e-5, block_rows=None):
    z = res + _bf16_mm(x2d, w) + b[None, :]
    mu = z.mean(-1, keepdims=True)
    var = jnp.square(z - mu).mean(-1, keepdims=True)
    return (z - mu) * jax.lax.rsqrt(var + eps) * g[None, :] + be[None, :]


def _ffn_conv1_ref(x_pad, w, b, lengths, t_out, pad_l):
    bsz, tpad, _ = x_pad.shape
    ks = w.shape[0]
    ti = jnp.arange(tpad)[None, :] - pad_l
    in_ok = (ti >= 0) & (ti < lengths[:, None])
    xm = jnp.where(in_ok[:, :, None], x_pad, 0.0).astype(jnp.bfloat16)
    acc = 0.0
    for tap in range(ks):
        acc = acc + jnp.einsum("btc,cf->btf", xm[:, tap:tap + t_out],
                               w[tap], preferred_element_type=jnp.float32)
    y = jnp.maximum(acc + b[None, None, :], 0.0)
    out_ok = (jnp.arange(t_out)[None, :] < lengths[:, None])[:, :, None]
    return jnp.where(out_ok, y, 0.0).astype(jnp.bfloat16)


def _ffn_conv2_res_ln_ref(h_pad, w, b, res, g, be, eps=1e-5):
    ks = w.shape[0]
    t_out = res.shape[1]
    acc = 0.0
    for tap in range(ks):
        acc = acc + jnp.einsum("btc,cf->btf",
                               h_pad[:, tap:tap + t_out].astype(jnp.bfloat16),
                               w[tap], preferred_element_type=jnp.float32)
    z = res + acc + b[None, None, :]
    mu = z.mean(-1, keepdims=True)
    var = jnp.square(z - mu).mean(-1, keepdims=True)
    return (z - mu) * jax.lax.rsqrt(var + eps) * g[None, None, :] + be[None, None, :]


def _get_relative_embeddings(emb, length, window):
    # emb: [1, 2*window+1, d] -> [2*length-1, d], zero padded outside window.
    pad_len = max(length - (window + 1), 0)
    start = max(window + 1 - length, 0)
    if pad_len > 0:
        emb = jnp.pad(emb, ((0, 0), (pad_len, pad_len), (0, 0)))
    return emb[0, start:start + 2 * length - 1]


def _rel_to_abs(x):
    # [b, h, t, 2t-1] -> [b, h, t, t]   (Music-Transformer pad/reshape skew)
    b, h, t, _ = x.shape
    x = jnp.pad(x, ((0, 0), (0, 0), (0, 0), (0, 1)))
    x = x.reshape(b, h, 2 * t * t)
    x = jnp.pad(x, ((0, 0), (0, 0), (0, t - 1)))
    x = x.reshape(b, h, t + 1, 2 * t - 1)
    return x[:, :, :t, t - 1:]


def _abs_to_rel(x):
    # [b, h, t, t] -> [b, h, t, 2t-1]   (inverse skew)
    b, h, t, _ = x.shape
    x = jnp.pad(x, ((0, 0), (0, 0), (0, 0), (0, t - 1)))
    x = x.reshape(b, h, t * (2 * t - 1))
    x = jnp.pad(x, ((0, 0), (0, 0), (t, 0)))
    x = x.reshape(b, h, t, 2 * t)
    return x[:, :, :, 1:]


def _attn_ref(qkv, lengths, emb_rel_k, emb_rel_v, n_heads, head_dim, window):
    b, t, _ = qkv.shape
    scale = 1.0 / math.sqrt(head_dim)
    qkv = qkv.reshape(b, t, 3, n_heads, head_dim)
    q = qkv[:, :, 0].transpose(0, 2, 1, 3)            # [b, nh, t, d] bf16
    k = qkv[:, :, 1].transpose(0, 2, 1, 3)
    v = qkv[:, :, 2].transpose(0, 2, 1, 3)
    qs = q * scale

    scores = jnp.einsum("bhtd,bhsd->bhts", qs, k,
                        preferred_element_type=jnp.float32)
    rel_k = _get_relative_embeddings(emb_rel_k, t, window)
    rel_v = _get_relative_embeddings(emb_rel_v, t, window)
    rel_logits = jnp.einsum("bhtd,rd->bhtr", qs, rel_k,
                            preferred_element_type=jnp.float32)
    scores = scores + _rel_to_abs(rel_logits)
    key_ok = (jnp.arange(t)[None, :] < lengths[:, None])[:, None, None, :]
    scores = jnp.where(key_ok, scores, -1e4)
    p = jax.nn.softmax(scores, axis=-1)
    ctx = jnp.einsum("bhts,bhsd->bhtd", p.astype(jnp.bfloat16), v,
                     preferred_element_type=jnp.float32)
    rel_w = _abs_to_rel(p)
    ctx = ctx + jnp.einsum("bhtr,rd->bhtd", rel_w.astype(jnp.bfloat16), rel_v,
                           preferred_element_type=jnp.float32)
    ctx = ctx.transpose(0, 2, 1, 3).reshape(b, t, n_heads * head_dim)
    return ctx.astype(jnp.bfloat16)


# ------------------------------ forward pass --------------------------------

def text_encoder_forward(params, phone, pitch, lengths, cfg, use_pallas=True):
    if use_pallas:
        lin, embf, lin_ln = linear, emb_phone_pitch, linear_res_ln
        conv1, conv2_ln, attn = ffn_conv1, ffn_conv2_res_ln, rel_attention
    else:
        lin, embf, lin_ln = _linear_ref, _emb_ref, _linear_res_ln_ref
        conv1, conv2_ln, attn = _ffn_conv1_ref, _ffn_conv2_res_ln_ref, _attn_ref

    b, t, _ = phone.shape
    H = cfg["hidden_channels"]
    nh = cfg["n_heads"]
    d = H // nh
    ks = cfg["kernel_size"]
    out_c = cfg["out_channels"]
    window = cfg["window_size"]
    pad_l, pad_r = (ks - 1) // 2, ks // 2

    lengths = lengths.astype(jnp.int32)
    seq_mask = (jnp.arange(t)[None, :] < lengths[:, None]).astype(jnp.float32)

    # embedding gather (glue) + fused linear/add/scale/leaky-relu kernel.
    # Padded rows are left untouched here: they never contaminate valid rows
    # (keys are masked in attention, conv inputs are masked, final proj is
    # masked), so the explicit entry mask of the torch code is dropped.
    pitch_emb = params["emb_pitch"][pitch]                    # [b, t, H]
    x = embf(phone.reshape(b * t, -1), pitch_emb.reshape(b * t, H),
             params["emb_phone_w"], params["emb_phone_b"], H).reshape(b, t, H)

    for layer in params["layers"]:
        # ---- attention: fused QKV projection (bf16 out), fused rel-pos ----
        x2 = x.reshape(b * t, H)
        qkv = lin(x2, layer["w_qkv"], layer["b_qkv"],
                  out_dtype=jnp.bfloat16).reshape(b, t, 3 * H)
        ctx = attn(qkv, lengths, layer["emb_rel_k"], layer["emb_rel_v"],
                   nh, d, window)                             # [b, t, H] bf16

        # out-projection + residual + LayerNorm fused in one kernel (f32 out)
        x = lin_ln(ctx.reshape(b * t, H), layer["wo"], layer["bo"],
                   x2, layer["g1"], layer["b1"]).reshape(b, t, H)

        # ---- FFN: conv1(+mask,+relu,+mask) and conv2(+residual,+LN) ----
        x_pad = jnp.pad(x, ((0, 0), (pad_l, pad_r), (0, 0)))
        h1 = conv1(x_pad, layer["w_ffn1"], layer["b_ffn1"], lengths, t, pad_l)
        h_pad = jnp.pad(h1, ((0, 0), (pad_l, pad_r), (0, 0)))
        x = conv2_ln(h_pad, layer["w_ffn2"], layer["b_ffn2"],
                     x, layer["g2"], layer["b2"])

    # final 1x1 projection; output masking fused into the transpose glue.
    stats = lin(x.reshape(b * t, H), params["proj_w"],
                params["proj_b"]).reshape(b, t, 2 * out_c)
    stats = stats * seq_mask[:, :, None]
    stats = jnp.transpose(stats, (0, 2, 1))                   # [b, 2*out, t]
    return stats[:, :out_c, :], stats[:, out_c:, :], seq_mask[:, None, :]


# ------------------------------ parameters ----------------------------------

def init_params(key, cfg):
    H = cfg["hidden_channels"]
    Fc = cfg["filter_channels"]
    nh = cfg["n_heads"]
    d = H // nh
    ks = cfg["kernel_size"]
    window = cfg["window_size"]
    emb_dim = cfg["embedding_dim"]
    out_c = cfg["out_channels"]
    bf = jnp.bfloat16

    keys = iter(jax.random.split(key, 1024))

    def nrm(shape, scl, dtype=jnp.float32):
        return (jax.random.normal(next(keys), shape, jnp.float32)
                * scl).astype(dtype)

    # matmul weights pre-cast to bf16 once (no per-forward astype pass).
    params = {
        "emb_phone_w": nrm((emb_dim, H), 1.0 / math.sqrt(emb_dim), bf),
        "emb_phone_b": nrm((H,), 0.02),
        "emb_pitch": nrm((256, H), 1.0),
        "proj_w": nrm((H, 2 * out_c), 1.0 / math.sqrt(H), bf),
        "proj_b": nrm((2 * out_c,), 0.02),
        "layers": [],
    }
    rel_std = d ** (-0.5)
    for _ in range(cfg["n_layers"]):
        params["layers"].append({
            "w_qkv": nrm((H, 3 * H), 1.0 / math.sqrt(H), bf),
            "b_qkv": nrm((3 * H,), 0.02),
            "wo": nrm((H, H), 1.0 / math.sqrt(H), bf),
            "bo": nrm((H,), 0.02),
            "emb_rel_k": nrm((1, 2 * window + 1, d), rel_std, bf),
            "emb_rel_v": nrm((1, 2 * window + 1, d), rel_std, bf),
            "g1": jnp.ones((H,), jnp.float32),
            "b1": jnp.zeros((H,), jnp.float32),
            "w_ffn1": nrm((ks, H, Fc), 1.0 / math.sqrt(ks * H), bf),
            "b_ffn1": nrm((Fc,), 0.02),
            "w_ffn2": nrm((ks, Fc, H), 1.0 / math.sqrt(ks * Fc), bf),
            "b_ffn2": nrm((H,), 0.02),
            "g2": jnp.ones((H,), jnp.float32),
            "b2": jnp.zeros((H,), jnp.float32),
        })
    return params


# --------------------------------- main --------------------------------------

if __name__ == "__main__":
    cfg = dict(out_channels=8, hidden_channels=32, filter_channels=64,
               n_heads=2, n_layers=2, kernel_size=3, p_dropout=0.0,
               embedding_dim=24, window_size=10)

    key = jax.random.PRNGKey(0)
    kp, kph, kpi = jax.random.split(key, 3)
    params = init_params(kp, cfg)

    B, T = 2, 16
    phone = jax.random.normal(kph, (B, T, cfg["embedding_dim"]), jnp.float32)
    pitch = jax.random.randint(kpi, (B, T), 0, 256)
    lengths = jnp.array([16, 11], dtype=jnp.int32)

    fwd = jax.jit(functools.partial(text_encoder_forward, cfg=cfg,
                                    use_pallas=True))
    m, logs, x_mask = fwd(params, phone, pitch, lengths)
    jax.block_until_ready((m, logs, x_mask))

    # pure-JAX reference (same bf16-input / f32-accumulate matmul regime, but
    # uses the classic pad/reshape skew for the relative-position path).
    m_r, logs_r, xm_r = text_encoder_forward(params, phone, pitch, lengths,
                                             cfg, use_pallas=False)
    assert m.shape == (B, cfg["out_channels"], T)
    assert logs.shape == (B, cfg["out_channels"], T)
    assert x_mask.shape == (B, 1, T)
    assert float(jnp.max(jnp.abs(m - m_r))) < 5e-2
    assert float(jnp.max(jnp.abs(logs - logs_r))) < 5e-2
    assert float(jnp.max(jnp.abs(x_mask - xm_r))) < 1e-6

    print("KERNEL_OK")
</pallas_src>

<mosaic_0001>
module attributes {stable_mosaic.version = 11 : i64} {
  func.func @_linear_kernel(%arg0: i32, %arg1: memref<32x32xf32, #tpu.memory_space<vmem>>, %arg2: memref<32x96xbf16, #tpu.memory_space<vmem>>, %arg3: memref<1x96xf32, #tpu.memory_space<vmem>>, %arg4: memref<32x96xbf16, #tpu.memory_space<vmem>>) attributes {dimension_semantics = [#tpu.dimension_semantics<parallel>], iteration_bounds = array<i64: 1>, scalar_prefetch = 0 : i64, scratch_operands = 0 : i64, tpu.core_type = #tpu.core_type<tc>, window_params = [{transform_indices = @transform_0, window_bounds = array<i64: 32, 32>}, {pipeline_mode = #tpu.pipeline_mode<synchronous>, transform_indices = @transform_1, window_bounds = array<i64: 32, 96>}, {pipeline_mode = #tpu.pipeline_mode<synchronous>, transform_indices = @transform_2, window_bounds = array<i64: 1, 96>}, {transform_indices = @transform_3, window_bounds = array<i64: 32, 96>}]} {
    %c0 = arith.constant 0 : index
    %c0_0 = arith.constant 0 : index
    %0 = vector.load %arg1[%c0, %c0_0] : memref<32x32xf32, #tpu.memory_space<vmem>>, vector<32x32xf32>
    %1 = arith.truncf %0 : vector<32x32xf32> to vector<32x32xbf16>
    %c0_1 = arith.constant 0 : index
    %c0_2 = arith.constant 0 : index
    %2 = vector.load %arg2[%c0_1, %c0_2] : memref<32x96xbf16, #tpu.memory_space<vmem>>, vector<32x96xbf16>
    %cst = arith.constant dense<0.000000e+00> : vector<32x96xf32>
    %3 = tpu.matmul %1, %2, %cst {dimension_numbers = #tpu.dot_dimension_numbers<[1], [0], [0], [1], [0, 0, 1, 1], [], []>} : vector<32x32xbf16>, vector<32x96xbf16>, vector<32x96xf32> -> vector<32x96xf32>
    %c0_3 = arith.constant 0 : index
    %c0_4 = arith.constant 0 : index
    %4 = vector.load %arg3[%c0_3, %c0_4] : memref<1x96xf32, #tpu.memory_space<vmem>>, vector<1x96xf32>
    %5 = vector.broadcast %4 : vector<1x96xf32> to vector<32x96xf32>
    %6 = arith.addf %3, %5 : vector<32x96xf32>
    %7 = arith.truncf %6 : vector<32x96xf32> to vector<32x96xbf16>
    %c0_5 = arith.constant 0 : index
    %c0_6 = arith.constant 0 : index
    %8 = vector.load %arg4[%c0_5, %c0_6] : memref<32x96xbf16, #tpu.memory_space<vmem>>, vector<32x96xbf16>
    tpu.vector_store %arg4[%c0_5, %c0_6], %7 {strides = array<i32>} : memref<32x96xbf16, #tpu.memory_space<vmem>>, vector<32x96xbf16>,
    return
  }
  func.func @transform_0(%arg0: i32) -> (i32, i32) {
    %c0_i32 = arith.constant 0 : i32
    %c0_i32_0 = arith.constant 0 : i32
    return %arg0, %c0_i32 : i32, i32
  }
  func.func @transform_1(%arg0: i32) -> (i32, i32) {
    %c0_i32 = arith.constant 0 : i32
    %c0_i32_0 = arith.constant 0 : i32
    %c0_i32_1 = arith.constant 0 : i32
    return %c0_i32, %c0_i32_0 : i32, i32
  }
  func.func @transform_2(%arg0: i32) -> (i32, i32) {
    %c0_i32 = arith.constant 0 : i32
    %c0_i32_0 = arith.constant 0 : i32
    %c0_i32_1 = arith.constant 0 : i32
    return %c0_i32, %c0_i32_0 : i32, i32
  }
  func.func @transform_3(%arg0: i32) -> (i32, i32) {
    %c0_i32 = arith.constant 0 : i32
    %c0_i32_0 = arith.constant 0 : i32
    return %arg0, %c0_i32 : i32, i32
  }
}

module attributes {stable_mosaic.version = 11 : i64} {
  func.func @_emb_kernel(%arg0: i32, %arg1: memref<32x24xf32, #tpu.memory_space<vmem>>, %arg2: memref<32x32xf32, #tpu.memory_space<vmem>>, %arg3: memref<24x32xbf16, #tpu.memory_space<vmem>>, %arg4: memref<1x32xf32, #tpu.memory_space<vmem>>, %arg5: memref<32x32xf32, #tpu.memory_space<vmem>>) attributes {dimension_semantics = [#tpu.dimension_semantics<parallel>], iteration_bounds = array<i64: 1>, scalar_prefetch = 0 : i64, scratch_operands = 0 : i64, tpu.core_type = #tpu.core_type<tc>, window_params = [{transform_indices = @transform_0, window_bounds = array<i64: 32, 24>}, {transform_indices = @transform_1, window_bounds = array<i64: 32, 32>}, {pipeline_mode = #tpu.pipeline_mode<synchronous>, transform_indices = @transform_2, window_bounds = array<i64: 24, 32>}, {pipeline_mode = #tpu.pipeline_mode<synchronous>, transform_indices = @transform_3, window_bounds = array<i64: 1, 32>}, {transform_indices = @transform_4, window_bounds = array<i64: 32, 32>}]} {
    %c0 = arith.constant 0 : index
    %c0_0 = arith.constant 0 : index
    %0 = vector.load %arg1[%c0, %c0_0] : memref<32x24xf32, #tpu.memory_space<vmem>>, vector<32x24xf32>
    %1 = arith.truncf %0 : vector<32x24xf32> to vector<32x24xbf16>
    %c0_1 = arith.constant 0 : index
    %c0_2 = arith.constant 0 : index
    %2 = vector.load %arg3[%c0_1, %c0_2] : memref<24x32xbf16, #tpu.memory_space<vmem>>, vector<24x32xbf16>
    %cst = arith.constant dense<0.000000e+00> : vector<32x32xf32>
    %3 = tpu.matmul %1, %2, %cst {dimension_numbers = #tpu.dot_dimension_numbers<[1], [0], [0], [1], [0, 0, 1, 1], [], []>} : vector<32x24xbf16>, vector<24x32xbf16>, vector<32x32xf32> -> vector<32x32xf32>
    %c0_3 = arith.constant 0 : index
    %c0_4 = arith.constant 0 : index
    %4 = vector.load %arg4[%c0_3, %c0_4] : memref<1x32xf32, #tpu.memory_space<vmem>>, vector<1x32xf32>
    %5 = vector.broadcast %4 : vector<1x32xf32> to vector<32x32xf32>
    %6 = arith.addf %3, %5 : vector<32x32xf32>
    %c0_5 = arith.constant 0 : index
    %c0_6 = arith.constant 0 : index
    %7 = vector.load %arg2[%c0_5, %c0_6] : memref<32x32xf32, #tpu.memory_space<vmem>>, vector<32x32xf32>
    %8 = arith.addf %6, %7 : vector<32x32xf32>
    %cst_7 = arith.constant 5.65685415 : f32
    %9 = vector.broadcast %cst_7 : f32 to vector<32x32xf32>
    %10 = arith.mulf %8, %9 : vector<32x32xf32>
    %cst_8 = arith.constant 0.000000e+00 : f32
    %11 = vector.broadcast %cst_8 : f32 to vector<32x32xf32>
    %12 = arith.cmpf oge, %10, %11 : vector<32x32xf32>
    %cst_9 = arith.constant 1.000000e-01 : f32
    %13 = vector.broadcast %cst_9 : f32 to vector<32x32xf32>
    %14 = arith.mulf %13, %10 : vector<32x32xf32>
    %15 = arith.select %12, %10, %14 : vector<32x32xi1>, vector<32x32xf32>
    %c0_10 = arith.constant 0 : index
    %c0_11 = arith.constant 0 : index
    %16 = vector.load %arg5[%c0_10, %c0_11] : memref<32x32xf32, #tpu.memory_space<vmem>>, vector<32x32xf32>
    tpu.vector_store %arg5[%c0_10, %c0_11], %15 {strides = array<i32>} : memref<32x32xf32, #tpu.memory_space<vmem>>, vector<32x32xf32>,
    return
  }
  func.func @transform_0(%arg0: i32) -> (i32, i32) {
    %c0_i32 = arith.constant 0 : i32
    %c0_i32_0 = arith.constant 0 : i32
    return %arg0, %c0_i32 : i32, i32
  }
  func.func @transform_1(%arg0: i32) -> (i32, i32) {
    %c0_i32 = arith.constant 0 : i32
    %c0_i32_0 = arith.constant 0 : i32
    return %arg0, %c0_i32 : i32, i32
  }
  func.func @transform_2(%arg0: i32) -> (i32, i32) {
    %c0_i32 = arith.constant 0 : i32
    %c0_i32_0 = arith.constant 0 : i32
    %c0_i32_1 = arith.constant 0 : i32
    return %c0_i32, %c0_i32_0 : i32, i32
  }
  func.func @transform_3(%arg0: i32) -> (i32, i32) {
    %c0_i32 = arith.constant 0 : i32
    %c0_i32_0 = arith.constant 0 : i32
    %c0_i32_1 = arith.constant 0 : i32
    return %c0_i32, %c0_i32_0 : i32, i32
  }
  func.func @transform_4(%arg0: i32) -> (i32, i32) {
    %c0_i32 = arith.constant 0 : i32
    %c0_i32_0 = arith.constant 0 : i32
    return %arg0, %c0_i32 : i32, i32
  }
}

module attributes {stable_mosaic.version = 11 : i64} {
  func.func @_linear_res_ln_kernel(%arg0: i32, %arg1: memref<32x32xbf16, #tpu.memory_space<vmem>>, %arg2: memref<32x32xbf16, #tpu.memory_space<vmem>>, %arg3: memref<1x32xf32, #tpu.memory_space<vmem>>, %arg4: memref<32x32xf32, #tpu.memory_space<vmem>>, %arg5: memref<1x32xf32, #tpu.memory_space<vmem>>, %arg6: memref<1x32xf32, #tpu.memory_space<vmem>>, %arg7: memref<32x32xf32, #tpu.memory_space<vmem>>) attributes {dimension_semantics = [#tpu.dimension_semantics<parallel>], iteration_bounds = array<i64: 1>, scalar_prefetch = 0 : i64, scratch_operands = 0 : i64, tpu.core_type = #tpu.core_type<tc>, window_params = [{transform_indices = @transform_0, window_bounds = array<i64: 32, 32>}, {pipeline_mode = #tpu.pipeline_mode<synchronous>, transform_indices = @transform_1, window_bounds = array<i64: 32, 32>}, {pipeline_mode = #tpu.pipeline_mode<synchronous>, transform_indices = @transform_2, window_bounds = array<i64: 1, 32>}, {transform_indices = @transform_3, window_bounds = array<i64: 32, 32>}, {pipeline_mode = #tpu.pipeline_mode<synchronous>, transform_indices = @transform_4, window_bounds = array<i64: 1, 32>}, {pipeline_mode = #tpu.pipeline_mode<synchronous>, transform_indices = @transform_5, window_bounds = array<i64: 1, 32>}, {transform_indices = @transform_6, window_bounds = array<i64: 32, 32>}]} {
    %c0 = arith.constant 0 : index
    %c0_0 = arith.constant 0 : index
    %0 = vector.load %arg1[%c0, %c0_0] : memref<32x32xbf16, #tpu.memory_space<vmem>>, vector<32x32xbf16>
    %c0_1 = arith.constant 0 : index
    %c0_2 = arith.constant 0 : index
    %1 = vector.load %arg2[%c0_1, %c0_2] : memref<32x32xbf16, #tpu.memory_space<vmem>>, vector<32x32xbf16>
    %cst = arith.constant dense<0.000000e+00> : vector<32x32xf32>
    %2 = tpu.matmul %0, %1, %cst {dimension_numbers = #tpu.dot_dimension_numbers<[1], [0], [0], [1], [0, 0, 1, 1], [], []>} : vector<32x32xbf16>, vector<32x32xbf16>, vector<32x32xf32> -> vector<32x32xf32>
    %c0_3 = arith.constant 0 : index
    %c0_4 = arith.constant 0 : index
    %3 = vector.load %arg4[%c0_3, %c0_4] : memref<32x32xf32, #tpu.memory_space<vmem>>, vector<32x32xf32>
    %4 = arith.addf %3, %2 : vector<32x32xf32>
    %c0_5 = arith.constant 0 : index
    %c0_6 = arith.constant 0 : index
    %5 = vector.load %arg3[%c0_5, %c0_6] : memref<1x32xf32, #tpu.memory_space<vmem>>, vector<1x32xf32>
    %6 = vector.broadcast %5 : vector<1x32xf32> to vector<32x32xf32>
    %7 = arith.addf %4, %6 : vector<32x32xf32>
    %cst_7 = arith.constant dense<0.000000e+00> : vector<32xf32>
    %8 = vector.multi_reduction <add>, %7, %cst_7 [1] : vector<32x32xf32> to vector<32xf32>
    %9 = vector.shape_cast %8 : vector<32xf32> to vector<32x1xf32>
    %cst_8 = arith.constant 3.200000e+01 : f32
    %10 = vector.broadcast %cst_8 : f32 to vector<32x1xf32>
    %11 = arith.divf %9, %10 : vector<32x1xf32>
    %12 = vector.broadcast %11 : vector<32x1xf32> to vector<32x32xf32>
    %13 = arith.subf %7, %12 : vector<32x32xf32>
    %14 = arith.mulf %13, %13 : vector<32x32xf32>
    %cst_9 = arith.constant dense<0.000000e+00> : vector<32xf32>
    %15 = vector.multi_reduction <add>, %14, %cst_9 [1] : vector<32x32xf32> to vector<32xf32>
    %16 = vector.shape_cast %15 : vector<32xf32> to vector<32x1xf32>
    %cst_10 = arith.constant 3.200000e+01 : f32
    %17 = vector.broadcast %cst_10 : f32 to vector<32x1xf32>
    %18 = arith.divf %16, %17 : vector<32x1xf32>
    %19 = vector.broadcast %11 : vector<32x1xf32> to vector<32x32xf32>
    %20 = arith.subf %7, %19 : vector<32x32xf32>
    %cst_11 = arith.constant 9.99999974E-6 : f32
    %21 = vector.broadcast %cst_11 : f32 to vector<32x1xf32>
    %22 = arith.addf %18, %21 : vector<32x1xf32>
    %23 = math.rsqrt %22 : vector<32x1xf32>
    %24 = vector.broadcast %23 : vector<32x1xf32> to vector<32x32xf32>
    %25 = arith.mulf %20, %24 : vector<32x32xf32>
    %c0_12 = arith.constant 0 : index
    %c0_13 = arith.constant 0 : index
    %26 = vector.load %arg5[%c0_12, %c0_13] : memref<1x32xf32, #tpu.memory_space<vmem>>, vector<1x32xf32>
    %27 = vector.broadcast %26 : vector<1x32xf32> to vector<32x32xf32>
    %28 = arith.mulf %25, %27 : vector<32x32xf32>
    %c0_14 = arith.constant 0 : index
    %c0_15 = arith.constant 0 : index
    %29 = vector.load %arg6[%c0_14, %c0_15] : memref<1x32xf32, #tpu.memory_space<vmem>>, vector<1x32xf32>
    %30 = vector.broadcast %29 : vector<1x32xf32> to vector<32x32xf32>
    %31 = arith.addf %28, %30 : vector<32x32xf32>
    %c0_16 = arith.constant 0 : index
    %c0_17 = arith.constant 0 : index
    %32 = vector.load %arg7[%c0_16, %c0_17] : memref<32x32xf32, #tpu.memory_space<vmem>>, vector<32x32xf32>
    tpu.vector_store %arg7[%c0_16, %c0_17], %31 {strides = array<i32>} : memref<32x32xf32, #tpu.memory_space<vmem>>, vector<32x32xf32>,
    return
  }
  func.func @transform_0(%arg0: i32) -> (i32, i32) {
    %c0_i32 = arith.constant 0 : i32
    %c0_i32_0 = arith.constant 0 : i32
    return %arg0, %c0_i32 : i32, i32
  }
  func.func @transform_1(%arg0: i32) -> (i32, i32) {
    %c0_i32 = arith.constant 0 : i32
    %c0_i32_0 = arith.constant 0 : i32
    %c0_i32_1 = arith.constant 0 : i32
    return %c0_i32, %c0_i32_0 : i32, i32
  }
  func.func @transform_2(%arg0: i32) -> (i32, i32) {
    %c0_i32 = arith.constant 0 : i32
    %c0_i32_0 = arith.constant 0 : i32
    %c0_i32_1 = arith.constant 0 : i32
    return %c0_i32, %c0_i32_0 : i32, i32
  }
  func.func @transform_3(%arg0: i32) -> (i32, i32) {
    %c0_i32 = arith.constant 0 : i32
    %c0_i32_0 = arith.constant 0 : i32
    return %arg0, %c0_i32 : i32, i32
  }
  func.func @transform_4(%arg0: i32) -> (i32, i32) {
    %c0_i32 = arith.constant 0 : i32
    %c0_i32_0 = arith.constant 0 : i32
    %c0_i32_1 = arith.constant 0 : i32
    return %c0_i32, %c0_i32_0 : i32, i32
  }
  func.func @transform_5(%arg0: i32) -> (i32, i32) {
    %c0_i32 = arith.constant 0 : i32
    %c0_i32_0 = arith.constant 0 : i32
    %c0_i32_1 = arith.constant 0 : i32
    return %c0_i32, %c0_i32_0 : i32, i32
  }
  func.func @transform_6(%arg0: i32) -> (i32, i32) {
    %c0_i32 = arith.constant 0 : i32
    %c0_i32_0 = arith.constant 0 : i32
    return %arg0, %c0_i32 : i32, i32
  }
}

module attributes {stable_mosaic.version = 11 : i64} {
  func.func @_attn_kernel(%arg0: i32, %arg1: memref<2xi32, #tpu.memory_space<smem>>, %arg2: memref<1x16x96xbf16, #tpu.memory_space<vmem>>, %arg3: memref<21x16xbf16, #tpu.memory_space<vmem>>, %arg4: memref<21x16xbf16, #tpu.memory_space<vmem>>, %arg5: memref<1x16x32xbf16, #tpu.memory_space<vmem>>) attributes {dimension_semantics = [#tpu.dimension_semantics<parallel>], iteration_bounds = array<i64: 2>, scalar_prefetch = 1 : i64, scratch_operands = 0 : i64, tpu.core_type = #tpu.core_type<tc>, window_params = [{transform_indices = @transform_0, window_bounds = array<i64: 1, 16, 96>}, {pipeline_mode = #tpu.pipeline_mode<synchronous>, transform_indices = @transform_1, window_bounds = array<i64: 21, 16>}, {pipeline_mode = #tpu.pipeline_mode<synchronous>, transform_indices = @transform_2, window_bounds = array<i64: 21, 16>}, {transform_indices = @transform_3, window_bounds = array<i64: 1, 16, 32>}]} {
    %0 = arith.index_cast %arg0 : i32 to index
    %1 = memref.load %arg1[%0] : memref<2xi32, #tpu.memory_space<smem>>
    %2 = tpu.iota {dimensions = array<i32: 0>} : vector<16x16xi32>
    %3 = tpu.iota {dimensions = array<i32: 1>} : vector<16x16xi32>
    %4 = arith.subi %3, %2 : vector<16x16xi32>
    %5 = vector.broadcast %1 : i32 to vector<16x16xi32>
    %6 = arith.cmpi slt, %3, %5 : vector<16x16xi32>
    %c0 = arith.constant 0 : index
    %c0_0 = arith.constant 0 : index
    %7 = vector.load %arg3[%c0, %c0_0] : memref<21x16xbf16, #tpu.memory_space<vmem>>, vector<21x16xbf16>
    %c0_1 = arith.constant 0 : index
    %c0_2 = arith.constant 0 : index
    %8 = vector.load %arg4[%c0_1, %c0_2] : memref<21x16xbf16, #tpu.memory_space<vmem>>, vector<21x16xbf16>
    %9 = arith.extf %8 : vector<21x16xbf16> to vector<21x16xf32>
    %c0_3 = arith.constant 0 : index
    %c0_4 = arith.constant 0 : index
    %c0_5 = arith.constant 0 : index
    %10 = vector.load %arg2[%c0_3, %c0_4, %c0_5] : memref<1x16x96xbf16, #tpu.memory_space<vmem>>, vector<1x16x16xbf16>
    %11 = vector.shape_cast %10 : vector<1x16x16xbf16> to vector<16x16xbf16>
    %cst = arith.constant 2.500000e-01 : bf16
    %12 = vector.broadcast %cst : bf16 to vector<16x16xbf16>
    %13 = arith.mulf %11, %12 : vector<16x16xbf16>
    %c0_6 = arith.constant 0 : index
    %c0_7 = arith.constant 0 : index
    %c32 = arith.constant 32 : index
    %14 = vector.load %arg2[%c0_6, %c0_7, %c32] : memref<1x16x96xbf16, #tpu.memory_space<vmem>>, vector<1x16x16xbf16>
    %15 = vector.shape_cast %14 : vector<1x16x16xbf16> to vector<16x16xbf16>
    %c0_8 = arith.constant 0 : index
    %c0_9 = arith.constant 0 : index
    %c64 = arith.constant 64 : index
    %16 = vector.load %arg2[%c0_8, %c0_9, %c64] : memref<1x16x96xbf16, #tpu.memory_space<vmem>>, vector<1x16x16xbf16>
    %17 = vector.shape_cast %16 : vector<1x16x16xbf16> to vector<16x16xbf16>
    %cst_10 = arith.constant dense<0.000000e+00> : vector<16x16xf32>
    %18 = tpu.matmul %13, %15, %cst_10 {dimension_numbers = #tpu.dot_dimension_numbers<[1], [1], [0], [0], [0, 0, 1, 0], [], []>} : vector<16x16xbf16>, vector<16x16xbf16>, vector<16x16xf32> -> vector<16x16xf32>
    %cst_11 = arith.constant dense<0.000000e+00> : vector<16x21xf32>
    %19 = tpu.matmul %13, %7, %cst_11 {dimension_numbers = #tpu.dot_dimension_numbers<[1], [1], [0], [0], [0, 0, 1, 0], [], []>} : vector<16x16xbf16>, vector<21x16xbf16>, vector<16x21xf32> -> vector<16x21xf32>
    %c-10_i32 = arith.constant -10 : i32
    %20 = vector.broadcast %c-10_i32 : i32 to vector<16x16xi32>
    %21 = arith.cmpi eq, %4, %20 : vector<16x16xi32>
    %22 = vector.extract_strided_slice %19 {offsets = [0, 0], sizes = [16, 1], strides = [1, 1]} : vector<16x21xf32> to vector<16x1xf32>
    %cst_12 = arith.constant 0.000000e+00 : f32
    %23 = vector.shape_cast %22 : vector<16x1xf32> to vector<16x1xf32>
    %24 = vector.broadcast %23 : vector<16x1xf32> to vector<16x16xf32>
    %25 = vector.broadcast %cst_12 : f32 to vector<16x16xf32>
    %26 = arith.select %21, %24, %25 : vector<16x16xi1>, vector<16x16xf32>
    %27 = arith.addf %18, %26 : vector<16x16xf32>
    %c-9_i32 = arith.constant -9 : i32
    %28 = vector.broadcast %c-9_i32 : i32 to vector<16x16xi32>
    %29 = arith.cmpi eq, %4, %28 : vector<16x16xi32>
    %30 = vector.extract_strided_slice %19 {offsets = [0, 1], sizes = [16, 1], strides = [1, 1]} : vector<16x21xf32> to vector<16x1xf32>
    %cst_13 = arith.constant 0.000000e+00 : f32
    %31 = vector.shape_cast %30 : vector<16x1xf32> to vector<16x1xf32>
    %32 = vector.broadcast %31 : vector<16x1xf32> to vector<16x16xf32>
    %33 = vector.broadcast %cst_13 : f32 to vector<16x16xf32>
    %34 = arith.select %29, %32, %33 : vector<16x16xi1>, vector<16x16xf32>
    %35 = arith.addf %27, %34 : vector<16x16xf32>
    %c-8_i32 = arith.constant -8 : i32
    %36 = vector.broadcast %c-8_i32 : i32 to vector<16x16xi32>
    %37 = arith.cmpi eq, %4, %36 : vector<16x16xi32>
    %38 = vector.extract_strided_slice %19 {offsets = [0, 2], sizes = [16, 1], strides = [1, 1]} : vector<16x21xf32> to vector<16x1xf32>
    %cst_14 = arith.constant 0.000000e+00 : f32
    %39 = vector.shape_cast %38 : vector<16x1xf32> to vector<16x1xf32>
    %40 = vector.broadcast %39 : vector<16x1xf32> to vector<16x16xf32>
    %41 = vector.broadcast %cst_14 : f32 to vector<16x16xf32>
    %42 = arith.select %37, %40, %41 : vector<16x16xi1>, vector<16x16xf32>
    %43 = arith.addf %35, %42 : vector<16x16xf32>
    %c-7_i32 = arith.constant -7 : i32
    %44 = vector.broadcast %c-7_i32 : i32 to vector<16x16xi32>
    %45 = arith.cmpi eq, %4, %44 : vector<16x16xi32>
    %46 = vector.extract_strided_slice %19 {offsets = [0, 3], sizes = [16, 1], strides = [1, 1]} : vector<16x21xf32> to vector<16x1xf32>
    %cst_15 = arith.constant 0.000000e+00 : f32
    %47 = vector.shape_cast %46 : vector<16x1xf32> to vector<16x1xf32>
    %48 = vector.broadcast %47 : vector<16x1xf32> to vector<16x16xf32>
    %49 = vector.broadcast %cst_15 : f32 to vector<16x16xf32>
    %50 = arith.select %45, %48, %49 : vector<16x16xi1>, vector<16x16xf32>
    %51 = arith.addf %43, %50 : vector<16x16xf32>
    %c-6_i32 = arith.constant -6 : i32
    %52 = vector.broadcast %c-6_i32 : i32 to vector<16x16xi32>
    %53 = arith.cmpi eq, %4, %52 : vector<16x16xi32>
    %54 = vector.extract_strided_slice %19 {offsets = [0, 4], sizes = [16, 1], strides = [1, 1]} : vector<16x21xf32> to vector<16x1xf32>
    %cst_16 = arith.constant 0.000000e+00 : f32
    %55 = vector.shape_cast %54 : vector<16x1xf32> to vector<16x1xf32>
    %56 = vector.broadcast %55 : vector<16x1xf32> to vector<16x16xf32>
    %57 = vector.broadcast %cst_16 : f32 to vector<16x16xf32>
    %58 = arith.select %53, %56, %57 : vector<16x16xi1>, vector<16x16xf32>
    %59 = arith.addf %51, %58 : vector<16x16xf32>
    %c-5_i32 = arith.constant -5 : i32
    %60 = vector.broadcast %c-5_i32 : i32 to vector<16x16xi32>
    %61 = arith.cmpi eq, %4, %60 : vector<16x16xi32>
    %62 = vector.extract_strided_slice %19 {offsets = [0, 5], sizes = [16, 1], strides = [1, 1]} : vector<16x21xf32> to vector<16x1xf32>
    %cst_17 = arith.constant 0.000000e+00 : f32
    %63 = vector.shape_cast %62 : vector<16x1xf32> to vector<16x1xf32>
    %64 = vector.broadcast %63 : vector<16x1xf32> to vector<16x16xf32>
    %65 = vector.broadcast %cst_17 : f32 to vector<16x16xf32>
    %66 = arith.select %61, %64, %65 : vector<16x16xi1>, vector<16x16xf32>
    %67 = arith.addf %59, %66 : vector<16x16xf32>
    %c-4_i32 = arith.constant -4 : i32
    %68 = vector.broadcast %c-4_i32 : i32 to vector<16x16xi32>
    %69 = arith.cmpi eq, %4, %68 : vector<16x16xi32>
    %70 = vector.extract_strided_slice %19 {offsets = [0, 6], sizes = [16, 1], strides = [1, 1]} : vector<16x21xf32> to vector<16x1xf32>
    %cst_18 = arith.constant 0.000000e+00 : f32
    %71 = vector.shape_cast %70 : vector<16x1xf32> to vector<16x1xf32>
    %72 = vector.broadcast %71 : vector<16x1xf32> to vector<16x16xf32>
    %73 = vector.broadcast %cst_18 : f32 to vector<16x16xf32>
    %74 = arith.select %69, %72, %73 : vector<16x16xi1>, vector<16x16xf32>
    %75 = arith.addf %67, %74 : vector<16x16xf32>
    %c-3_i32 = arith.constant -3 : i32
    %76 = vector.broadcast %c-3_i32 : i32 to vector<16x16xi32>
    %77 = arith.cmpi eq, %4, %76 : vector<16x16xi32>
    %78 = vector.extract_strided_slice %19 {offsets = [0, 7], sizes = [16, 1], strides = [1, 1]} : vector<16x21xf32> to vector<16x1xf32>
    %cst_19 = arith.constant 0.000000e+00 : f32
    %79 = vector.shape_cast %78 : vector<16x1xf32> to vector<16x1xf32>
    %80 = vector.broadcast %79 : vector<16x1xf32> to vector<16x16xf32>
    %81 = vector.broadcast %cst_19 : f32 to vector<16x16xf32>
    %82 = arith.select %77, %80, %81 : vector<16x16xi1>, vector<16x16xf32>
    %83 = arith.addf %75, %82 : vector<16x16xf32>
    %c-2_i32 = arith.constant -2 : i32
    %84 = vector.broadcast %c-2_i32 : i32 to vector<16x16xi32>
    %85 = arith.cmpi eq, %4, %84 : vector<16x16xi32>
    %86 = vector.extract_strided_slice %19 {offsets = [0, 8], sizes = [16, 1], strides = [1, 1]} : vector<16x21xf32> to vector<16x1xf32>
    %cst_20 = arith.constant 0.000000e+00 : f32
    %87 = vector.shape_cast %86 : vector<16x1xf32> to vector<16x1xf32>
    %88 = vector.broadcast %87 : vector<16x1xf32> to vector<16x16xf32>
    %89 = vector.broadcast %cst_20 : f32 to vector<16x16xf32>
    %90 = arith.select %85, %88, %89 : vector<16x16xi1>, vector<16x16xf32>
    %91 = arith.addf %83, %90 : vector<16x16xf32>
    %c-1_i32 = arith.constant -1 : i32
    %92 = vector.broadcast %c-1_i32 : i32 to vector<16x16xi32>
    %93 = arith.cmpi eq, %4, %92 : vector<16x16xi32>
    %94 = vector.extract_strided_slice %19 {offsets = [0, 9], sizes = [16, 1], strides = [1, 1]} : vector<16x21xf32> to vector<16x1xf32>
    %cst_21 = arith.constant 0.000000e+00 : f32
    %95 = vector.shape_cast %94 : vector<16x1xf32> to vector<16x1xf32>
    %96 = vector.broadcast %95 : vector<16x1xf32> to vector<16x16xf32>
    %97 = vector.broadcast %cst_21 : f32 to vector<16x16xf32>
    %98 = arith.select %93, %96, %97 : vector<16x16xi1>, vector<16x16xf32>
    %99 = arith.addf %91, %98 : vector<16x16xf32>
    %c0_i32 = arith.constant 0 : i32
    %100 = vector.broadcast %c0_i32 : i32 to vector<16x16xi32>
    %101 = arith.cmpi eq, %4, %100 : vector<16x16xi32>
    %102 = vector.extract_strided_slice %19 {offsets = [0, 10], sizes = [16, 1], strides = [1, 1]} : vector<16x21xf32> to vector<16x1xf32>
    %cst_22 = arith.constant 0.000000e+00 : f32
    %103 = vector.shape_cast %102 : vector<16x1xf32> to vector<16x1xf32>
    %104 = vector.broadcast %103 : vector<16x1xf32> to vector<16x16xf32>
    %105 = vector.broadcast %cst_22 : f32 to vector<16x16xf32>
    %106 = arith.select %101, %104, %105 : vector<16x16xi1>, vector<16x16xf32>
    %107 = arith.addf %99, %106 : vector<16x16xf32>
    %c1_i32 = arith.constant 1 : i32
    %108 = vector.broadcast %c1_i32 : i32 to vector<16x16xi32>
    %109 = arith.cmpi eq, %4, %108 : vector<16x16xi32>
    %110 = vector.extract_strided_slice %19 {offsets = [0, 11], sizes = [16, 1], strides = [1, 1]} : vector<16x21xf32> to vector<16x1xf32>
    %cst_23 = arith.constant 0.000000e+00 : f32
    %111 = vector.shape_cast %110 : vector<16x1xf32> to vector<16x1xf32>
    %112 = vector.broadcast %111 : vector<16x1xf32> to vector<16x16xf32>
    %113 = vector.broadcast %cst_23 : f32 to vector<16x16xf32>
    %114 = arith.select %109, %112, %113 : vector<16x16xi1>, vector<16x16xf32>
    %115 = arith.addf %107, %114 : vector<16x16xf32>
    %c2_i32 = arith.constant 2 : i32
    %116 = vector.broadcast %c2_i32 : i32 to vector<16x16xi32>
    %117 = arith.cmpi eq, %4, %116 : vector<16x16xi32>
    %118 = vector.extract_strided_slice %19 {offsets = [0, 12], sizes = [16, 1], strides = [1, 1]} : vector<16x21xf32> to vector<16x1xf32>
    %cst_24 = arith.constant 0.000000e+00 : f32
    %119 = vector.shape_cast %118 : vector<16x1xf32> to vector<16x1xf32>
    %120 = vector.broadcast %119 : vector<16x1xf32> to vector<16x16xf32>
    %121 = vector.broadcast %cst_24 : f32 to vector<16x16xf32>
    %122 = arith.select %117, %120, %121 : vector<16x16xi1>, vector<16x16xf32>
    %123 = arith.addf %115, %122 : vector<16x16xf32>
    %c3_i32 = arith.constant 3 : i32
    %124 = vector.broadcast %c3_i32 : i32 to vector<16x16xi32>
    %125 = arith.cmpi eq, %4, %124 : vector<16x16xi32>
    %126 = vector.extract_strided_slice %19 {offsets = [0, 13], sizes = [16, 1], strides = [1, 1]} : vector<16x21xf32> to vector<16x1xf32>
    %cst_25 = arith.constant 0.000000e+00 : f32
    %127 = vector.shape_cast %126 : vector<16x1xf32> to vector<16x1xf32>
    %128 = vector.broadcast %127 : vector<16x1xf32> to vector<16x16xf32>
    %129 = vector.broadcast %cst_25 : f32 to vector<16x16xf32>
    %130 = arith.select %125, %128, %129 : vector<16x16xi1>, vector<16x16xf32>
    %131 = arith.addf %123, %130 : vector<16x16xf32>
    %c4_i32 = arith.constant 4 : i32
    %132 = vector.broadcast %c4_i32 : i32 to vector<16x16xi32>
    %133 = arith.cmpi eq, %4, %132 : vector<16x16xi32>
    %134 = vector.extract_strided_slice %19 {offsets = [0, 14], sizes = [16, 1], strides = [1, 1]} : vector<16x21xf32> to vector<16x1xf32>
    %cst_26 = arith.constant 0.000000e+00 : f32
    %135 = vector.shape_cast %134 : vector<16x1xf32> to vector<16x1xf32>
    %136 = vector.broadcast %135 : vector<16x1xf32> to vector<16x16xf32>
    %137 = vector.broadcast %cst_26 : f32 to vector<16x16xf32>
    %138 = arith.select %133, %136, %137 : vector<16x16xi1>, vector<16x16xf32>
    %139 = arith.addf %131, %138 : vector<16x16xf32>
    %c5_i32 = arith.constant 5 : i32
    %140 = vector.broadcast %c5_i32 : i32 to vector<16x16xi32>
    %141 = arith.cmpi eq, %4, %140 : vector<16x16xi32>
    %142 = vector.extract_strided_slice %19 {offsets = [0, 15], sizes = [16, 1], strides = [1, 1]} : vector<16x21xf32> to vector<16x1xf32>
    %cst_27 = arith.constant 0.000000e+00 : f32
    %143 = vector.shape_cast %142 : vector<16x1xf32> to vector<16x1xf32>
    %144 = vector.broadcast %143 : vector<16x1xf32> to vector<16x16xf32>
    %145 = vector.broadcast %cst_27 : f32 to vector<16x16xf32>
    %146 = arith.select %141, %144, %145 : vector<16x16xi1>, vector<16x16xf32>
    %147 = arith.addf %139, %146 : vector<16x16xf32>
    %c6_i32 = arith.constant 6 : i32
    %148 = vector.broadcast %c6_i32 : i32 to vector<16x16xi32>
    %149 = arith.cmpi eq, %4, %148 : vector<16x16xi32>
    %150 = vector.extract_strided_slice %19 {offsets = [0, 16], sizes = [16, 1], strides = [1, 1]} : vector<16x21xf32> to vector<16x1xf32>
    %cst_28 = arith.constant 0.000000e+00 : f32
    %151 = vector.shape_cast %150 : vector<16x1xf32> to vector<16x1xf32>
    %152 = vector.broadcast %151 : vector<16x1xf32> to vector<16x16xf32>
    %153 = vector.broadcast %cst_28 : f32 to vector<16x16xf32>
    %154 = arith.select %149, %152, %153 : vector<16x16xi1>, vector<16x16xf32>
    %155 = arith.addf %147, %154 : vector<16x16xf32>
    %c7_i32 = arith.constant 7 : i32
    %156 = vector.broadcast %c7_i32 : i32 to vector<16x16xi32>
    %157 = arith.cmpi eq, %4, %156 : vector<16x16xi32>
    %158 = vector.extract_strided_slice %19 {offsets = [0, 17], sizes = [16, 1], strides = [1, 1]} : vector<16x21xf32> to vector<16x1xf32>
    %cst_29 = arith.constant 0.000000e+00 : f32
    %159 = vector.shape_cast %158 : vector<16x1xf32> to vector<16x1xf32>
    %160 = vector.broadcast %159 : vector<16x1xf32> to vector<16x16xf32>
    %161 = vector.broadcast %cst_29 : f32 to vector<16x16xf32>
    %162 = arith.select %157, %160, %161 : vector<16x16xi1>, vector<16x16xf32>
    %163 = arith.addf %155, %162 : vector<16x16xf32>
    %c8_i32 = arith.constant 8 : i32
    %164 = vector.broadcast %c8_i32 : i32 to vector<16x16xi32>
    %165 = arith.cmpi eq, %4, %164 : vector<16x16xi32>
    %166 = vector.extract_strided_slice %19 {offsets = [0, 18], sizes = [16, 1], strides = [1, 1]} : vector<16x21xf32> to vector<16x1xf32>
    %cst_30 = arith.constant 0.000000e+00 : f32
    %167 = vector.shape_cast %166 : vector<16x1xf32> to vector<16x1xf32>
    %168 = vector.broadcast %167 : vector<16x1xf32> to vector<16x16xf32>
    %169 = vector.broadcast %cst_30 : f32 to vector<16x16xf32>
    %170 = arith.select %165, %168, %169 : vector<16x16xi1>, vector<16x16xf32>
    %171 = arith.addf %163, %170 : vector<16x16xf32>
    %c9_i32 = arith.constant 9 : i32
    %172 = vector.broadcast %c9_i32 : i32 to vector<16x16xi32>
    %173 = arith.cmpi eq, %4, %172 : vector<16x16xi32>
    %174 = vector.extract_strided_slice %19 {offsets = [0, 19], sizes = [16, 1], strides = [1, 1]} : vector<16x21xf32> to vector<16x1xf32>
    %cst_31 = arith.constant 0.000000e+00 : f32
    %175 = vector.shape_cast %174 : vector<16x1xf32> to vector<16x1xf32>
    %176 = vector.broadcast %175 : vector<16x1xf32> to vector<16x16xf32>
    %177 = vector.broadcast %cst_31 : f32 to vector<16x16xf32>
    %178 = arith.select %173, %176, %177 : vector<16x16xi1>, vector<16x16xf32>
    %179 = arith.addf %171, %178 : vector<16x16xf32>
    %c10_i32 = arith.constant 10 : i32
    %180 = vector.broadcast %c10_i32 : i32 to vector<16x16xi32>
    %181 = arith.cmpi eq, %4, %180 : vector<16x16xi32>
    %182 = vector.extract_strided_slice %19 {offsets = [0, 20], sizes = [16, 1], strides = [1, 1]} : vector<16x21xf32> to vector<16x1xf32>
    %cst_32 = arith.constant 0.000000e+00 : f32
    %183 = vector.shape_cast %182 : vector<16x1xf32> to vector<16x1xf32>
    %184 = vector.broadcast %183 : vector<16x1xf32> to vector<16x16xf32>
    %185 = vector.broadcast %cst_32 : f32 to vector<16x16xf32>
    %186 = arith.select %181, %184, %185 : vector<16x16xi1>, vector<16x16xf32>
    %187 = arith.addf %179, %186 : vector<16x16xf32>
    %cst_33 = arith.constant -1.000000e+04 : f32
    %188 = vector.broadcast %cst_33 : f32 to vector<16x16xf32>
    %189 = arith.select %6, %187, %188 : vector<16x16xi1>, vector<16x16xf32>
    %cst_34 = arith.constant dense<0xFF800000> : vector<16xf32>
    %190 = vector.multi_reduction <maximumf>, %189, %cst_34 [1] : vector<16x16xf32> to vector<16xf32>
    %191 = vector.shape_cast %190 : vector<16xf32> to vector<16x1xf32>
    %192 = vector.broadcast %191 : vector<16x1xf32> to vector<16x16xf32>
    %193 = arith.subf %189, %192 : vector<16x16xf32>
    %194 = math.exp %193 : vector<16x16xf32>
    %cst_35 = arith.constant dense<0.000000e+00> : vector<16xf32>
    %195 = vector.multi_reduction <add>, %194, %cst_35 [1] : vector<16x16xf32> to vector<16xf32>
    %196 = vector.shape_cast %195 : vector<16xf32> to vector<16x1xf32>
    %197 = tpu.reciprocal %196 {approx = true} : vector<16x1xf32> -> vector<16x1xf32>
    %198 = vector.broadcast %197 : vector<16x1xf32> to vector<16x16xf32>
    %199 = arith.mulf %194, %198 : vector<16x16xf32>
    %200 = arith.truncf %199 : vector<16x16xf32> to vector<16x16xbf16>
    %cst_36 = arith.constant dense<0.000000e+00> : vector<16x16xf32>
    %201 = tpu.matmul %200, %17, %cst_36 {dimension_numbers = #tpu.dot_dimension_numbers<[1], [0], [0], [1], [0, 0, 1, 1], [], []>} : vector<16x16xbf16>, vector<16x16xbf16>, vector<16x16xf32> -> vector<16x16xf32>
    %c-10_i32_37 = arith.constant -10 : i32
    %202 = vector.broadcast %c-10_i32_37 : i32 to vector<16x16xi32>
    %203 = arith.cmpi eq, %4, %202 : vector<16x16xi32>
    %cst_38 = arith.constant 0.000000e+00 : f32
    %204 = vector.broadcast %cst_38 : f32 to vector<16x16xf32>
    %205 = arith.select %203, %199, %204 : vector<16x16xi1>, vector<16x16xf32>
    %cst_39 = arith.constant dense<0.000000e+00> : vector<16xf32>
    %206 = vector.multi_reduction <add>, %205, %cst_39 [1] : vector<16x16xf32> to vector<16xf32>
    %207 = vector.shape_cast %206 : vector<16xf32> to vector<16x1xf32>
    %208 = vector.extract_strided_slice %9 {offsets = [0, 0], sizes = [1, 16], strides = [1, 1]} : vector<21x16xf32> to vector<1x16xf32>
    %209 = vector.broadcast %207 : vector<16x1xf32> to vector<16x16xf32>
    %210 = vector.broadcast %208 : vector<1x16xf32> to vector<16x16xf32>
    %211 = arith.mulf %209, %210 : vector<16x16xf32>
    %212 = arith.addf %201, %211 : vector<16x16xf32>
    %c-9_i32_40 = arith.constant -9 : i32
    %213 = vector.broadcast %c-9_i32_40 : i32 to vector<16x16xi32>
    %214 = arith.cmpi eq, %4, %213 : vector<16x16xi32>
    %cst_41 = arith.constant 0.000000e+00 : f32
    %215 = vector.broadcast %cst_41 : f32 to vector<16x16xf32>
    %216 = arith.select %214, %199, %215 : vector<16x16xi1>, vector<16x16xf32>
    %cst_42 = arith.constant dense<0.000000e+00> : vector<16xf32>
    %217 = vector.multi_reduction <add>, %216, %cst_42 [1] : vector<16x16xf32> to vector<16xf32>
    %218 = vector.shape_cast %217 : vector<16xf32> to vector<16x1xf32>
    %219 = vector.extract_strided_slice %9 {offsets = [1, 0], sizes = [1, 16], strides = [1, 1]} : vector<21x16xf32> to vector<1x16xf32>
    %220 = vector.broadcast %218 : vector<16x1xf32> to vector<16x16xf32>
    %221 = vector.broadcast %219 : vector<1x16xf32> to vector<16x16xf32>
    %222 = arith.mulf %220, %221 : vector<16x16xf32>
    %223 = arith.addf %212, %222 : vector<16x16xf32>
    %c-8_i32_43 = arith.constant -8 : i32
    %224 = vector.broadcast %c-8_i32_43 : i32 to vector<16x16xi32>
    %225 = arith.cmpi eq, %4, %224 : vector<16x16xi32>
    %cst_44 = arith.constant 0.000000e+00 : f32
    %226 = vector.broadcast %cst_44 : f32 to vector<16x16xf32>
    %227 = arith.select %225, %199, %226 : vector<16x16xi1>, vector<16x16xf32>
    %cst_45 = arith.constant dense<0.000000e+00> : vector<16xf32>
    %228 = vector.multi_reduction <add>, %227, %cst_45 [1] : vector<16x16xf32> to vector<16xf32>
    %229 = vector.shape_cast %228 : vector<16xf32> to vector<16x1xf32>
    %230 = vector.extract_strided_slice %9 {offsets = [2, 0], sizes = [1, 16], strides = [1, 1]} : vector<21x16xf32> to vector<1x16xf32>
    %231 = vector.broadcast %229 : vector<16x1xf32> to vector<16x16xf32>
    %232 = vector.broadcast %230 : vector<1x16xf32> to vector<16x16xf32>
    %233 = arith.mulf %231, %232 : vector<16x16xf32>
    %234 = arith.addf %223, %233 : vector<16x16xf32>
    %c-7_i32_46 = arith.constant -7 : i32
    %235 = vector.broadcast %c-7_i32_46 : i32 to vector<16x16xi32>
    %236 = arith.cmpi eq, %4, %235 : vector<16x16xi32>
    %cst_47 = arith.constant 0.000000e+00 : f32
    %237 = vector.broadcast %cst_47 : f32 to vector<16x16xf32>
    %238 = arith.select %236, %199, %237 : vector<16x16xi1>, vector<16x16xf32>
    %cst_48 = arith.constant dense<0.000000e+00> : vector<16xf32>
    %239 = vector.multi_reduction <add>, %238, %cst_48 [1] : vector<16x16xf32> to vector<16xf32>
    %240 = vector.shape_cast %239 : vector<16xf32> to vector<16x1xf32>
    %241 = vector.extract_strided_slice %9 {offsets = [3, 0], sizes = [1, 16], strides = [1, 1]} : vector<21x16xf32> to vector<1x16xf32>
    %242 = vector.broadcast %240 : vector<16x1xf32> to vector<16x16xf32>
    %243 = vector.broadcast %241 : vector<1x16xf32> to vector<16x16xf32>
    %244 = arith.mulf %242, %243 : vector<16x16xf32>
    %245 = arith.addf %234, %244 : vector<16x16xf32>
    %c-6_i32_49 = arith.constant -6 : i32
    %246 = vector.broadcast %c-6_i32_49 : i32 to vector<16x16xi32>
    %247 = arith.cmpi eq, %4, %246 : vector<16x16xi32>
    %cst_50 = arith.constant 0.000000e+00 : f32
    %248 = vector.broadcast %cst_50 : f32 to vector<16x16xf32>
    %249 = arith.select %247, %199, %248 : vector<16x16xi1>, vector<16x16xf32>
    %cst_51 = arith.constant dense<0.000000e+00> : vector<16xf32>
    %250 = vector.multi_reduction <add>, %249, %cst_51 [1] : vector<16x16xf32> to vector<16xf32>
    %251 = vector.shape_cast %250 : vector<16xf32> to vector<16x1xf32>
    %252 = vector.extract_strided_slice %9 {offsets = [4, 0], sizes = [1, 16], strides = [1, 1]} : vector<21x16xf32> to vector<1x16xf32>
    %253 = vector.broadcast %251 : vector<16x1xf32> to vector<16x16xf32>
    %254 = vector.broadcast %252 : vector<1x16xf32> to vector<16x16xf32>
    %255 = arith.mulf %253, %254 : vector<16x16xf32>
    %256 = arith.addf %245, %255 : vector<16x16xf32>
    %c-5_i32_52 = arith.constant -5 : i32
    %257 = vector.broadcast %c-5_i32_52 : i32 to vector<16x16xi32>
    %258 = arith.cmpi eq, %4, %257 : vector<16x16xi32>
    %cst_53 = arith.constant 0.000000e+00 : f32
    %259 = vector.broadcast %cst_53 : f32 to vector<16x16xf32>
    %260 = arith.select %258, %199, %259 : vector<16x16xi1>, vector<16x16xf32>
    %cst_54 = arith.constant dense<0.000000e+00> : vector<16xf32>
    %261 = vector.multi_reduction <add>, %260, %cst_54 [1] : vector<16x16xf32> to vector<16xf32>
    %262 = vector.shape_cast %261 : vector<16xf32> to vector<16x1xf32>
    %263 = vector.extract_strided_slice %9 {offsets = [5, 0], sizes = [1, 16], strides = [1, 1]} : vector<21x16xf32> to vector<1x16xf32>
    %264 = vector.broadcast %262 : vector<16x1xf32> to vector<16x16xf32>
    %265 = vector.broadcast %263 : vector<1x16xf32> to vector<16x16xf32>
    %266 = arith.mulf %264, %265 : vector<16x16xf32>
    %267 = arith.addf %256, %266 : vector<16x16xf32>
    %c-4_i32_55 = arith.constant -4 : i32
    %268 = vector.broadcast %c-4_i32_55 : i32 to vector<16x16xi32>
    %269 = arith.cmpi eq, %4, %268 : vector<16x16xi32>
    %cst_56 = arith.constant 0.000000e+00 : f32
    %270 = vector.broadcast %cst_56 : f32 to vector<16x16xf32>
    %271 = arith.select %269, %199, %270 : vector<16x16xi1>, vector<16x16xf32>
    %cst_57 = arith.constant dense<0.000000e+00> : vector<16xf32>
    %272 = vector.multi_reduction <add>, %271, %cst_57 [1] : vector<16x16xf32> to vector<16xf32>
    %273 = vector.shape_cast %272 : vector<16xf32> to vector<16x1xf32>
    %274 = vector.extract_strided_slice %9 {offsets = [6, 0], sizes = [1, 16], strides = [1, 1]} : vector<21x16xf32> to vector<1x16xf32>
    %275 = vector.broadcast %273 : vector<16x1xf32> to vector<16x16xf32>
    %276 = vector.broadcast %274 : vector<1x16xf32> to vector<16x16xf32>
    %277 = arith.mulf %275, %276 : vector<16x16xf32>
    %278 = arith.addf %267, %277 : vector<16x16xf32>
    %c-3_i32_58 = arith.constant -3 : i32
    %279 = vector.broadcast %c-3_i32_58 : i32 to vector<16x16xi32>
    %280 = arith.cmpi eq, %4, %279 : vector<16x16xi32>
    %cst_59 = arith.constant 0.000000e+00 : f32
    %281 = vector.broadcast %cst_59 : f32 to vector<16x16xf32>
    %282 = arith.select %280, %199, %281 : vector<16x16xi1>, vector<16x16xf32>
    %cst_60 = arith.constant dense<0.000000e+00> : vector<16xf32>
    %283 = vector.multi_reduction <add>, %282, %cst_60 [1] : vector<16x16xf32> to vector<16xf32>
    %284 = vector.shape_cast %283 : vector<16xf32> to vector<16x1xf32>
    %285 = vector.extract_strided_slice %9 {offsets = [7, 0], sizes = [1, 16], strides = [1, 1]} : vector<21x16xf32> to vector<1x16xf32>
    %286 = vector.broadcast %284 : vector<16x1xf32> to vector<16x16xf32>
    %287 = vector.broadcast %285 : vector<1x16xf32> to vector<16x16xf32>
    %288 = arith.mulf %286, %287 : vector<16x16xf32>
    %289 = arith.addf %278, %288 : vector<16x16xf32>
    %c-2_i32_61 = arith.constant -2 : i32
    %290 = vector.broadcast %c-2_i32_61 : i32 to vector<16x16xi32>
    %291 = arith.cmpi eq, %4, %290 : vector<16x16xi32>
    %cst_62 = arith.constant 0.000000e+00 : f32
    %292 = vector.broadcast %cst_62 : f32 to vector<16x16xf32>
    %293 = arith.select %291, %199, %292 : vector<16x16xi1>, vector<16x16xf32>
    %cst_63 = arith.constant dense<0.000000e+00> : vector<16xf32>
    %294 = vector.multi_reduction <add>, %293, %cst_63 [1] : vector<16x16xf32> to vector<16xf32>
    %295 = vector.shape_cast %294 : vector<16xf32> to vector<16x1xf32>
    %296 = vector.extract_strided_slice %9 {offsets = [8, 0], sizes = [1, 16], strides = [1, 1]} : vector<21x16xf32> to vector<1x16xf32>
    %297 = vector.broadcast %295 : vector<16x1xf32> to vector<16x16xf32>
    %298 = vector.broadcast %296 : vector<1x16xf32> to vector<16x16xf32>
    %299 = arith.mulf %297, %298 : vector<16x16xf32>
    %300 = arith.addf %289, %299 : vector<16x16xf32>
    %c-1_i32_64 = arith.constant -1 : i32
    %301 = vector.broadcast %c-1_i32_64 : i32 to vector<16x16xi32>
    %302 = arith.cmpi eq, %4, %301 : vector<16x16xi32>
    %cst_65 = arith.constant 0.000000e+00 : f32
    %303 = vector.broadcast %cst_65 : f32 to vector<16x16xf32>
    %304 = arith.select %302, %199, %303 : vector<16x16xi1>, vector<16x16xf32>
    %cst_66 = arith.constant dense<0.000000e+00> : vector<16xf32>
    %305 = vector.multi_reduction <add>, %304, %cst_66 [1] : vector<16x16xf32> to vector<16xf32>
    %306 = vector.shape_cast %305 : vector<16xf32> to vector<16x1xf32>
    %307 = vector.extract_strided_slice %9 {offsets = [9, 0], sizes = [1, 16], strides = [1, 1]} : vector<21x16xf32> to vector<1x16xf32>
    %308 = vector.broadcast %306 : vector<16x1xf32> to vector<16x16xf32>
    %309 = vector.broadcast %307 : vector<1x16xf32> to vector<16x16xf32>
    %310 = arith.mulf %308, %309 : vector<16x16xf32>
    %311 = arith.addf %300, %310 : vector<16x16xf32>
    %c0_i32_67 = arith.constant 0 : i32
    %312 = vector.broadcast %c0_i32_67 : i32 to vector<16x16xi32>
    %313 = arith.cmpi eq, %4, %312 : vector<16x16xi32>
    %cst_68 = arith.constant 0.000000e+00 : f32
    %314 = vector.broadcast %cst_68 : f32 to vector<16x16xf32>
    %315 = arith.select %313, %199, %314 : vector<16x16xi1>, vector<16x16xf32>
    %cst_69 = arith.constant dense<0.000000e+00> : vector<16xf32>
    %316 = vector.multi_reduction <add>, %315, %cst_69 [1] : vector<16x16xf32> to vector<16xf32>
    %317 = vector.shape_cast %316 : vector<16xf32> to vector<16x1xf32>
    %318 = vector.extract_strided_slice %9 {offsets = [10, 0], sizes = [1, 16], strides = [1, 1]} : vector<21x16xf32> to vector<1x16xf32>
    %319 = vector.broadcast %317 : vector<16x1xf32> to vector<16x16xf32>
    %320 = vector.broadcast %318 : vector<1x16xf32> to vector<16x16xf32>
    %321 = arith.mulf %319, %320 : vector<16x16xf32>
    %322 = arith.addf %311, %321 : vector<16x16xf32>
    %c1_i32_70 = arith.constant 1 : i32
    %323 = vector.broadcast %c1_i32_70 : i32 to vector<16x16xi32>
    %324 = arith.cmpi eq, %4, %323 : vector<16x16xi32>
    %cst_71 = arith.constant 0.000000e+00 : f32
    %325 = vector.broadcast %cst_71 : f32 to vector<16x16xf32>
    %326 = arith.select %324, %199, %325 : vector<16x16xi1>, vector<16x16xf32>
    %cst_72 = arith.constant dense<0.000000e+00> : vector<16xf32>
    %327 = vector.multi_reduction <add>, %326, %cst_72 [1] : vector<16x16xf32> to vector<16xf32>
    %328 = vector.shape_cast %327 : vector<16xf32> to vector<16x1xf32>
    %329 = vector.extract_strided_slice %9 {offsets = [11, 0], sizes = [1, 16], strides = [1, 1]} : vector<21x16xf32> to vector<1x16xf32>
    %330 = vector.broadcast %328 : vector<16x1xf32> to vector<16x16xf32>
    %331 = vector.broadcast %329 : vector<1x16xf32> to vector<16x16xf32>
    %332 = arith.mulf %330, %331 : vector<16x16xf32>
    %333 = arith.addf %322, %332 : vector<16x16xf32>
    %c2_i32_73 = arith.constant 2 : i32
    %334 = vector.broadcast %c2_i32_73 : i32 to vector<16x16xi32>
    %335 = arith.cmpi eq, %4, %334 : vector<16x16xi32>
    %cst_74 = arith.constant 0.000000e+00 : f32
    %336 = vector.broadcast %cst_74 : f32 to vector<16x16xf32>
    %337 = arith.select %335, %199, %336 : vector<16x16xi1>, vector<16x16xf32>
    %cst_75 = arith.constant dense<0.000000e+00> : vector<16xf32>
    %338 = vector.multi_reduction <add>, %337, %cst_75 [1] : vector<16x16xf32> to vector<16xf32>
    %339 = vector.shape_cast %338 : vector<16xf32> to vector<16x1xf32>
    %340 = vector.extract_strided_slice %9 {offsets = [12, 0], sizes = [1, 16], strides = [1, 1]} : vector<21x16xf32> to vector<1x16xf32>
    %341 = vector.broadcast %339 : vector<16x1xf32> to vector<16x16xf32>
    %342 = vector.broadcast %340 : vector<1x16xf32> to vector<16x16xf32>
    %343 = arith.mulf %341, %342 : vector<16x16xf32>
    %344 = arith.addf %333, %343 : vector<16x16xf32>
    %c3_i32_76 = arith.constant 3 : i32
    %345 = vector.broadcast %c3_i32_76 : i32 to vector<16x16xi32>
    %346 = arith.cmpi eq, %4, %345 : vector<16x16xi32>
    %cst_77 = arith.constant 0.000000e+00 : f32
    %347 = vector.broadcast %cst_77 : f32 to vector<16x16xf32>
    %348 = arith.select %346, %199, %347 : vector<16x16xi1>, vector<16x16xf32>
    %cst_78 = arith.constant dense<0.000000e+00> : vector<16xf32>
    %349 = vector.multi_reduction <add>, %348, %cst_78 [1] : vector<16x16xf32> to vector<16xf32>
    %350 = vector.shape_cast %349 : vector<16xf32> to vector<16x1xf32>
    %351 = vector.extract_strided_slice %9 {offsets = [13, 0], sizes = [1, 16], strides = [1, 1]} : vector<21x16xf32> to vector<1x16xf32>
    %352 = vector.broadcast %350 : vector<16x1xf32> to vector<16x16xf32>
    %353 = vector.broadcast %351 : vector<1x16xf32> to vector<16x16xf32>
    %354 = arith.mulf %352, %353 : vector<16x16xf32>
    %355 = arith.addf %344, %354 : vector<16x16xf32>
    %c4_i32_79 = arith.constant 4 : i32
    %356 = vector.broadcast %c4_i32_79 : i32 to vector<16x16xi32>
    %357 = arith.cmpi eq, %4, %356 : vector<16x16xi32>
    %cst_80 = arith.constant 0.000000e+00 : f32
    %358 = vector.broadcast %cst_80 : f32 to vector<16x16xf32>
    %359 = arith.select %357, %199, %358 : vector<16x16xi1>, vector<16x16xf32>
    %cst_81 = arith.constant dense<0.000000e+00> : vector<16xf32>
    %360 = vector.multi_reduction <add>, %359, %cst_81 [1] : vector<16x16xf32> to vector<16xf32>
    %361 = vector.shape_cast %360 : vector<16xf32> to vector<16x1xf32>
    %362 = vector.extract_strided_slice %9 {offsets = [14, 0], sizes = [1, 16], strides = [1, 1]} : vector<21x16xf32> to vector<1x16xf32>
    %363 = vector.broadcast %361 : vector<16x1xf32> to vector<16x16xf32>
    %364 = vector.broadcast %362 : vector<1x16xf32> to vector<16x16xf32>
    %365 = arith.mulf %363, %364 : vector<16x16xf32>
    %366 = arith.addf %355, %365 : vector<16x16xf32>
    %c5_i32_82 = arith.constant 5 : i32
    %367 = vector.broadcast %c5_i32_82 : i32 to vector<16x16xi32>
    %368 = arith.cmpi eq, %4, %367 : vector<16x16xi32>
    %cst_83 = arith.constant 0.000000e+00 : f32
    %369 = vector.broadcast %cst_83 : f32 to vector<16x16xf32>
    %370 = arith.select %368, %199, %369 : vector<16x16xi1>, vector<16x16xf32>
    %cst_84 = arith.constant dense<0.000000e+00> : vector<16xf32>
    %371 = vector.multi_reduction <add>, %370, %cst_84 [1] : vector<16x16xf32> to vector<16xf32>
    %372 = vector.shape_cast %371 : vector<16xf32> to vector<16x1xf32>
    %373 = vector.extract_strided_slice %9 {offsets = [15, 0], sizes = [1, 16], strides = [1, 1]} : vector<21x16xf32> to vector<1x16xf32>
    %374 = vector.broadcast %372 : vector<16x1xf32> to vector<16x16xf32>
    %375 = vector.broadcast %373 : vector<1x16xf32> to vector<16x16xf32>
    %376 = arith.mulf %374, %375 : vector<16x16xf32>
    %377 = arith.addf %366, %376 : vector<16x16xf32>
    %c6_i32_85 = arith.constant 6 : i32
    %378 = vector.broadcast %c6_i32_85 : i32 to vector<16x16xi32>
    %379 = arith.cmpi eq, %4, %378 : vector<16x16xi32>
    %cst_86 = arith.constant 0.000000e+00 : f32
    %380 = vector.broadcast %cst_86 : f32 to vector<16x16xf32>
    %381 = arith.select %379, %199, %380 : vector<16x16xi1>, vector<16x16xf32>
    %cst_87 = arith.constant dense<0.000000e+00> : vector<16xf32>
    %382 = vector.multi_reduction <add>, %381, %cst_87 [1] : vector<16x16xf32> to vector<16xf32>
    %383 = vector.shape_cast %382 : vector<16xf32> to vector<16x1xf32>
    %384 = vector.extract_strided_slice %9 {offsets = [16, 0], sizes = [1, 16], strides = [1, 1]} : vector<21x16xf32> to vector<1x16xf32>
    %385 = vector.broadcast %383 : vector<16x1xf32> to vector<16x16xf32>
    %386 = vector.broadcast %384 : vector<1x16xf32> to vector<16x16xf32>
    %387 = arith.mulf %385, %386 : vector<16x16xf32>
    %388 = arith.addf %377, %387 : vector<16x16xf32>
    %c7_i32_88 = arith.constant 7 : i32
    %389 = vector.broadcast %c7_i32_88 : i32 to vector<16x16xi32>
    %390 = arith.cmpi eq, %4, %389 : vector<16x16xi32>
    %cst_89 = arith.constant 0.000000e+00 : f32
    %391 = vector.broadcast %cst_89 : f32 to vector<16x16xf32>
    %392 = arith.select %390, %199, %391 : vector<16x16xi1>, vector<16x16xf32>
    %cst_90 = arith.constant dense<0.000000e+00> : vector<16xf32>
    %393 = vector.multi_reduction <add>, %392, %cst_90 [1] : vector<16x16xf32> to vector<16xf32>
    %394 = vector.shape_cast %393 : vector<16xf32> to vector<16x1xf32>
    %395 = vector.extract_strided_slice %9 {offsets = [17, 0], sizes = [1, 16], strides = [1, 1]} : vector<21x16xf32> to vector<1x16xf32>
    %396 = vector.broadcast %394 : vector<16x1xf32> to vector<16x16xf32>
    %397 = vector.broadcast %395 : vector<1x16xf32> to vector<16x16xf32>
    %398 = arith.mulf %396, %397 : vector<16x16xf32>
    %399 = arith.addf %388, %398 : vector<16x16xf32>
    %c8_i32_91 = arith.constant 8 : i32
    %400 = vector.broadcast %c8_i32_91 : i32 to vector<16x16xi32>
    %401 = arith.cmpi eq, %4, %400 : vector<16x16xi32>
    %cst_92 = arith.constant 0.000000e+00 : f32
    %402 = vector.broadcast %cst_92 : f32 to vector<16x16xf32>
    %403 = arith.select %401, %199, %402 : vector<16x16xi1>, vector<16x16xf32>
    %cst_93 = arith.constant dense<0.000000e+00> : vector<16xf32>
    %404 = vector.multi_reduction <add>, %403, %cst_93 [1] : vector<16x16xf32> to vector<16xf32>
    %405 = vector.shape_cast %404 : vector<16xf32> to vector<16x1xf32>
    %406 = vector.extract_strided_slice %9 {offsets = [18, 0], sizes = [1, 16], strides = [1, 1]} : vector<21x16xf32> to vector<1x16xf32>
    %407 = vector.broadcast %405 : vector<16x1xf32> to vector<16x16xf32>
    %408 = vector.broadcast %406 : vector<1x16xf32> to vector<16x16xf32>
    %409 = arith.mulf %407, %408 : vector<16x16xf32>
    %410 = arith.addf %399, %409 : vector<16x16xf32>
    %c9_i32_94 = arith.constant 9 : i32
    %411 = vector.broadcast %c9_i32_94 : i32 to vector<16x16xi32>
    %412 = arith.cmpi eq, %4, %411 : vector<16x16xi32>
    %cst_95 = arith.constant 0.000000e+00 : f32
    %413 = vector.broadcast %cst_95 : f32 to vector<16x16xf32>
    %414 = arith.select %412, %199, %413 : vector<16x16xi1>, vector<16x16xf32>
    %cst_96 = arith.constant dense<0.000000e+00> : vector<16xf32>
    %415 = vector.multi_reduction <add>, %414, %cst_96 [1] : vector<16x16xf32> to vector<16xf32>
    %416 = vector.shape_cast %415 : vector<16xf32> to vector<16x1xf32>
    %417 = vector.extract_strided_slice %9 {offsets = [19, 0], sizes = [1, 16], strides = [1, 1]} : vector<21x16xf32> to vector<1x16xf32>
    %418 = vector.broadcast %416 : vector<16x1xf32> to vector<16x16xf32>
    %419 = vector.broadcast %417 : vector<1x16xf32> to vector<16x16xf32>
    %420 = arith.mulf %418, %419 : vector<16x16xf32>
    %421 = arith.addf %410, %420 : vector<16x16xf32>
    %c10_i32_97 = arith.constant 10 : i32
    %422 = vector.broadcast %c10_i32_97 : i32 to vector<16x16xi32>
    %423 = arith.cmpi eq, %4, %422 : vector<16x16xi32>
    %cst_98 = arith.constant 0.000000e+00 : f32
    %424 = vector.broadcast %cst_98 : f32 to vector<16x16xf32>
    %425 = arith.select %423, %199, %424 : vector<16x16xi1>, vector<16x16xf32>
    %cst_99 = arith.constant dense<0.000000e+00> : vector<16xf32>
    %426 = vector.multi_reduction <add>, %425, %cst_99 [1] : vector<16x16xf32> to vector<16xf32>
    %427 = vector.shape_cast %426 : vector<16xf32> to vector<16x1xf32>
    %428 = vector.extract_strided_slice %9 {offsets = [20, 0], sizes = [1, 16], strides = [1, 1]} : vector<21x16xf32> to vector<1x16xf32>
    %429 = vector.broadcast %427 : vector<16x1xf32> to vector<16x16xf32>
    %430 = vector.broadcast %428 : vector<1x16xf32> to vector<16x16xf32>
    %431 = arith.mulf %429, %430 : vector<16x16xf32>
    %432 = arith.addf %421, %431 : vector<16x16xf32>
    %c0_100 = arith.constant 0 : index
    %c0_101 = arith.constant 0 : index
    %c16 = arith.constant 16 : index
    %433 = vector.load %arg2[%c0_100, %c0_101, %c16] : memref<1x16x96xbf16, #tpu.memory_space<vmem>>, vector<1x16x16xbf16>
    %434 = vector.shape_cast %433 : vector<1x16x16xbf16> to vector<16x16xbf16>
    %cst_102 = arith.constant 2.500000e-01 : bf16
    %435 = vector.broadcast %cst_102 : bf16 to vector<16x16xbf16>
    %436 = arith.mulf %434, %435 : vector<16x16xbf16>
    %c0_103 = arith.constant 0 : index
    %c0_104 = arith.constant 0 : index
    %c48 = arith.constant 48 : index
    %437 = vector.load %arg2[%c0_103, %c0_104, %c48] : memref<1x16x96xbf16, #tpu.memory_space<vmem>>, vector<1x16x16xbf16>
    %438 = vector.shape_cast %437 : vector<1x16x16xbf16> to vector<16x16xbf16>
    %c0_105 = arith.constant 0 : index
    %c0_106 = arith.constant 0 : index
    %c80 = arith.constant 80 : index
    %439 = vector.load %arg2[%c0_105, %c0_106, %c80] : memref<1x16x96xbf16, #tpu.memory_space<vmem>>, vector<1x16x16xbf16>
    %440 = vector.shape_cast %439 : vector<1x16x16xbf16> to vector<16x16xbf16>
    %cst_107 = arith.constant dense<0.000000e+00> : vector<16x16xf32>
    %441 = tpu.matmul %436, %438, %cst_107 {dimension_numbers = #tpu.dot_dimension_numbers<[1], [1], [0], [0], [0, 0, 1, 0], [], []>} : vector<16x16xbf16>, vector<16x16xbf16>, vector<16x16xf32> -> vector<16x16xf32>
    %cst_108 = arith.constant dense<0.000000e+00> : vector<16x21xf32>
    %442 = tpu.matmul %436, %7, %cst_108 {dimension_numbers = #tpu.dot_dimension_numbers<[1], [1], [0], [0], [0, 0, 1, 0], [], []>} : vector<16x16xbf16>, vector<21x16xbf16>, vector<16x21xf32> -> vector<16x21xf32>
    %c-10_i32_109 = arith.constant -10 : i32
    %443 = vector.broadcast %c-10_i32_109 : i32 to vector<16x16xi32>
    %444 = arith.cmpi eq, %4, %443 : vector<16x16xi32>
    %445 = vector.extract_strided_slice %442 {offsets = [0, 0], sizes = [16, 1], strides = [1, 1]} : vector<16x21xf32> to vector<16x1xf32>
    %cst_110 = arith.constant 0.000000e+00 : f32
    %446 = vector.shape_cast %445 : vector<16x1xf32> to vector<16x1xf32>
    %447 = vector.broadcast %446 : vector<16x1xf32> to vector<16x16xf32>
    %448 = vector.broadcast %cst_110 : f32 to vector<16x16xf32>
    %449 = arith.select %444, %447, %448 : vector<16x16xi1>, vector<16x16xf32>
    %450 = arith.addf %441, %449 : vector<16x16xf32>
    %c-9_i32_111 = arith.constant -9 : i32
    %451 = vector.broadcast %c-9_i32_111 : i32 to vector<16x16xi32>
    %452 = arith.cmpi eq, %4, %451 : vector<16x16xi32>
    %453 = vector.extract_strided_slice %442 {offsets = [0, 1], sizes = [16, 1], strides = [1, 1]} : vector<16x21xf32> to vector<16x1xf32>
    %cst_112 = arith.constant 0.000000e+00 : f32
    %454 = vector.shape_cast %453 : vector<16x1xf32> to vector<16x1xf32>
    %455 = vector.broadcast %454 : vector<16x1xf32> to vector<16x16xf32>
    %456 = vector.broadcast %cst_112 : f32 to vector<16x16xf32>
    %457 = arith.select %452, %455, %456 : vector<16x16xi1>, vector<16x16xf32>
    %458 = arith.addf %450, %457 : vector<16x16xf32>
    %c-8_i32_113 = arith.constant -8 : i32
    %459 = vector.broadcast %c-8_i32_113 : i32 to vector<16x16xi32>
    %460 = arith.cmpi eq, %4, %459 : vector<16x16xi32>
    %461 = vector.extract_strided_slice %442 {offsets = [0, 2], sizes = [16, 1], strides = [1, 1]} : vector<16x21xf32> to vector<16x1xf32>
    %cst_114 = arith.constant 0.000000e+00 : f32
    %462 = vector.shape_cast %461 : vector<16x1xf32> to vector<16x1xf32>
    %463 = vector.broadcast %462 : vector<16x1xf32> to vector<16x16xf32>
    %464 = vector.broadcast %cst_114 : f32 to vector<16x16xf32>
    %465 = arith.select %460, %463, %464 : vector<16x16xi1>, vector<16x16xf32>
    %466 = arith.addf %458, %465 : vector<16x16xf32>
    %c-7_i32_115 = arith.constant -7 : i32
    %467 = vector.broadcast %c-7_i32_115 : i32 to vector<16x16xi32>
    %468 = arith.cmpi eq, %4, %467 : vector<16x16xi32>
    %469 = vector.extract_strided_slice %442 {offsets = [0, 3], sizes = [16, 1], strides = [1, 1]} : vector<16x21xf32> to vector<16x1xf32>
    %cst_116 = arith.constant 0.000000e+00 : f32
    %470 = vector.shape_cast %469 : vector<16x1xf32> to vector<16x1xf32>
    %471 = vector.broadcast %470 : vector<16x1xf32> to vector<16x16xf32>
    %472 = vector.broadcast %cst_116 : f32 to vector<16x16xf32>
    %473 = arith.select %468, %471, %472 : vector<16x16xi1>, vector<16x16xf32>
    %474 = arith.addf %466, %473 : vector<16x16xf32>
    %c-6_i32_117 = arith.constant -6 : i32
    %475 = vector.broadcast %c-6_i32_117 : i32 to vector<16x16xi32>
    %476 = arith.cmpi eq, %4, %475 : vector<16x16xi32>
    %477 = vector.extract_strided_slice %442 {offsets = [0, 4], sizes = [16, 1], strides = [1, 1]} : vector<16x21xf32> to vector<16x1xf32>
    %cst_118 = arith.constant 0.000000e+00 : f32
    %478 = vector.shape_cast %477 : vector<16x1xf32> to vector<16x1xf32>
    %479 = vector.broadcast %478 : vector<16x1xf32> to vector<16x16xf32>
    %480 = vector.broadcast %cst_118 : f32 to vector<16x16xf32>
    %481 = arith.select %476, %479, %480 : vector<16x16xi1>, vector<16x16xf32>
    %482 = arith.addf %474, %481 : vector<16x16xf32>
    %c-5_i32_119 = arith.constant -5 : i32
    %483 = vector.broadcast %c-5_i32_119 : i32 to vector<16x16xi32>
    %484 = arith.cmpi eq, %4, %483 : vector<16x16xi32>
    %485 = vector.extract_strided_slice %442 {offsets = [0, 5], sizes = [16, 1], strides = [1, 1]} : vector<16x21xf32> to vector<16x1xf32>
    %cst_120 = arith.constant 0.000000e+00 : f32
    %486 = vector.shape_cast %485 : vector<16x1xf32> to vector<16x1xf32>
    %487 = vector.broadcast %486 : vector<16x1xf32> to vector<16x16xf32>
    %488 = vector.broadcast %cst_120 : f32 to vector<16x16xf32>
    %489 = arith.select %484, %487, %488 : vector<16x16xi1>, vector<16x16xf32>
    %490 = arith.addf %482, %489 : vector<16x16xf32>
    %c-4_i32_121 = arith.constant -4 : i32
    %491 = vector.broadcast %c-4_i32_121 : i32 to vector<16x16xi32>
    %492 = arith.cmpi eq, %4, %491 : vector<16x16xi32>
    %493 = vector.extract_strided_slice %442 {offsets = [0, 6], sizes = [16, 1], strides = [1, 1]} : vector<16x21xf32> to vector<16x1xf32>
    %cst_122 = arith.constant 0.000000e+00 : f32
    %494 = vector.shape_cast %493 : vector<16x1xf32> to vector<16x1xf32>
    %495 = vector.broadcast %494 : vector<16x1xf32> to vector<16x16xf32>
    %496 = vector.broadcast %cst_122 : f32 to vector<16x16xf32>
    %497 = arith.select %492, %495, %496 : vector<16x16xi1>, vector<16x16xf32>
    %498 = arith.addf %490, %497 : vector<16x16xf32>
    %c-3_i32_123 = arith.constant -3 : i32
    %499 = vector.broadcast %c-3_i32_123 : i32 to vector<16x16xi32>
    %500 = arith.cmpi eq, %4, %499 : vector<16x16xi32>
    %501 = vector.extract_strided_slice %442 {offsets = [0, 7], sizes = [16, 1], strides = [1, 1]} : vector<16x21xf32> to vector<16x1xf32>
    %cst_124 = arith.constant 0.000000e+00 : f32
    %502 = vector.shape_cast %501 : vector<16x1xf32> to vector<16x1xf32>
    %503 = vector.broadcast %502 : vector<16x1xf32> to vector<16x16xf32>
    %504 = vector.broadcast %cst_124 : f32 to vector<16x16xf32>
    %505 = arith.select %500, %503, %504 : vector<16x16xi1>, vector<16x16xf32>
    %506 = arith.addf %498, %505 : vector<16x16xf32>
    %c-2_i32_125 = arith.constant -2 : i32
    %507 = vector.broadcast %c-2_i32_125 : i32 to vector<16x16xi32>
    %508 = arith.cmpi eq, %4, %507 : vector<16x16xi32>
    %509 = vector.extract_strided_slice %442 {offsets = [0, 8], sizes = [16, 1], strides = [1, 1]} : vector<16x21xf32> to vector<16x1xf32>
    %cst_126 = arith.constant 0.000000e+00 : f32
    %510 = vector.shape_cast %509 : vector<16x1xf32> to vector<16x1xf32>
    %511 = vector.broadcast %510 : vector<16x1xf32> to vector<16x16xf32>
    %512 = vector.broadcast %cst_126 : f32 to vector<16x16xf32>
    %513 = arith.select %508, %511, %512 : vector<16x16xi1>, vector<16x16xf32>
    %514 = arith.addf %506, %513 : vector<16x16xf32>
    %c-1_i32_127 = arith.constant -1 : i32
    %515 = vector.broadcast %c-1_i32_127 : i32 to vector<16x16xi32>
    %516 = arith.cmpi eq, %4, %515 : vector<16x16xi32>
    %517 = vector.extract_strided_slice %442 {offsets = [0, 9], sizes = [16, 1], strides = [1, 1]} : vector<16x21xf32> to vector<16x1xf32>
    %cst_128 = arith.constant 0.000000e+00 : f32
    %518 = vector.shape_cast %517 : vector<16x1xf32> to vector<16x1xf32>
    %519 = vector.broadcast %518 : vector<16x1xf32> to vector<16x16xf32>
    %520 = vector.broadcast %cst_128 : f32 to vector<16x16xf32>
    %521 = arith.select %516, %519, %520 : vector<16x16xi1>, vector<16x16xf32>
    %522 = arith.addf %514, %521 : vector<16x16xf32>
    %c0_i32_129 = arith.constant 0 : i32
    %523 = vector.broadcast %c0_i32_129 : i32 to vector<16x16xi32>
    %524 = arith.cmpi eq, %4, %523 : vector<16x16xi32>
    %525 = vector.extract_strided_slice %442 {offsets = [0, 10], sizes = [16, 1], strides = [1, 1]} : vector<16x21xf32> to vector<16x1xf32>
    %cst_130 = arith.constant 0.000000e+00 : f32
    %526 = vector.shape_cast %525 : vector<16x1xf32> to vector<16x1xf32>
    %527 = vector.broadcast %526 : vector<16x1xf32> to vector<16x16xf32>
    %528 = vector.broadcast %cst_130 : f32 to vector<16x16xf32>
    %529 = arith.select %524, %527, %528 : vector<16x16xi1>, vector<16x16xf32>
    %530 = arith.addf %522, %529 : vector<16x16xf32>
    %c1_i32_131 = arith.constant 1 : i32
    %531 = vector.broadcast %c1_i32_131 : i32 to vector<16x16xi32>
    %532 = arith.cmpi eq, %4, %531 : vector<16x16xi32>
    %533 = vector.extract_strided_slice %442 {offsets = [0, 11], sizes = [16, 1], strides = [1, 1]} : vector<16x21xf32> to vector<16x1xf32>
    %cst_132 = arith.constant 0.000000e+00 : f32
    %534 = vector.shape_cast %533 : vector<16x1xf32> to vector<16x1xf32>
    %535 = vector.broadcast %534 : vector<16x1xf32> to vector<16x16xf32>
    %536 = vector.broadcast %cst_132 : f32 to vector<16x16xf32>
    %537 = arith.select %532, %535, %536 : vector<16x16xi1>, vector<16x16xf32>
    %538 = arith.addf %530, %537 : vector<16x16xf32>
    %c2_i32_133 = arith.constant 2 : i32
    %539 = vector.broadcast %c2_i32_133 : i32 to vector<16x16xi32>
    %540 = arith.cmpi eq, %4, %539 : vector<16x16xi32>
    %541 = vector.extract_strided_slice %442 {offsets = [0, 12], sizes = [16, 1], strides = [1, 1]} : vector<16x21xf32> to vector<16x1xf32>
    %cst_134 = arith.constant 0.000000e+00 : f32
    %542 = vector.shape_cast %541 : vector<16x1xf32> to vector<16x1xf32>
    %543 = vector.broadcast %542 : vector<16x1xf32> to vector<16x16xf32>
    %544 = vector.broadcast %cst_134 : f32 to vector<16x16xf32>
    %545 = arith.select %540, %543, %544 : vector<16x16xi1>, vector<16x16xf32>
    %546 = arith.addf %538, %545 : vector<16x16xf32>
    %c3_i32_135 = arith.constant 3 : i32
    %547 = vector.broadcast %c3_i32_135 : i32 to vector<16x16xi32>
    %548 = arith.cmpi eq, %4, %547 : vector<16x16xi32>
    %549 = vector.extract_strided_slice %442 {offsets = [0, 13], sizes = [16, 1], strides = [1, 1]} : vector<16x21xf32> to vector<16x1xf32>
    %cst_136 = arith.constant 0.000000e+00 : f32
    %550 = vector.shape_cast %549 : vector<16x1xf32> to vector<16x1xf32>
    %551 = vector.broadcast %550 : vector<16x1xf32> to vector<16x16xf32>
    %552 = vector.broadcast %cst_136 : f32 to vector<16x16xf32>
    %553 = arith.select %548, %551, %552 : vector<16x16xi1>, vector<16x16xf32>
    %554 = arith.addf %546, %553 : vector<16x16xf32>
    %c4_i32_137 = arith.constant 4 : i32
    %555 = vector.broadcast %c4_i32_137 : i32 to vector<16x16xi32>
    %556 = arith.cmpi eq, %4, %555 : vector<16x16xi32>
    %557 = vector.extract_strided_slice %442 {offsets = [0, 14], sizes = [16, 1], strides = [1, 1]} : vector<16x21xf32> to vector<16x1xf32>
    %cst_138 = arith.constant 0.000000e+00 : f32
    %558 = vector.shape_cast %557 : vector<16x1xf32> to vector<16x1xf32>
    %559 = vector.broadcast %558 : vector<16x1xf32> to vector<16x16xf32>
    %560 = vector.broadcast %cst_138 : f32 to vector<16x16xf32>
    %561 = arith.select %556, %559, %560 : vector<16x16xi1>, vector<16x16xf32>
    %562 = arith.addf %554, %561 : vector<16x16xf32>
    %c5_i32_139 = arith.constant 5 : i32
    %563 = vector.broadcast %c5_i32_139 : i32 to vector<16x16xi32>
    %564 = arith.cmpi eq, %4, %563 : vector<16x16xi32>
    %565 = vector.extract_strided_slice %442 {offsets = [0, 15], sizes = [16, 1], strides = [1, 1]} : vector<16x21xf32> to vector<16x1xf32>
    %cst_140 = arith.constant 0.000000e+00 : f32
    %566 = vector.shape_cast %565 : vector<16x1xf32> to vector<16x1xf32>
    %567 = vector.broadcast %566 : vector<16x1xf32> to vector<16x16xf32>
    %568 = vector.broadcast %cst_140 : f32 to vector<16x16xf32>
    %569 = arith.select %564, %567, %568 : vector<16x16xi1>, vector<16x16xf32>
    %570 = arith.addf %562, %569 : vector<16x16xf32>
    %c6_i32_141 = arith.constant 6 : i32
    %571 = vector.broadcast %c6_i32_141 : i32 to vector<16x16xi32>
    %572 = arith.cmpi eq, %4, %571 : vector<16x16xi32>
    %573 = vector.extract_strided_slice %442 {offsets = [0, 16], sizes = [16, 1], strides = [1, 1]} : vector<16x21xf32> to vector<16x1xf32>
    %cst_142 = arith.constant 0.000000e+00 : f32
    %574 = vector.shape_cast %573 : vector<16x1xf32> to vector<16x1xf32>
    %575 = vector.broadcast %574 : vector<16x1xf32> to vector<16x16xf32>
    %576 = vector.broadcast %cst_142 : f32 to vector<16x16xf32>
    %577 = arith.select %572, %575, %576 : vector<16x16xi1>, vector<16x16xf32>
    %578 = arith.addf %570, %577 : vector<16x16xf32>
    %c7_i32_143 = arith.constant 7 : i32
    %579 = vector.broadcast %c7_i32_143 : i32 to vector<16x16xi32>
    %580 = arith.cmpi eq, %4, %579 : vector<16x16xi32>
    %581 = vector.extract_strided_slice %442 {offsets = [0, 17], sizes = [16, 1], strides = [1, 1]} : vector<16x21xf32> to vector<16x1xf32>
    %cst_144 = arith.constant 0.000000e+00 : f32
    %582 = vector.shape_cast %581 : vector<16x1xf32> to vector<16x1xf32>
    %583 = vector.broadcast %582 : vector<16x1xf32> to vector<16x16xf32>
    %584 = vector.broadcast %cst_144 : f32 to vector<16x16xf32>
    %585 = arith.select %580, %583, %584 : vector<16x16xi1>, vector<16x16xf32>
    %586 = arith.addf %578, %585 : vector<16x16xf32>
    %c8_i32_145 = arith.constant 8 : i32
    %587 = vector.broadcast %c8_i32_145 : i32 to vector<16x16xi32>
    %588 = arith.cmpi eq, %4, %587 : vector<16x16xi32>
    %589 = vector.extract_strided_slice %442 {offsets = [0, 18], sizes = [16, 1], strides = [1, 1]} : vector<16x21xf32> to vector<16x1xf32>
    %cst_146 = arith.constant 0.000000e+00 : f32
    %590 = vector.shape_cast %589 : vector<16x1xf32> to vector<16x1xf32>
    %591 = vector.broadcast %590 : vector<16x1xf32> to vector<16x16xf32>
    %592 = vector.broadcast %cst_146 : f32 to vector<16x16xf32>
    %593 = arith.select %588, %591, %592 : vector<16x16xi1>, vector<16x16xf32>
    %594 = arith.addf %586, %593 : vector<16x16xf32>
    %c9_i32_147 = arith.constant 9 : i32
    %595 = vector.broadcast %c9_i32_147 : i32 to vector<16x16xi32>
    %596 = arith.cmpi eq, %4, %595 : vector<16x16xi32>
    %597 = vector.extract_strided_slice %442 {offsets = [0, 19], sizes = [16, 1], strides = [1, 1]} : vector<16x21xf32> to vector<16x1xf32>
    %cst_148 = arith.constant 0.000000e+00 : f32
    %598 = vector.shape_cast %597 : vector<16x1xf32> to vector<16x1xf32>
    %599 = vector.broadcast %598 : vector<16x1xf32> to vector<16x16xf32>
    %600 = vector.broadcast %cst_148 : f32 to vector<16x16xf32>
    %601 = arith.select %596, %599, %600 : vector<16x16xi1>, vector<16x16xf32>
    %602 = arith.addf %594, %601 : vector<16x16xf32>
    %c10_i32_149 = arith.constant 10 : i32
    %603 = vector.broadcast %c10_i32_149 : i32 to vector<16x16xi32>
    %604 = arith.cmpi eq, %4, %603 : vector<16x16xi32>
    %605 = vector.extract_strided_slice %442 {offsets = [0, 20], sizes = [16, 1], strides = [1, 1]} : vector<16x21xf32> to vector<16x1xf32>
    %cst_150 = arith.constant 0.000000e+00 : f32
    %606 = vector.shape_cast %605 : vector<16x1xf32> to vector<16x1xf32>
    %607 = vector.broadcast %606 : vector<16x1xf32> to vector<16x16xf32>
    %608 = vector.broadcast %cst_150 : f32 to vector<16x16xf32>
    %609 = arith.select %604, %607, %608 : vector<16x16xi1>, vector<16x16xf32>
    %610 = arith.addf %602, %609 : vector<16x16xf32>
    %cst_151 = arith.constant -1.000000e+04 : f32
    %611 = vector.broadcast %cst_151 : f32 to vector<16x16xf32>
    %612 = arith.select %6, %610, %611 : vector<16x16xi1>, vector<16x16xf32>
    %cst_152 = arith.constant dense<0xFF800000> : vector<16xf32>
    %613 = vector.multi_reduction <maximumf>, %612, %cst_152 [1] : vector<16x16xf32> to vector<16xf32>
    %614 = vector.shape_cast %613 : vector<16xf32> to vector<16x1xf32>
    %615 = vector.broadcast %614 : vector<16x1xf32> to vector<16x16xf32>
    %616 = arith.subf %612, %615 : vector<16x16xf32>
    %617 = math.exp %616 : vector<16x16xf32>
    %cst_153 = arith.constant dense<0.000000e+00> : vector<16xf32>
    %618 = vector.multi_reduction <add>, %617, %cst_153 [1] : vector<16x16xf32> to vector<16xf32>
    %619 = vector.shape_cast %618 : vector<16xf32> to vector<16x1xf32>
    %620 = tpu.reciprocal %619 {approx = true} : vector<16x1xf32> -> vector<16x1xf32>
    %621 = vector.broadcast %620 : vector<16x1xf32> to vector<16x16xf32>
    %622 = arith.mulf %617, %621 : vector<16x16xf32>
    %623 = arith.truncf %622 : vector<16x16xf32> to vector<16x16xbf16>
    %cst_154 = arith.constant dense<0.000000e+00> : vector<16x16xf32>
    %624 = tpu.matmul %623, %440, %cst_154 {dimension_numbers = #tpu.dot_dimension_numbers<[1], [0], [0], [1], [0, 0, 1, 1], [], []>} : vector<16x16xbf16>, vector<16x16xbf16>, vector<16x16xf32> -> vector<16x16xf32>
    %c-10_i32_155 = arith.constant -10 : i32
    %625 = vector.broadcast %c-10_i32_155 : i32 to vector<16x16xi32>
    %626 = arith.cmpi eq, %4, %625 : vector<16x16xi32>
    %cst_156 = arith.constant 0.000000e+00 : f32
    %627 = vector.broadcast %cst_156 : f32 to vector<16x16xf32>
    %628 = arith.select %626, %622, %627 : vector<16x16xi1>, vector<16x16xf32>
    %cst_157 = arith.constant dense<0.000000e+00> : vector<16xf32>
    %629 = vector.multi_reduction <add>, %628, %cst_157 [1] : vector<16x16xf32> to vector<16xf32>
    %630 = vector.shape_cast %629 : vector<16xf32> to vector<16x1xf32>
    %631 = vector.extract_strided_slice %9 {offsets = [0, 0], sizes = [1, 16], strides = [1, 1]} : vector<21x16xf32> to vector<1x16xf32>
    %632 = vector.broadcast %630 : vector<16x1xf32> to vector<16x16xf32>
    %633 = vector.broadcast %631 : vector<1x16xf32> to vector<16x16xf32>
    %634 = arith.mulf %632, %633 : vector<16x16xf32>
    %635 = arith.addf %624, %634 : vector<16x16xf32>
    %c-9_i32_158 = arith.constant -9 : i32
    %636 = vector.broadcast %c-9_i32_158 : i32 to vector<16x16xi32>
    %637 = arith.cmpi eq, %4, %636 : vector<16x16xi32>
    %cst_159 = arith.constant 0.000000e+00 : f32
    %638 = vector.broadcast %cst_159 : f32 to vector<16x16xf32>
    %639 = arith.select %637, %622, %638 : vector<16x16xi1>, vector<16x16xf32>
    %cst_160 = arith.constant dense<0.000000e+00> : vector<16xf32>
    %640 = vector.multi_reduction <add>, %639, %cst_160 [1] : vector<16x16xf32> to vector<16xf32>
    %641 = vector.shape_cast %640 : vector<16xf32> to vector<16x1xf32>
    %642 = vector.extract_strided_slice %9 {offsets = [1, 0], sizes = [1, 16], strides = [1, 1]} : vector<21x16xf32> to vector<1x16xf32>
    %643 = vector.broadcast %641 : vector<16x1xf32> to vector<16x16xf32>
    %644 = vector.broadcast %642 : vector<1x16xf32> to vector<16x16xf32>
    %645 = arith.mulf %643, %644 : vector<16x16xf32>
    %646 = arith.addf %635, %645 : vector<16x16xf32>
    %c-8_i32_161 = arith.constant -8 : i32
    %647 = vector.broadcast %c-8_i32_161 : i32 to vector<16x16xi32>
    %648 = arith.cmpi eq, %4, %647 : vector<16x16xi32>
    %cst_162 = arith.constant 0.000000e+00 : f32
    %649 = vector.broadcast %cst_162 : f32 to vector<16x16xf32>
    %650 = arith.select %648, %622, %649 : vector<16x16xi1>, vector<16x16xf32>
    %cst_163 = arith.constant dense<0.000000e+00> : vector<16xf32>
    %651 = vector.multi_reduction <add>, %650, %cst_163 [1] : vector<16x16xf32> to vector<16xf32>
    %652 = vector.shape_cast %651 : vector<16xf32> to vector<16x1xf32>
    %653 = vector.extract_strided_slice %9 {offsets = [2, 0], sizes = [1, 16], strides = [1, 1]} : vector<21x16xf32> to vector<1x16xf32>
    %654 = vector.broadcast %652 : vector<16x1xf32> to vector<16x16xf32>
    %655 = vector.broadcast %653 : vector<1x16xf32> to vector<16x16xf32>
    %656 = arith.mulf %654, %655 : vector<16x16xf32>
    %657 = arith.addf %646, %656 : vector<16x16xf32>
    %c-7_i32_164 = arith.constant -7 : i32
    %658 = vector.broadcast %c-7_i32_164 : i32 to vector<16x16xi32>
    %659 = arith.cmpi eq, %4, %658 : vector<16x16xi32>
    %cst_165 = arith.constant 0.000000e+00 : f32
    %660 = vector.broadcast %cst_165 : f32 to vector<16x16xf32>
    %661 = arith.select %659, %622, %660 : vector<16x16xi1>, vector<16x16xf32>
    %cst_166 = arith.constant dense<0.000000e+00> : vector<16xf32>
    %662 = vector.multi_reduction <add>, %661, %cst_166 [1] : vector<16x16xf32> to vector<16xf32>
    %663 = vector.shape_cast %662 : vector<16xf32> to vector<16x1xf32>
    %664 = vector.extract_strided_slice %9 {offsets = [3, 0], sizes = [1, 16], strides = [1, 1]} : vector<21x16xf32> to vector<1x16xf32>
    %665 = vector.broadcast %663 : vector<16x1xf32> to vector<16x16xf32>
    %666 = vector.broadcast %664 : vector<1x16xf32> to vector<16x16xf32>
    %667 = arith.mulf %665, %666 : vector<16x16xf32>
    %668 = arith.addf %657, %667 : vector<16x16xf32>
    %c-6_i32_167 = arith.constant -6 : i32
    %669 = vector.broadcast %c-6_i32_167 : i32 to vector<16x16xi32>
    %670 = arith.cmpi eq, %4, %669 : vector<16x16xi32>
    %cst_168 = arith.constant 0.000000e+00 : f32
    %671 = vector.broadcast %cst_168 : f32 to vector<16x16xf32>
    %672 = arith.select %670, %622, %671 : vector<16x16xi1>, vector<16x16xf32>
    %cst_169 = arith.constant dense<0.000000e+00> : vector<16xf32>
    %673 = vector.multi_reduction <add>, %672, %cst_169 [1] : vector<16x16xf32> to vector<16xf32>
    %674 = vector.shape_cast %673 : vector<16xf32> to vector<16x1xf32>
    %675 = vector.extract_strided_slice %9 {offsets = [4, 0], sizes = [1, 16], strides = [1, 1]} : vector<21x16xf32> to vector<1x16xf32>
    %676 = vector.broadcast %674 : vector<16x1xf32> to vector<16x16xf32>
    %677 = vector.broadcast %675 : vector<1x16xf32> to vector<16x16xf32>
    %678 = arith.mulf %676, %677 : vector<16x16xf32>
    %679 = arith.addf %668, %678 : vector<16x16xf32>
    %c-5_i32_170 = arith.constant -5 : i32
    %680 = vector.broadcast %c-5_i32_170 : i32 to vector<16x16xi32>
    %681 = arith.cmpi eq, %4, %680 : vector<16x16xi32>
    %cst_171 = arith.constant 0.000000e+00 : f32
    %682 = vector.broadcast %cst_171 : f32 to vector<16x16xf32>
    %683 = arith.select %681, %622, %682 : vector<16x16xi1>, vector<16x16xf32>
    %cst_172 = arith.constant dense<0.000000e+00> : vector<16xf32>
    %684 = vector.multi_reduction <add>, %683, %cst_172 [1] : vector<16x16xf32> to vector<16xf32>
    %685 = vector.shape_cast %684 : vector<16xf32> to vector<16x1xf32>
    %686 = vector.extract_strided_slice %9 {offsets = [5, 0], sizes = [1, 16], strides = [1, 1]} : vector<21x16xf32> to vector<1x16xf32>
    %687 = vector.broadcast %685 : vector<16x1xf32> to vector<16x16xf32>
    %688 = vector.broadcast %686 : vector<1x16xf32> to vector<16x16xf32>
    %689 = arith.mulf %687, %688 : vector<16x16xf32>
    %690 = arith.addf %679, %689 : vector<16x16xf32>
    %c-4_i32_173 = arith.constant -4 : i32
    %691 = vector.broadcast %c-4_i32_173 : i32 to vector<16x16xi32>
    %692 = arith.cmpi eq, %4, %691 : vector<16x16xi32>
    %cst_174 = arith.constant 0.000000e+00 : f32
    %693 = vector.broadcast %cst_174 : f32 to vector<16x16xf32>
    %694 = arith.select %692, %622, %693 : vector<16x16xi1>, vector<16x16xf32>
    %cst_175 = arith.constant dense<0.000000e+00> : vector<16xf32>
    %695 = vector.multi_reduction <add>, %694, %cst_175 [1] : vector<16x16xf32> to vector<16xf32>
    %696 = vector.shape_cast %695 : vector<16xf32> to vector<16x1xf32>
    %697 = vector.extract_strided_slice %9 {offsets = [6, 0], sizes = [1, 16], strides = [1, 1]} : vector<21x16xf32> to vector<1x16xf32>
    %698 = vector.broadcast %696 : vector<16x1xf32> to vector<16x16xf32>
    %699 = vector.broadcast %697 : vector<1x16xf32> to vector<16x16xf32>
    %700 = arith.mulf %698, %699 : vector<16x16xf32>
    %701 = arith.addf %690, %700 : vector<16x16xf32>
    %c-3_i32_176 = arith.constant -3 : i32
    %702 = vector.broadcast %c-3_i32_176 : i32 to vector<16x16xi32>
    %703 = arith.cmpi eq, %4, %702 : vector<16x16xi32>
    %cst_177 = arith.constant 0.000000e+00 : f32
    %704 = vector.broadcast %cst_177 : f32 to vector<16x16xf32>
    %705 = arith.select %703, %622, %704 : vector<16x16xi1>, vector<16x16xf32>
    %cst_178 = arith.constant dense<0.000000e+00> : vector<16xf32>
    %706 = vector.multi_reduction <add>, %705, %cst_178 [1] : vector<16x16xf32> to vector<16xf32>
    %707 = vector.shape_cast %706 : vector<16xf32> to vector<16x1xf32>
    %708 = vector.extract_strided_slice %9 {offsets = [7, 0], sizes = [1, 16], strides = [1, 1]} : vector<21x16xf32> to vector<1x16xf32>
    %709 = vector.broadcast %707 : vector<16x1xf32> to vector<16x16xf32>
    %710 = vector.broadcast %708 : vector<1x16xf32> to vector<16x16xf32>
    %711 = arith.mulf %709, %710 : vector<16x16xf32>
    %712 = arith.addf %701, %711 : vector<16x16xf32>
    %c-2_i32_179 = arith.constant -2 : i32
    %713 = vector.broadcast %c-2_i32_179 : i32 to vector<16x16xi32>
    %714 = arith.cmpi eq, %4, %713 : vector<16x16xi32>
    %cst_180 = arith.constant 0.000000e+00 : f32
    %715 = vector.broadcast %cst_180 : f32 to vector<16x16xf32>
    %716 = arith.select %714, %622, %715 : vector<16x16xi1>, vector<16x16xf32>
    %cst_181 = arith.constant dense<0.000000e+00> : vector<16xf32>
    %717 = vector.multi_reduction <add>, %716, %cst_181 [1] : vector<16x16xf32> to vector<16xf32>
    %718 = vector.shape_cast %717 : vector<16xf32> to vector<16x1xf32>
    %719 = vector.extract_strided_slice %9 {offsets = [8, 0], sizes = [1, 16], strides = [1, 1]} : vector<21x16xf32> to vector<1x16xf32>
    %720 = vector.broadcast %718 : vector<16x1xf32> to vector<16x16xf32>
    %721 = vector.broadcast %719 : vector<1x16xf32> to vector<16x16xf32>
    %722 = arith.mulf %720, %721 : vector<16x16xf32>
    %723 = arith.addf %712, %722 : vector<16x16xf32>
    %c-1_i32_182 = arith.constant -1 : i32
    %724 = vector.broadcast %c-1_i32_182 : i32 to vector<16x16xi32>
    %725 = arith.cmpi eq, %4, %724 : vector<16x16xi32>
    %cst_183 = arith.constant 0.000000e+00 : f32
    %726 = vector.broadcast %cst_183 : f32 to vector<16x16xf32>
    %727 = arith.select %725, %622, %726 : vector<16x16xi1>, vector<16x16xf32>
    %cst_184 = arith.constant dense<0.000000e+00> : vector<16xf32>
    %728 = vector.multi_reduction <add>, %727, %cst_184 [1] : vector<16x16xf32> to vector<16xf32>
    %729 = vector.shape_cast %728 : vector<16xf32> to vector<16x1xf32>
    %730 = vector.extract_strided_slice %9 {offsets = [9, 0], sizes = [1, 16], strides = [1, 1]} : vector<21x16xf32> to vector<1x16xf32>
    %731 = vector.broadcast %729 : vector<16x1xf32> to vector<16x16xf32>
    %732 = vector.broadcast %730 : vector<1x16xf32> to vector<16x16xf32>
    %733 = arith.mulf %731, %732 : vector<16x16xf32>
    %734 = arith.addf %723, %733 : vector<16x16xf32>
    %c0_i32_185 = arith.constant 0 : i32
    %735 = vector.broadcast %c0_i32_185 : i32 to vector<16x16xi32>
    %736 = arith.cmpi eq, %4, %735 : vector<16x16xi32>
    %cst_186 = arith.constant 0.000000e+00 : f32
    %737 = vector.broadcast %cst_186 : f32 to vector<16x16xf32>
    %738 = arith.select %736, %622, %737 : vector<16x16xi1>, vector<16x16xf32>
    %cst_187 = arith.constant dense<0.000000e+00> : vector<16xf32>
    %739 = vector.multi_reduction <add>, %738, %cst_187 [1] : vector<16x16xf32> to vector<16xf32>
    %740 = vector.shape_cast %739 : vector<16xf32> to vector<16x1xf32>
    %741 = vector.extract_strided_slice %9 {offsets = [10, 0], sizes = [1, 16], strides = [1, 1]} : vector<21x16xf32> to vector<1x16xf32>
    %742 = vector.broadcast %740 : vector<16x1xf32> to vector<16x16xf32>
    %743 = vector.broadcast %741 : vector<1x16xf32> to vector<16x16xf32>
    %744 = arith.mulf %742, %743 : vector<16x16xf32>
    %745 = arith.addf %734, %744 : vector<16x16xf32>
    %c1_i32_188 = arith.constant 1 : i32
    %746 = vector.broadcast %c1_i32_188 : i32 to vector<16x16xi32>
    %747 = arith.cmpi eq, %4, %746 : vector<16x16xi32>
    %cst_189 = arith.constant 0.000000e+00 : f32
    %748 = vector.broadcast %cst_189 : f32 to vector<16x16xf32>
    %749 = arith.select %747, %622, %748 : vector<16x16xi1>, vector<16x16xf32>
    %cst_190 = arith.constant dense<0.000000e+00> : vector<16xf32>
    %750 = vector.multi_reduction <add>, %749, %cst_190 [1] : vector<16x16xf32> to vector<16xf32>
    %751 = vector.shape_cast %750 : vector<16xf32> to vector<16x1xf32>
    %752 = vector.extract_strided_slice %9 {offsets = [11, 0], sizes = [1, 16], strides = [1, 1]} : vector<21x16xf32> to vector<1x16xf32>
    %753 = vector.broadcast %751 : vector<16x1xf32> to vector<16x16xf32>
    %754 = vector.broadcast %752 : vector<1x16xf32> to vector<16x16xf32>
    %755 = arith.mulf %753, %754 : vector<16x16xf32>
    %756 = arith.addf %745, %755 : vector<16x16xf32>
    %c2_i32_191 = arith.constant 2 : i32
    %757 = vector.broadcast %c2_i32_191 : i32 to vector<16x16xi32>
    %758 = arith.cmpi eq, %4, %757 : vector<16x16xi32>
    %cst_192 = arith.constant 0.000000e+00 : f32
    %759 = vector.broadcast %cst_192 : f32 to vector<16x16xf32>
    %760 = arith.select %758, %622, %759 : vector<16x16xi1>, vector<16x16xf32>
    %cst_193 = arith.constant dense<0.000000e+00> : vector<16xf32>
    %761 = vector.multi_reduction <add>, %760, %cst_193 [1] : vector<16x16xf32> to vector<16xf32>
    %762 = vector.shape_cast %761 : vector<16xf32> to vector<16x1xf32>
    %763 = vector.extract_strided_slice %9 {offsets = [12, 0], sizes = [1, 16], strides = [1, 1]} : vector<21x16xf32> to vector<1x16xf32>
    %764 = vector.broadcast %762 : vector<16x1xf32> to vector<16x16xf32>
    %765 = vector.broadcast %763 : vector<1x16xf32> to vector<16x16xf32>
    %766 = arith.mulf %764, %765 : vector<16x16xf32>
    %767 = arith.addf %756, %766 : vector<16x16xf32>
    %c3_i32_194 = arith.constant 3 : i32
    %768 = vector.broadcast %c3_i32_194 : i32 to vector<16x16xi32>
    %769 = arith.cmpi eq, %4, %768 : vector<16x16xi32>
    %cst_195 = arith.constant 0.000000e+00 : f32
    %770 = vector.broadcast %cst_195 : f32 to vector<16x16xf32>
    %771 = arith.select %769, %622, %770 : vector<16x16xi1>, vector<16x16xf32>
    %cst_196 = arith.constant dense<0.000000e+00> : vector<16xf32>
    %772 = vector.multi_reduction <add>, %771, %cst_196 [1] : vector<16x16xf32> to vector<16xf32>
    %773 = vector.shape_cast %772 : vector<16xf32> to vector<16x1xf32>
    %774 = vector.extract_strided_slice %9 {offsets = [13, 0], sizes = [1, 16], strides = [1, 1]} : vector<21x16xf32> to vector<1x16xf32>
    %775 = vector.broadcast %773 : vector<16x1xf32> to vector<16x16xf32>
    %776 = vector.broadcast %774 : vector<1x16xf32> to vector<16x16xf32>
    %777 = arith.mulf %775, %776 : vector<16x16xf32>
    %778 = arith.addf %767, %777 : vector<16x16xf32>
    %c4_i32_197 = arith.constant 4 : i32
    %779 = vector.broadcast %c4_i32_197 : i32 to vector<16x16xi32>
    %780 = arith.cmpi eq, %4, %779 : vector<16x16xi32>
    %cst_198 = arith.constant 0.000000e+00 : f32
    %781 = vector.broadcast %cst_198 : f32 to vector<16x16xf32>
    %782 = arith.select %780, %622, %781 : vector<16x16xi1>, vector<16x16xf32>
    %cst_199 = arith.constant dense<0.000000e+00> : vector<16xf32>
    %783 = vector.multi_reduction <add>, %782, %cst_199 [1] : vector<16x16xf32> to vector<16xf32>
    %784 = vector.shape_cast %783 : vector<16xf32> to vector<16x1xf32>
    %785 = vector.extract_strided_slice %9 {offsets = [14, 0], sizes = [1, 16], strides = [1, 1]} : vector<21x16xf32> to vector<1x16xf32>
    %786 = vector.broadcast %784 : vector<16x1xf32> to vector<16x16xf32>
    %787 = vector.broadcast %785 : vector<1x16xf32> to vector<16x16xf32>
    %788 = arith.mulf %786, %787 : vector<16x16xf32>
    %789 = arith.addf %778, %788 : vector<16x16xf32>
    %c5_i32_200 = arith.constant 5 : i32
    %790 = vector.broadcast %c5_i32_200 : i32 to vector<16x16xi32>
    %791 = arith.cmpi eq, %4, %790 : vector<16x16xi32>
    %cst_201 = arith.constant 0.000000e+00 : f32
    %792 = vector.broadcast %cst_201 : f32 to vector<16x16xf32>
    %793 = arith.select %791, %622, %792 : vector<16x16xi1>, vector<16x16xf32>
    %cst_202 = arith.constant dense<0.000000e+00> : vector<16xf32>
    %794 = vector.multi_reduction <add>, %793, %cst_202 [1] : vector<16x16xf32> to vector<16xf32>
    %795 = vector.shape_cast %794 : vector<16xf32> to vector<16x1xf32>
    %796 = vector.extract_strided_slice %9 {offsets = [15, 0], sizes = [1, 16], strides = [1, 1]} : vector<21x16xf32> to vector<1x16xf32>
    %797 = vector.broadcast %795 : vector<16x1xf32> to vector<16x16xf32>
    %798 = vector.broadcast %796 : vector<1x16xf32> to vector<16x16xf32>
    %799 = arith.mulf %797, %798 : vector<16x16xf32>
    %800 = arith.addf %789, %799 : vector<16x16xf32>
    %c6_i32_203 = arith.constant 6 : i32
    %801 = vector.broadcast %c6_i32_203 : i32 to vector<16x16xi32>
    %802 = arith.cmpi eq, %4, %801 : vector<16x16xi32>
    %cst_204 = arith.constant 0.000000e+00 : f32
    %803 = vector.broadcast %cst_204 : f32 to vector<16x16xf32>
    %804 = arith.select %802, %622, %803 : vector<16x16xi1>, vector<16x16xf32>
    %cst_205 = arith.constant dense<0.000000e+00> : vector<16xf32>
    %805 = vector.multi_reduction <add>, %804, %cst_205 [1] : vector<16x16xf32> to vector<16xf32>
    %806 = vector.shape_cast %805 : vector<16xf32> to vector<16x1xf32>
    %807 = vector.extract_strided_slice %9 {offsets = [16, 0], sizes = [1, 16], strides = [1, 1]} : vector<21x16xf32> to vector<1x16xf32>
    %808 = vector.broadcast %806 : vector<16x1xf32> to vector<16x16xf32>
    %809 = vector.broadcast %807 : vector<1x16xf32> to vector<16x16xf32>
    %810 = arith.mulf %808, %809 : vector<16x16xf32>
    %811 = arith.addf %800, %810 : vector<16x16xf32>
    %c7_i32_206 = arith.constant 7 : i32
    %812 = vector.broadcast %c7_i32_206 : i32 to vector<16x16xi32>
    %813 = arith.cmpi eq, %4, %812 : vector<16x16xi32>
    %cst_207 = arith.constant 0.000000e+00 : f32
    %814 = vector.broadcast %cst_207 : f32 to vector<16x16xf32>
    %815 = arith.select %813, %622, %814 : vector<16x16xi1>, vector<16x16xf32>
    %cst_208 = arith.constant dense<0.000000e+00> : vector<16xf32>
    %816 = vector.multi_reduction <add>, %815, %cst_208 [1] : vector<16x16xf32> to vector<16xf32>
    %817 = vector.shape_cast %816 : vector<16xf32> to vector<16x1xf32>
    %818 = vector.extract_strided_slice %9 {offsets = [17, 0], sizes = [1, 16], strides = [1, 1]} : vector<21x16xf32> to vector<1x16xf32>
    %819 = vector.broadcast %817 : vector<16x1xf32> to vector<16x16xf32>
    %820 = vector.broadcast %818 : vector<1x16xf32> to vector<16x16xf32>
    %821 = arith.mulf %819, %820 : vector<16x16xf32>
    %822 = arith.addf %811, %821 : vector<16x16xf32>
    %c8_i32_209 = arith.constant 8 : i32
    %823 = vector.broadcast %c8_i32_209 : i32 to vector<16x16xi32>
    %824 = arith.cmpi eq, %4, %823 : vector<16x16xi32>
    %cst_210 = arith.constant 0.000000e+00 : f32
    %825 = vector.broadcast %cst_210 : f32 to vector<16x16xf32>
    %826 = arith.select %824, %622, %825 : vector<16x16xi1>, vector<16x16xf32>
    %cst_211 = arith.constant dense<0.000000e+00> : vector<16xf32>
    %827 = vector.multi_reduction <add>, %826, %cst_211 [1] : vector<16x16xf32> to vector<16xf32>
    %828 = vector.shape_cast %827 : vector<16xf32> to vector<16x1xf32>
    %829 = vector.extract_strided_slice %9 {offsets = [18, 0], sizes = [1, 16], strides = [1, 1]} : vector<21x16xf32> to vector<1x16xf32>
    %830 = vector.broadcast %828 : vector<16x1xf32> to vector<16x16xf32>
    %831 = vector.broadcast %829 : vector<1x16xf32> to vector<16x16xf32>
    %832 = arith.mulf %830, %831 : vector<16x16xf32>
    %833 = arith.addf %822, %832 : vector<16x16xf32>
    %c9_i32_212 = arith.constant 9 : i32
    %834 = vector.broadcast %c9_i32_212 : i32 to vector<16x16xi32>
    %835 = arith.cmpi eq, %4, %834 : vector<16x16xi32>
    %cst_213 = arith.constant 0.000000e+00 : f32
    %836 = vector.broadcast %cst_213 : f32 to vector<16x16xf32>
    %837 = arith.select %835, %622, %836 : vector<16x16xi1>, vector<16x16xf32>
    %cst_214 = arith.constant dense<0.000000e+00> : vector<16xf32>
    %838 = vector.multi_reduction <add>, %837, %cst_214 [1] : vector<16x16xf32> to vector<16xf32>
    %839 = vector.shape_cast %838 : vector<16xf32> to vector<16x1xf32>
    %840 = vector.extract_strided_slice %9 {offsets = [19, 0], sizes = [1, 16], strides = [1, 1]} : vector<21x16xf32> to vector<1x16xf32>
    %841 = vector.broadcast %839 : vector<16x1xf32> to vector<16x16xf32>
    %842 = vector.broadcast %840 : vector<1x16xf32> to vector<16x16xf32>
    %843 = arith.mulf %841, %842 : vector<16x16xf32>
    %844 = arith.addf %833, %843 : vector<16x16xf32>
    %c10_i32_215 = arith.constant 10 : i32
    %845 = vector.broadcast %c10_i32_215 : i32 to vector<16x16xi32>
    %846 = arith.cmpi eq, %4, %845 : vector<16x16xi32>
    %cst_216 = arith.constant 0.000000e+00 : f32
    %847 = vector.broadcast %cst_216 : f32 to vector<16x16xf32>
    %848 = arith.select %846, %622, %847 : vector<16x16xi1>, vector<16x16xf32>
    %cst_217 = arith.constant dense<0.000000e+00> : vector<16xf32>
    %849 = vector.multi_reduction <add>, %848, %cst_217 [1] : vector<16x16xf32> to vector<16xf32>
    %850 = vector.shape_cast %849 : vector<16xf32> to vector<16x1xf32>
    %851 = vector.extract_strided_slice %9 {offsets = [20, 0], sizes = [1, 16], strides = [1, 1]} : vector<21x16xf32> to vector<1x16xf32>
    %852 = vector.broadcast %850 : vector<16x1xf32> to vector<16x16xf32>
    %853 = vector.broadcast %851 : vector<1x16xf32> to vector<16x16xf32>
    %854 = arith.mulf %852, %853 : vector<16x16xf32>
    %855 = arith.addf %844, %854 : vector<16x16xf32>
    %856 = tpu.concatenate %432, %855 in 1 : vector<16x16xf32>, vector<16x16xf32> -> vector<16x32xf32>
    %857 = arith.truncf %856 : vector<16x32xf32> to vector<16x32xbf16>
    %c0_218 = arith.constant 0 : index
    %c0_219 = arith.constant 0 : index
    %c0_220 = arith.constant 0 : index
    %858 = vector.load %arg5[%c0_218, %c0_219, %c0_220] : memref<1x16x32xbf16, #tpu.memory_space<vmem>>, vector<1x16x32xbf16>
    %859 = vector.shape_cast %858 : vector<1x16x32xbf16> to vector<16x32xbf16>
    %860 = vector.shape_cast %857 : vector<16x32xbf16> to vector<1x16x32xbf16>
    tpu.vector_store %arg5[%c0_218, %c0_219, %c0_220], %860 {strides = array<i32>} : memref<1x16x32xbf16, #tpu.memory_space<vmem>>, vector<1x16x32xbf16>,
    return
  }
  func.func @transform_0(%arg0: i32, %arg1: memref<2xi32, #tpu.memory_space<smem>>) -> (i32, i32, i32) {
    %c0_i32 = arith.constant 0 : i32
    %c0_i32_0 = arith.constant 0 : i32
    %c0_i32_1 = arith.constant 0 : i32
    return %arg0, %c0_i32, %c0_i32_0 : i32, i32, i32
  }
  func.func @transform_1(%arg0: i32, %arg1: memref<2xi32, #tpu.memory_space<smem>>) -> (i32, i32) {
    %c0_i32 = arith.constant 0 : i32
    %c0_i32_0 = arith.constant 0 : i32
    %c0_i32_1 = arith.constant 0 : i32
    return %c0_i32, %c0_i32_0 : i32, i32
  }
  func.func @transform_2(%arg0: i32, %arg1: memref<2xi32, #tpu.memory_space<smem>>) -> (i32, i32) {
    %c0_i32 = arith.constant 0 : i32
    %c0_i32_0 = arith.constant 0 : i32
    %c0_i32_1 = arith.constant 0 : i32
    return %c0_i32, %c0_i32_0 : i32, i32
  }
  func.func @transform_3(%arg0: i32, %arg1: memref<2xi32, #tpu.memory_space<smem>>) -> (i32, i32, i32) {
    %c0_i32 = arith.constant 0 : i32
    %c0_i32_0 = arith.constant 0 : i32
    %c0_i32_1 = arith.constant 0 : i32
    return %arg0, %c0_i32, %c0_i32_0 : i32, i32, i32
  }
}

module attributes {stable_mosaic.version = 11 : i64} {
  func.func @_ffn_conv1_kernel(%arg0: i32, %arg1: memref<2xi32, #tpu.memory_space<smem>>, %arg2: memref<1x18x32xf32, #tpu.memory_space<vmem>>, %arg3: memref<3x32x64xbf16, #tpu.memory_space<vmem>>, %arg4: memref<1x64xf32, #tpu.memory_space<vmem>>, %arg5: memref<1x16x64xbf16, #tpu.memory_space<vmem>>) attributes {dimension_semantics = [#tpu.dimension_semantics<parallel>], iteration_bounds = array<i64: 2>, scalar_prefetch = 1 : i64, scratch_operands = 0 : i64, tpu.core_type = #tpu.core_type<tc>, window_params = [{transform_indices = @transform_0, window_bounds = array<i64: 1, 18, 32>}, {pipeline_mode = #tpu.pipeline_mode<synchronous>, transform_indices = @transform_1, window_bounds = array<i64: 3, 32, 64>}, {pipeline_mode = #tpu.pipeline_mode<synchronous>, transform_indices = @transform_2, window_bounds = array<i64: 1, 64>}, {transform_indices = @transform_3, window_bounds = array<i64: 1, 16, 64>}]} {
    %0 = arith.index_cast %arg0 : i32 to index
    %1 = memref.load %arg1[%0] : memref<2xi32, #tpu.memory_space<smem>>
    %2 = tpu.iota {dimensions = array<i32: 0>} : vector<18x1xi32>
    %c1_i32 = arith.constant 1 : i32
    %3 = vector.broadcast %c1_i32 : i32 to vector<18x1xi32>
    %4 = arith.subi %2, %3 : vector<18x1xi32>
    %c0_i32 = arith.constant 0 : i32
    %5 = vector.broadcast %c0_i32 : i32 to vector<18x1xi32>
    %6 = arith.cmpi sge, %4, %5 : vector<18x1xi32>
    %7 = vector.broadcast %1 : i32 to vector<18x1xi32>
    %8 = arith.cmpi slt, %4, %7 : vector<18x1xi32>
    %9 = arith.andi %6, %8 : vector<18x1xi1>
    %c0 = arith.constant 0 : index
    %c0_0 = arith.constant 0 : index
    %c0_1 = arith.constant 0 : index
    %10 = vector.load %arg2[%c0, %c0_0, %c0_1] : memref<1x18x32xf32, #tpu.memory_space<vmem>>, vector<1x18x32xf32>
    %11 = vector.shape_cast %10 : vector<1x18x32xf32> to vector<18x32xf32>
    %cst = arith.constant 0.000000e+00 : f32
    %12 = vector.shape_cast %9 : vector<18x1xi1> to vector<18x1xi1>
    %13 = vector.broadcast %12 : vector<18x1xi1> to vector<18x32xi1>
    %14 = vector.broadcast %cst : f32 to vector<18x32xf32>
    %15 = arith.select %13, %11, %14 : vector<18x32xi1>, vector<18x32xf32>
    %16 = arith.truncf %15 : vector<18x32xf32> to vector<18x32xbf16>
    %cst_2 = arith.constant 0.000000e+00 : f32
    %17 = vector.broadcast %cst_2 : f32 to vector<16x64xf32>
    %18 = vector.extract_strided_slice %16 {offsets = [0, 0], sizes = [16, 32], strides = [1, 1]} : vector<18x32xbf16> to vector<16x32xbf16>
    %c0_3 = arith.constant 0 : index
    %c0_4 = arith.constant 0 : index
    %c0_5 = arith.constant 0 : index
    %19 = vector.load %arg3[%c0_3, %c0_4, %c0_5] : memref<3x32x64xbf16, #tpu.memory_space<vmem>>, vector<1x32x64xbf16>
    %20 = vector.shape_cast %19 : vector<1x32x64xbf16> to vector<32x64xbf16>
    %cst_6 = arith.constant dense<0.000000e+00> : vector<16x64xf32>
    %21 = tpu.matmul %18, %20, %cst_6 {dimension_numbers = #tpu.dot_dimension_numbers<[1], [0], [0], [1], [0, 0, 1, 1], [], []>} : vector<16x32xbf16>, vector<32x64xbf16>, vector<16x64xf32> -> vector<16x64xf32>
    %22 = arith.addf %17, %21 : vector<16x64xf32>
    %23 = vector.extract_strided_slice %16 {offsets = [1, 0], sizes = [16, 32], strides = [1, 1]} : vector<18x32xbf16> to vector<16x32xbf16>
    %c1 = arith.constant 1 : index
    %c0_7 = arith.constant 0 : index
    %c0_8 = arith.constant 0 : index
    %24 = vector.load %arg3[%c1, %c0_7, %c0_8] : memref<3x32x64xbf16, #tpu.memory_space<vmem>>, vector<1x32x64xbf16>
    %25 = vector.shape_cast %24 : vector<1x32x64xbf16> to vector<32x64xbf16>
    %cst_9 = arith.constant dense<0.000000e+00> : vector<16x64xf32>
    %26 = tpu.matmul %23, %25, %cst_9 {dimension_numbers = #tpu.dot_dimension_numbers<[1], [0], [0], [1], [0, 0, 1, 1], [], []>} : vector<16x32xbf16>, vector<32x64xbf16>, vector<16x64xf32> -> vector<16x64xf32>
    %27 = arith.addf %22, %26 : vector<16x64xf32>
    %28 = vector.extract_strided_slice %16 {offsets = [2, 0], sizes = [16, 32], strides = [1, 1]} : vector<18x32xbf16> to vector<16x32xbf16>
    %c2 = arith.constant 2 : index
    %c0_10 = arith.constant 0 : index
    %c0_11 = arith.constant 0 : index
    %29 = vector.load %arg3[%c2, %c0_10, %c0_11] : memref<3x32x64xbf16, #tpu.memory_space<vmem>>, vector<1x32x64xbf16>
    %30 = vector.shape_cast %29 : vector<1x32x64xbf16> to vector<32x64xbf16>
    %cst_12 = arith.constant dense<0.000000e+00> : vector<16x64xf32>
    %31 = tpu.matmul %28, %30, %cst_12 {dimension_numbers = #tpu.dot_dimension_numbers<[1], [0], [0], [1], [0, 0, 1, 1], [], []>} : vector<16x32xbf16>, vector<32x64xbf16>, vector<16x64xf32> -> vector<16x64xf32>
    %32 = arith.addf %27, %31 : vector<16x64xf32>
    %c0_13 = arith.constant 0 : index
    %c0_14 = arith.constant 0 : index
    %33 = vector.load %arg4[%c0_13, %c0_14] : memref<1x64xf32, #tpu.memory_space<vmem>>, vector<1x64xf32>
    %34 = vector.broadcast %33 : vector<1x64xf32> to vector<16x64xf32>
    %35 = arith.addf %32, %34 : vector<16x64xf32>
    %cst_15 = arith.constant 0.000000e+00 : f32
    %36 = vector.broadcast %cst_15 : f32 to vector<16x64xf32>
    %37 = arith.maximumf %35, %36 : vector<16x64xf32>
    %38 = tpu.iota {dimensions = array<i32: 0>} : vector<16x1xi32>
    %39 = vector.broadcast %1 : i32 to vector<16x1xi32>
    %40 = arith.cmpi slt, %38, %39 : vector<16x1xi32>
    %cst_16 = arith.constant 0.000000e+00 : f32
    %41 = vector.shape_cast %40 : vector<16x1xi1> to vector<16x1xi1>
    %42 = vector.broadcast %41 : vector<16x1xi1> to vector<16x64xi1>
    %43 = vector.broadcast %cst_16 : f32 to vector<16x64xf32>
    %44 = arith.select %42, %37, %43 : vector<16x64xi1>, vector<16x64xf32>
    %45 = arith.truncf %44 : vector<16x64xf32> to vector<16x64xbf16>
    %c0_17 = arith.constant 0 : index
    %c0_18 = arith.constant 0 : index
    %c0_19 = arith.constant 0 : index
    %46 = vector.load %arg5[%c0_17, %c0_18, %c0_19] : memref<1x16x64xbf16, #tpu.memory_space<vmem>>, vector<1x16x64xbf16>
    %47 = vector.shape_cast %46 : vector<1x16x64xbf16> to vector<16x64xbf16>
    %48 = vector.shape_cast %45 : vector<16x64xbf16> to vector<1x16x64xbf16>
    tpu.vector_store %arg5[%c0_17, %c0_18, %c0_19], %48 {strides = array<i32>} : memref<1x16x64xbf16, #tpu.memory_space<vmem>>, vector<1x16x64xbf16>,
    return
  }
  func.func @transform_0(%arg0: i32, %arg1: memref<2xi32, #tpu.memory_space<smem>>) -> (i32, i32, i32) {
    %c0_i32 = arith.constant 0 : i32
    %c0_i32_0 = arith.constant 0 : i32
    %c0_i32_1 = arith.constant 0 : i32
    return %arg0, %c0_i32, %c0_i32_0 : i32, i32, i32
  }
  func.func @transform_1(%arg0: i32, %arg1: memref<2xi32, #tpu.memory_space<smem>>) -> (i32, i32, i32) {
    %c0_i32 = arith.constant 0 : i32
    %c0_i32_0 = arith.constant 0 : i32
    %c0_i32_1 = arith.constant 0 : i32
    %c0_i32_2 = arith.constant 0 : i32
    return %c0_i32, %c0_i32_0, %c0_i32_1 : i32, i32, i32
  }
  func.func @transform_2(%arg0: i32, %arg1: memref<2xi32, #tpu.memory_space<smem>>) -> (i32, i32) {
    %c0_i32 = arith.constant 0 : i32
    %c0_i32_0 = arith.constant 0 : i32
    %c0_i32_1 = arith.constant 0 : i32
    return %c0_i32, %c0_i32_0 : i32, i32
  }
  func.func @transform_3(%arg0: i32, %arg1: memref<2xi32, #tpu.memory_space<smem>>) -> (i32, i32, i32) {
    %c0_i32 = arith.constant 0 : i32
    %c0_i32_0 = arith.constant 0 : i32
    %c0_i32_1 = arith.constant 0 : i32
    return %arg0, %c0_i32, %c0_i32_0 : i32, i32, i32
  }
}

module attributes {stable_mosaic.version = 11 : i64} {
  func.func @_ffn_conv2_res_ln_kernel(%arg0: i32, %arg1: memref<1x18x64xbf16, #tpu.memory_space<vmem>>, %arg2: memref<3x64x32xbf16, #tpu.memory_space<vmem>>, %arg3: memref<1x32xf32, #tpu.memory_space<vmem>>, %arg4: memref<1x16x32xf32, #tpu.memory_space<vmem>>, %arg5: memref<1x32xf32, #tpu.memory_space<vmem>>, %arg6: memref<1x32xf32, #tpu.memory_space<vmem>>, %arg7: memref<1x16x32xf32, #tpu.memory_space<vmem>>) attributes {dimension_semantics = [#tpu.dimension_semantics<parallel>], iteration_bounds = array<i64: 2>, scalar_prefetch = 0 : i64, scratch_operands = 0 : i64, tpu.core_type = #tpu.core_type<tc>, window_params = [{transform_indices = @transform_0, window_bounds = array<i64: 1, 18, 64>}, {pipeline_mode = #tpu.pipeline_mode<synchronous>, transform_indices = @transform_1, window_bounds = array<i64: 3, 64, 32>}, {pipeline_mode = #tpu.pipeline_mode<synchronous>, transform_indices = @transform_2, window_bounds = array<i64: 1, 32>}, {transform_indices = @transform_3, window_bounds = array<i64: 1, 16, 32>}, {pipeline_mode = #tpu.pipeline_mode<synchronous>, transform_indices = @transform_4, window_bounds = array<i64: 1, 32>}, {pipeline_mode = #tpu.pipeline_mode<synchronous>, transform_indices = @transform_5, window_bounds = array<i64: 1, 32>}, {transform_indices = @transform_6, window_bounds = array<i64: 1, 16, 32>}]} {
    %c0 = arith.constant 0 : index
    %c0_0 = arith.constant 0 : index
    %c0_1 = arith.constant 0 : index
    %0 = vector.load %arg1[%c0, %c0_0, %c0_1] : memref<1x18x64xbf16, #tpu.memory_space<vmem>>, vector<1x18x64xbf16>
    %1 = vector.shape_cast %0 : vector<1x18x64xbf16> to vector<18x64xbf16>
    %cst = arith.constant 0.000000e+00 : f32
    %2 = vector.broadcast %cst : f32 to vector<16x32xf32>
    %3 = vector.extract_strided_slice %1 {offsets = [0, 0], sizes = [16, 64], strides = [1, 1]} : vector<18x64xbf16> to vector<16x64xbf16>
    %c0_2 = arith.constant 0 : index
    %c0_3 = arith.constant 0 : index
    %c0_4 = arith.constant 0 : index
    %4 = vector.load %arg2[%c0_2, %c0_3, %c0_4] : memref<3x64x32xbf16, #tpu.memory_space<vmem>>, vector<1x64x32xbf16>
    %5 = vector.shape_cast %4 : vector<1x64x32xbf16> to vector<64x32xbf16>
    %cst_5 = arith.constant dense<0.000000e+00> : vector<16x32xf32>
    %6 = tpu.matmul %3, %5, %cst_5 {dimension_numbers = #tpu.dot_dimension_numbers<[1], [0], [0], [1], [0, 0, 1, 1], [], []>} : vector<16x64xbf16>, vector<64x32xbf16>, vector<16x32xf32> -> vector<16x32xf32>
    %7 = arith.addf %2, %6 : vector<16x32xf32>
    %8 = vector.extract_strided_slice %1 {offsets = [1, 0], sizes = [16, 64], strides = [1, 1]} : vector<18x64xbf16> to vector<16x64xbf16>
    %c1 = arith.constant 1 : index
    %c0_6 = arith.constant 0 : index
    %c0_7 = arith.constant 0 : index
    %9 = vector.load %arg2[%c1, %c0_6, %c0_7] : memref<3x64x32xbf16, #tpu.memory_space<vmem>>, vector<1x64x32xbf16>
    %10 = vector.shape_cast %9 : vector<1x64x32xbf16> to vector<64x32xbf16>
    %cst_8 = arith.constant dense<0.000000e+00> : vector<16x32xf32>
    %11 = tpu.matmul %8, %10, %cst_8 {dimension_numbers = #tpu.dot_dimension_numbers<[1], [0], [0], [1], [0, 0, 1, 1], [], []>} : vector<16x64xbf16>, vector<64x32xbf16>, vector<16x32xf32> -> vector<16x32xf32>
    %12 = arith.addf %7, %11 : vector<16x32xf32>
    %13 = vector.extract_strided_slice %1 {offsets = [2, 0], sizes = [16, 64], strides = [1, 1]} : vector<18x64xbf16> to vector<16x64xbf16>
    %c2 = arith.constant 2 : index
    %c0_9 = arith.constant 0 : index
    %c0_10 = arith.constant 0 : index
    %14 = vector.load %arg2[%c2, %c0_9, %c0_10] : memref<3x64x32xbf16, #tpu.memory_space<vmem>>, vector<1x64x32xbf16>
    %15 = vector.shape_cast %14 : vector<1x64x32xbf16> to vector<64x32xbf16>
    %cst_11 = arith.constant dense<0.000000e+00> : vector<16x32xf32>
    %16 = tpu.matmul %13, %15, %cst_11 {dimension_numbers = #tpu.dot_dimension_numbers<[1], [0], [0], [1], [0, 0, 1, 1], [], []>} : vector<16x64xbf16>, vector<64x32xbf16>, vector<16x32xf32> -> vector<16x32xf32>
    %17 = arith.addf %12, %16 : vector<16x32xf32>
    %c0_12 = arith.constant 0 : index
    %c0_13 = arith.constant 0 : index
    %c0_14 = arith.constant 0 : index
    %18 = vector.load %arg4[%c0_12, %c0_13, %c0_14] : memref<1x16x32xf32, #tpu.memory_space<vmem>>, vector<1x16x32xf32>
    %19 = vector.shape_cast %18 : vector<1x16x32xf32> to vector<16x32xf32>
    %20 = arith.addf %19, %17 : vector<16x32xf32>
    %c0_15 = arith.constant 0 : index
    %c0_16 = arith.constant 0 : index
    %21 = vector.load %arg3[%c0_15, %c0_16] : memref<1x32xf32, #tpu.memory_space<vmem>>, vector<1x32xf32>
    %22 = vector.broadcast %21 : vector<1x32xf32> to vector<16x32xf32>
    %23 = arith.addf %20, %22 : vector<16x32xf32>
    %cst_17 = arith.constant dense<0.000000e+00> : vector<16xf32>
    %24 = vector.multi_reduction <add>, %23, %cst_17 [1] : vector<16x32xf32> to vector<16xf32>
    %25 = vector.shape_cast %24 : vector<16xf32> to vector<16x1xf32>
    %cst_18 = arith.constant 3.200000e+01 : f32
    %26 = vector.broadcast %cst_18 : f32 to vector<16x1xf32>
    %27 = arith.divf %25, %26 : vector<16x1xf32>
    %28 = vector.broadcast %27 : vector<16x1xf32> to vector<16x32xf32>
    %29 = arith.subf %23, %28 : vector<16x32xf32>
    %30 = arith.mulf %29, %29 : vector<16x32xf32>
    %cst_19 = arith.constant dense<0.000000e+00> : vector<16xf32>
    %31 = vector.multi_reduction <add>, %30, %cst_19 [1] : vector<16x32xf32> to vector<16xf32>
    %32 = vector.shape_cast %31 : vector<16xf32> to vector<16x1xf32>
    %cst_20 = arith.constant 3.200000e+01 : f32
    %33 = vector.broadcast %cst_20 : f32 to vector<16x1xf32>
    %34 = arith.divf %32, %33 : vector<16x1xf32>
    %35 = vector.broadcast %27 : vector<16x1xf32> to vector<16x32xf32>
    %36 = arith.subf %23, %35 : vector<16x32xf32>
    %cst_21 = arith.constant 9.99999974E-6 : f32
    %37 = vector.broadcast %cst_21 : f32 to vector<16x1xf32>
    %38 = arith.addf %34, %37 : vector<16x1xf32>
    %39 = math.rsqrt %38 : vector<16x1xf32>
    %40 = vector.broadcast %39 : vector<16x1xf32> to vector<16x32xf32>
    %41 = arith.mulf %36, %40 : vector<16x32xf32>
    %c0_22 = arith.constant 0 : index
    %c0_23 = arith.constant 0 : index
    %42 = vector.load %arg5[%c0_22, %c0_23] : memref<1x32xf32, #tpu.memory_space<vmem>>, vector<1x32xf32>
    %43 = vector.broadcast %42 : vector<1x32xf32> to vector<16x32xf32>
    %44 = arith.mulf %41, %43 : vector<16x32xf32>
    %c0_24 = arith.constant 0 : index
    %c0_25 = arith.constant 0 : index
    %45 = vector.load %arg6[%c0_24, %c0_25] : memref<1x32xf32, #tpu.memory_space<vmem>>, vector<1x32xf32>
    %46 = vector.broadcast %45 : vector<1x32xf32> to vector<16x32xf32>
    %47 = arith.addf %44, %46 : vector<16x32xf32>
    %c0_26 = arith.constant 0 : index
    %c0_27 = arith.constant 0 : index
    %c0_28 = arith.constant 0 : index
    %48 = vector.load %arg7[%c0_26, %c0_27, %c0_28] : memref<1x16x32xf32, #tpu.memory_space<vmem>>, vector<1x16x32xf32>
    %49 = vector.shape_cast %48 : vector<1x16x32xf32> to vector<16x32xf32>
    %50 = vector.shape_cast %47 : vector<16x32xf32> to vector<1x16x32xf32>
    tpu.vector_store %arg7[%c0_26, %c0_27, %c0_28], %50 {strides = array<i32>} : memref<1x16x32xf32, #tpu.memory_space<vmem>>, vector<1x16x32xf32>,
    return
  }
  func.func @transform_0(%arg0: i32) -> (i32, i32, i32) {
    %c0_i32 = arith.constant 0 : i32
    %c0_i32_0 = arith.constant 0 : i32
    %c0_i32_1 = arith.constant 0 : i32
    return %arg0, %c0_i32, %c0_i32_0 : i32, i32, i32
  }
  func.func @transform_1(%arg0: i32) -> (i32, i32, i32) {
    %c0_i32 = arith.constant 0 : i32
    %c0_i32_0 = arith.constant 0 : i32
    %c0_i32_1 = arith.constant 0 : i32
    %c0_i32_2 = arith.constant 0 : i32
    return %c0_i32, %c0_i32_0, %c0_i32_1 : i32, i32, i32
  }
  func.func @transform_2(%arg0: i32) -> (i32, i32) {
    %c0_i32 = arith.constant 0 : i32
    %c0_i32_0 = arith.constant 0 : i32
    %c0_i32_1 = arith.constant 0 : i32
    return %c0_i32, %c0_i32_0 : i32, i32
  }
  func.func @transform_3(%arg0: i32) -> (i32, i32, i32) {
    %c0_i32 = arith.constant 0 : i32
    %c0_i32_0 = arith.constant 0 : i32
    %c0_i32_1 = arith.constant 0 : i32
    return %arg0, %c0_i32, %c0_i32_0 : i32, i32, i32
  }
  func.func @transform_4(%arg0: i32) -> (i32, i32) {
    %c0_i32 = arith.constant 0 : i32
    %c0_i32_0 = arith.constant 0 : i32
    %c0_i32_1 = arith.constant 0 : i32
    return %c0_i32, %c0_i32_0 : i32, i32
  }
  func.func @transform_5(%arg0: i32) -> (i32, i32) {
    %c0_i32 = arith.constant 0 : i32
    %c0_i32_0 = arith.constant 0 : i32
    %c0_i32_1 = arith.constant 0 : i32
    return %c0_i32, %c0_i32_0 : i32, i32
  }
  func.func @transform_6(%arg0: i32) -> (i32, i32, i32) {
    %c0_i32 = arith.constant 0 : i32
    %c0_i32_0 = arith.constant 0 : i32
    %c0_i32_1 = arith.constant 0 : i32
    return %arg0, %c0_i32, %c0_i32_0 : i32, i32, i32
  }
}

module attributes {stable_mosaic.version = 11 : i64} {
  func.func @_linear_kernel(%arg0: i32, %arg1: memref<32x32xf32, #tpu.memory_space<vmem>>, %arg2: memref<32x16xbf16, #tpu.memory_space<vmem>>, %arg3: memref<1x16xf32, #tpu.memory_space<vmem>>, %arg4: memref<32x16xf32, #tpu.memory_space<vmem>>) attributes {dimension_semantics = [#tpu.dimension_semantics<parallel>], iteration_bounds = array<i64: 1>, scalar_prefetch = 0 : i64, scratch_operands = 0 : i64, tpu.core_type = #tpu.core_type<tc>, window_params = [{transform_indices = @transform_0, window_bounds = array<i64: 32, 32>}, {pipeline_mode = #tpu.pipeline_mode<synchronous>, transform_indices = @transform_1, window_bounds = array<i64: 32, 16>}, {pipeline_mode = #tpu.pipeline_mode<synchronous>, transform_indices = @transform_2, window_bounds = array<i64: 1, 16>}, {transform_indices = @transform_3, window_bounds = array<i64: 32, 16>}]} {
    %c0 = arith.constant 0 : index
    %c0_0 = arith.constant 0 : index
    %0 = vector.load %arg1[%c0, %c0_0] : memref<32x32xf32, #tpu.memory_space<vmem>>, vector<32x32xf32>
    %1 = arith.truncf %0 : vector<32x32xf32> to vector<32x32xbf16>
    %c0_1 = arith.constant 0 : index
    %c0_2 = arith.constant 0 : index
    %2 = vector.load %arg2[%c0_1, %c0_2] : memref<32x16xbf16, #tpu.memory_space<vmem>>, vector<32x16xbf16>
    %cst = arith.constant dense<0.000000e+00> : vector<32x16xf32>
    %3 = tpu.matmul %1, %2, %cst {dimension_numbers = #tpu.dot_dimension_numbers<[1], [0], [0], [1], [0, 0, 1, 1], [], []>} : vector<32x32xbf16>, vector<32x16xbf16>, vector<32x16xf32> -> vector<32x16xf32>
    %c0_3 = arith.constant 0 : index
    %c0_4 = arith.constant 0 : index
    %4 = vector.load %arg3[%c0_3, %c0_4] : memref<1x16xf32, #tpu.memory_space<vmem>>, vector<1x16xf32>
    %5 = vector.broadcast %4 : vector<1x16xf32> to vector<32x16xf32>
    %6 = arith.addf %3, %5 : vector<32x16xf32>
    %c0_5 = arith.constant 0 : index
    %c0_6 = arith.constant 0 : index
    %7 = vector.load %arg4[%c0_5, %c0_6] : memref<32x16xf32, #tpu.memory_space<vmem>>, vector<32x16xf32>
    tpu.vector_store %arg4[%c0_5, %c0_6], %6 {strides = array<i32>} : memref<32x16xf32, #tpu.memory_space<vmem>>, vector<32x16xf32>,
    return
  }
  func.func @transform_0(%arg0: i32) -> (i32, i32) {
    %c0_i32 = arith.constant 0 : i32
    %c0_i32_0 = arith.constant 0 : i32
    return %arg0, %c0_i32 : i32, i32
  }
  func.func @transform_1(%arg0: i32) -> (i32, i32) {
    %c0_i32 = arith.constant 0 : i32
    %c0_i32_0 = arith.constant 0 : i32
    %c0_i32_1 = arith.constant 0 : i32
    return %c0_i32, %c0_i32_0 : i32, i32
  }
  func.func @transform_2(%arg0: i32) -> (i32, i32) {
    %c0_i32 = arith.constant 0 : i32
    %c0_i32_0 = arith.constant 0 : i32
    %c0_i32_1 = arith.constant 0 : i32
    return %c0_i32, %c0_i32_0 : i32, i32
  }
  func.func @transform_3(%arg0: i32) -> (i32, i32) {
    %c0_i32 = arith.constant 0 : i32
    %c0_i32_0 = arith.constant 0 : i32
    return %arg0, %c0_i32 : i32, i32
  }
}

</mosaic_0001>

<bundles_post_ra>
// kernel: text_encoder_forward.12
= control target key start
LH: loop header
LB: loop body
LE: loop exit
PB: predicated region body
PF: predicated region fallthrough
CT: control target
= control target key end

     0   :  { %vm47_vm0 = vcmask 1043456   ;;  %vm40_vm1 = vcmask 195584   ;;  %vm94_vm2 = vcmask 261120   ;;  %s187_s2 = inlined_call_operand.vmem [shape: bf16[24,32], index: 2, kind: input, shape index: {}]   ;;  %s188_s3 = inlined_call_operand.vmem [shape: f32[1,32], index: 3, kind: input, shape index: {}]   ;;  %s189_s0 = inlined_call_operand.vmem [shape: f32[32,24], index: 0, kind: input, shape index: {}]   ;;  %s190_s1 = inlined_call_operand.vmem [shape: f32[32,32], index: 1, kind: input, shape index: {}]   ;;  %s191_s4 = inlined_call_operand.vmem [shape: f32[32,32], index: 4, kind: output, shape index: {}]  }
   0x1   :  { %v26_v0 = vld [vmem:[%s187_s2 + $0x8] sm:$0xf]  ;;  %v109_v4 = vld [vmem:[%s187_s2] sm:$0xff]  ;;  %v20_v7 = vld [vmem:[%s189_s0 + $0x10] sm:$0xff] }
   0x2   :  { %v36_v1 = vunpack.c.l.b16 %v26_v0  ;;  %v18_v5 = vld [vmem:[%s189_s0] sm:$0xff]  ;;  %v19_v6 = vld [vmem:[%s189_s0 + $0x8] sm:$0xff]  ;;  %v21_v8 = vld [vmem:[%s189_s0 + $0x18] sm:$0xff] }
   0x3   :  { %v22_v9 = vpack.c.bf16 %v19_v6, %v18_v5  ;;  %v23_v10 = vpack.c.bf16 %v21_v8, %v20_v7  ;;  %v112_v11 = vld [vmem:[%s188_s3] ss:$0 sm:$0xff]  ;;  %v72_v15 = vld [vmem:[%s190_s1 + $0x10] sm:$0xff]  ;;  %v71_v25 = vld [vmem:[%s190_s1 + $0x8] sm:$0xff] }
   0x4   :  { %v38_v2 = vpack.c.b16 %v36_v1, %v36_v1  ;;  %v70_v13 = vld [vmem:[%s190_s1] sm:$0xff]  ;;  %v73_v27 = vld [vmem:[%s190_s1 + $0x18] sm:$0xff] }
   0x6   :  { %v49_v3 = vsel %vm47_vm0, %v38_v2, 0 }
   0x7   :  { %57 = vmatpush.bf16.msra.mxu0 %v49_v3  ;;  %110 = vmatpush.bf16.msra.mxu1 %v49_v3 }
   0xb   :  { %58 = vmatpush.bf16.msra.mxu0 %v109_v4  ;;  %111 = vmatpush.bf16.msra.mxu1 %v109_v4 }
   0xe   :  { %107 = vmatmul.msk.bf16.vlgmr.msra.gmra.mxu0 %vm40_vm1, %v22_v9  ;;  %108 = vmatmul.msk.bf16.vlgmr.msra.gmra.mxu1 %vm40_vm1, %v23_v10 }
  0x8b   :  { %v60_v12 = vpop.f32.mrf.mxu0  ;;  %v65_v14 = vpop.f32.mrf.mxu1 }
  0x8c   :  { %v61_v16 = vadd.f32 %v112_v11, %v60_v12  ;;  %v66_v17 = vadd.f32 %v112_v11, %v65_v14 }
  0x8e   :  { %v74_v18 = vadd.f32 %v70_v13, %v61_v16  ;;  %v76_v19 = vadd.f32 %v72_v15, %v66_v17 }
  0x90   :  { %v78_v20 = vmul.f32 5.656854, %v74_v18  ;;  %v80_v21 = vmul.f32 5.656854, %v76_v19 }
  0x92   :  { %vm82_vm3 = vcmp.ge.f32.partialorder %v78_v20, 0.0  ;;  %v86_v22 = vmul.f32 0.1, %v78_v20  ;;  %vm84_vm4 = vcmp.ge.f32.partialorder %v80_v21, 0.0  ;;  %v88_v23 = vmul.f32 0.1, %v80_v21 }
  0x93   :  { %v62_v24 = vpop.f32.mrf.mxu0  ;;  %v67_v26 = vpop.f32.mrf.mxu1 }
  0x94   :  { %v90_v28 = vsel %vm82_vm3, %v78_v20, %v86_v22  ;;  %v92_v29 = vsel %vm84_vm4, %v80_v21, %v88_v23  ;;  %v63_v30 = vadd.f32 %v112_v11, %v62_v24  ;;  %v68_v31 = vadd.f32 %v112_v11, %v67_v26 }
  0x95   :  { %95 = vst.msk [vmem:[%s191_s4] sm:$0xff] %vm94_vm2, %v90_v28 }
  0x96   :  { %97 = vst.msk [vmem:[%s191_s4 + $0x10] sm:$0xff] %vm94_vm2, %v92_v29  ;;  %v75_v32 = vadd.f32 %v71_v25, %v63_v30  ;;  %v77_v33 = vadd.f32 %v73_v27, %v68_v31 }
  0x98   :  { %v79_v34 = vmul.f32 5.656854, %v75_v32  ;;  %v81_v35 = vmul.f32 5.656854, %v77_v33 }
  0x9a   :  { %vm83_vm5 = vcmp.ge.f32.partialorder %v79_v34, 0.0  ;;  %v87_v36 = vmul.f32 0.1, %v79_v34  ;;  %vm85_vm6 = vcmp.ge.f32.partialorder %v81_v35, 0.0  ;;  %v89_v37 = vmul.f32 0.1, %v81_v35 }
  0x9c   :  { %v91_v38 = vsel %vm83_vm5, %v79_v34, %v87_v36  ;;  %v93_v39 = vsel %vm85_vm6, %v81_v35, %v89_v37 }
  0x9d   :  { %96 = vst.msk [vmem:[%s191_s4 + $0x8] sm:$0xff] %vm94_vm2, %v91_v38 }
  0x9e   :  { %98 = vst.msk [vmem:[%s191_s4 + $0x18] sm:$0xff] %vm94_vm2, %v93_v39 }

// kernel: text_encoder_forward.15
= control target key start
LH: loop header
LB: loop body
LE: loop exit
PB: predicated region body
PF: predicated region fallthrough
CT: control target
= control target key end

     0   :  { %vm54_vm0 = vcmask 261120   ;;  %v253_v25 = vmov 32.0   ;;  %s363_s1 = inlined_call_operand.vmem [shape: bf16[32,32], index: 1, kind: input, shape index: {}]   ;;  %s364_s0 = inlined_call_operand.vmem [shape: bf16[32,32], index: 0, kind: input, shape index: {}]   ;;  %s365_s2 = inlined_call_operand.vmem [shape: f32[1,32], index: 2, kind: input, shape index: {}]   ;;  %s366_s3 = inlined_call_operand.vmem [shape: f32[32,32], index: 3, kind: input, shape index: {}]   ;;  %s367_s4 = inlined_call_operand.vmem [shape: f32[1,32], index: 4, kind: input, shape index: {}]   ;;  %s368_s5 = inlined_call_operand.vmem [shape: f32[1,32], index: 5, kind: input, shape index: {}]   ;;  %s369_s6 = inlined_call_operand.vmem [shape: f32[32,32], index: 6, kind: output, shape index: {}]  }
   0x1   :  { %v236_v0 = vld [vmem:[%s363_s1 + $0x8] sm:$0xff]  ;;  %v235_v1 = vld [vmem:[%s363_s1] sm:$0xff]  ;;  %v82_v5 = vld [vmem:[%s366_s3 + $0x10] sm:$0xff]  ;;  %243 = vrcp.f32 %v253_v25 }
   0x2   :  { %67 = vmatpush.bf16.msra.mxu0 %v236_v0  ;;  %237 = vmatpush.bf16.msra.mxu1 %v236_v0  ;;  %v233_v2 = vld [vmem:[%s364_s0] sm:$0xff]  ;;  %v234_v3 = vld [vmem:[%s364_s0 + $0x8] sm:$0xff]  ;;  %v83_v16 = vld [vmem:[%s366_s3 + $0x18] sm:$0xff] }
   0x3   :  { %v80_v4 = vld [vmem:[%s366_s3] sm:$0xff]  ;;  %v81_v15 = vld [vmem:[%s366_s3 + $0x8] sm:$0xff] }
   0x4   :  { %v240_v6 = vld [vmem:[%s365_s2] ss:$0 sm:$0xff] }
   0x6   :  { %68 = vmatpush.bf16.msra.mxu0 %v235_v1  ;;  %238 = vmatpush.bf16.msra.mxu1 %v235_v1 }
   0x7   :  { %v244_v26 = vpop.eup %243 }
   0x8   :  { %v109_v27 = vmul.f32 32.0, %v244_v26  ;;  %vm113_vm1 = vweird.f32 %v244_v26 }
   0x9   :  { %231 = vmatmul.msk.bf16.vlgmr.msra.gmra.mxu0 %vm54_vm0, %v233_v2  ;;  %232 = vmatmul.msk.bf16.vlgmr.msra.gmra.mxu1 %vm54_vm0, %v234_v3 }
   0xa   :  { %v110_v28 = vsub.f32 1.0, %v109_v27 }
   0xc   :  { %v111_v29 = vmul.f32 %v244_v26, %v110_v28 }
   0xe   :  { %v112_v30 = vadd.f32 %v244_v26, %v111_v29 }
  0x10   :  { %v114_v31 = vsel %vm113_vm1, %v244_v26, %v112_v30 }
  0x86   :  { %v70_v7 = vpop.f32.mrf.mxu0  ;;  %v75_v8 = vpop.f32.mrf.mxu1 }
  0x87   :  { %v84_v9 = vadd.f32 %v80_v4, %v70_v7  ;;  %v86_v10 = vadd.f32 %v82_v5, %v75_v8 }
  0x89   :  { %v94_v11 = vadd.f32 %v240_v6, %v86_v10  ;;  %v92_v12 = vadd.f32 %v240_v6, %v84_v9 }
  0x8b   :  { %v102_v13 = vsel %vm54_vm0, %v94_v11, 0.0  ;;  %v96_v14 = vsel %vm54_vm0, %v92_v12, 0.0 }
  0x8c   :  { %103 = vadd.xlane.f32.xlu1 %v102_v13  ;;  %97 = vadd.xlane.f32.xlu0 %v96_v14  ;;  %v241_v14 = vld [vmem:[%s367_s4] ss:$0 sm:$0xff] }
  0x8e   :  { %v72_v17 = vpop.f32.mrf.mxu0  ;;  %v77_v18 = vpop.f32.mrf.mxu1 }
  0x8f   :  { %v85_v19 = vadd.f32 %v81_v15, %v72_v17  ;;  %v87_v20 = vadd.f32 %v83_v16, %v77_v18 }
  0x91   :  { %v95_v21 = vadd.f32 %v240_v6, %v87_v20  ;;  %v93_v22 = vadd.f32 %v240_v6, %v85_v19  ;;  %v242_v19 = vld [vmem:[%s368_s5] ss:$0 sm:$0xff] }
  0x93   :  { %v105_v23 = vsel %vm54_vm0, %v95_v21, 0.0  ;;  %v99_v24 = vsel %vm54_vm0, %v93_v22, 0.0 }
  0x94   :  { %106 = vadd.xlane.f32.xlu1 %v105_v23  ;;  %100 = vadd.xlane.f32.xlu0 %v99_v24 }
  0xff   :  { %v104_v32 = vpop.xlane.xlu1 %103  ;;  %v98_v33 = vpop.xlane.xlu0 %97 }
 0x100   :  { %v117_v34 = vmul.f32 %v114_v31, %v104_v32  ;;  %v115_v35 = vmul.f32 %v114_v31, %v98_v33 }
 0x102   :  { %v322_v36 = vsub.f32 %v94_v11, %v117_v34  ;;  %v119_v37 = vsub.f32 %v92_v12, %v115_v35 }
 0x104   :  { %v123_v38 = vmul.f32 %v119_v37, %v119_v37  ;;  %v125_v39 = vmul.f32 %v322_v36, %v322_v36 }
 0x106   :  { %v127_v40 = vsel %vm54_vm0, %v123_v38, 0.0  ;;  %v133_v41 = vsel %vm54_vm0, %v125_v39, 0.0 }
 0x107   :  { %v107_v42 = vpop.xlane.xlu1 %106  ;;  %128 = vadd.xlane.f32.xlu2 %v127_v40  ;;  %134 = vadd.xlane.f32.xlu0 %v133_v41  ;;  %v101_v43 = vpop.xlane.xlu0 %100 }
 0x108   :  { %v118_v44 = vmul.f32 %v114_v31, %v107_v42  ;;  %v116_v45 = vmul.f32 %v114_v31, %v101_v43 }
 0x10a   :  { %v328_v46 = vsub.f32 %v95_v21, %v118_v44  ;;  %v330_v47 = vsub.f32 %v93_v22, %v116_v45 }
 0x10c   :  { %v126_v48 = vmul.f32 %v328_v46, %v328_v46  ;;  %v124_v49 = vmul.f32 %v330_v47, %v330_v47 }
 0x10e   :  { %v136_v50 = vsel %vm54_vm0, %v126_v48, 0.0  ;;  %v130_v51 = vsel %vm54_vm0, %v124_v49, 0.0 }
 0x10f   :  { %137 = vadd.xlane.f32.xlu1 %v136_v50  ;;  %131 = vadd.xlane.f32.xlu2 %v130_v51 }
 0x17a   :  { %v129_v52 = vpop.xlane.xlu2 %128  ;;  %v135_v53 = vpop.xlane.xlu0 %134 }
 0x17b   :  { %v139_v54 = vmul.f32 %v129_v52, %v114_v31  ;;  %v141_v55 = vmul.f32 %v135_v53, %v114_v31 }
 0x17d   :  { %v143_v56 = vadd.f32 1e-05, %v139_v54  ;;  %v145_v57 = vadd.f32 1e-05, %v141_v55 }
 0x17f   :  { %245 = vrsqrt.f32 %v143_v56  ;;  %vm153_vm4 = vweird.f32 %v143_v56  ;;  %vm173_vm6 = vweird.f32 %v145_v57 }
 0x180   :  { %247 = vrsqrt.f32 %v145_v57 }
 0x182   :  { %v138_v58 = vpop.xlane.xlu1 %137  ;;  %v132_v59 = vpop.xlane.xlu2 %131 }
 0x183   :  { %v142_v60 = vmul.f32 %v138_v58, %v114_v31  ;;  %v140_v61 = vmul.f32 %v132_v59, %v114_v31 }
 0x185   :  { %v246_v62 = vpop.eup %245  ;;  %v146_v63 = vadd.f32 1e-05, %v142_v60  ;;  %v144_v0 = vadd.f32 1e-05, %v140_v61 }
 0x186   :  { %v248_v1 = vpop.eup %247  ;;  %v148_v2 = vmul.f32 %v246_v62, %v143_v56  ;;  %vm154_vm2 = vweird.f32 %v246_v62 }
 0x187   :  { %v168_v3 = vmul.f32 %v248_v1, %v145_v57  ;;  %249 = vrsqrt.f32 %v146_v63  ;;  %vm174_vm3 = vweird.f32 %v248_v1  ;;  %vm155_vm5 = vmor %vm153_vm4, %vm154_vm2  ;;  %vm183_vm10 = vweird.f32 %v146_v63 }
 0x188   :  { %v149_v4 = vmul.f32 %v246_v62, %v148_v2  ;;  %251 = vrsqrt.f32 %v144_v0  ;;  %vm175_vm7 = vmor %vm173_vm6, %vm174_vm3  ;;  %vm163_vm12 = vweird.f32 %v144_v0 }
 0x189   :  { %v169_v5 = vmul.f32 %v248_v1, %v168_v3 }
 0x18a   :  { %v150_v6 = vmul.f32 0.5, %v149_v4 }
 0x18b   :  { %v170_v7 = vmul.f32 0.5, %v169_v5 }
 0x18c   :  { %v151_v8 = vsub.f32 1.5, %v150_v6 }
 0x18d   :  { %v250_v9 = vpop.eup %249  ;;  %v171_v10 = vsub.f32 1.5, %v170_v7 }
 0x18e   :  { %v252_v11 = vpop.eup %251  ;;  %v152_v12 = vmul.f32 %v246_v62, %v151_v8  ;;  %v178_v13 = vmul.f32 %v250_v9, %v146_v63  ;;  %vm184_vm8 = vweird.f32 %v250_v9 }
 0x18f   :  { %v172_v15 = vmul.f32 %v248_v1, %v171_v10  ;;  %v158_v16 = vmul.f32 %v252_v11, %v144_v0  ;;  %vm164_vm9 = vweird.f32 %v252_v11  ;;  %vm185_vm11 = vmor %vm183_vm10, %vm184_vm8 }
 0x190   :  { %v156_v17 = vsel %vm155_vm5, %v246_v62, %v152_v12  ;;  %v179_v18 = vmul.f32 %v250_v9, %v178_v13  ;;  %vm165_vm13 = vmor %vm163_vm12, %vm164_vm9 }
 0x191   :  { %v187_v20 = vmul.f32 %v156_v17, %v119_v37  ;;  %v176_v21 = vsel %vm175_vm7, %v248_v1, %v172_v15  ;;  %v159_v22 = vmul.f32 %v252_v11, %v158_v16 }
 0x192   :  { %v189_v23 = vmul.f32 %v176_v21, %v322_v36  ;;  %v180_v24 = vmul.f32 0.5, %v179_v18 }
 0x193   :  { %v195_v25 = vmul.f32 %v241_v14, %v187_v20  ;;  %v160_v26 = vmul.f32 0.5, %v159_v22 }
 0x194   :  { %v197_v27 = vmul.f32 %v241_v14, %v189_v23  ;;  %v181_v28 = vsub.f32 1.5, %v180_v24 }
 0x195   :  { %v203_v29 = vadd.f32 %v242_v19, %v195_v25  ;;  %v161_v30 = vsub.f32 1.5, %v160_v26 }
 0x196   :  { %v205_v31 = vadd.f32 %v242_v19, %v197_v27  ;;  %v182_v32 = vmul.f32 %v250_v9, %v181_v28 }
 0x197   :  { %207 = vst.msk [vmem:[%s369_s6] sm:$0xff] %vm54_vm0, %v203_v29  ;;  %v162_v33 = vmul.f32 %v252_v11, %v161_v30 }
 0x198   :  { %209 = vst.msk [vmem:[%s369_s6 + $0x10] sm:$0xff] %vm54_vm0, %v205_v31  ;;  %v186_v34 = vsel %vm185_vm11, %v250_v9, %v182_v32 }
 0x199   :  { %v190_v35 = vmul.f32 %v186_v34, %v328_v46  ;;  %v166_v36 = vsel %vm165_vm13, %v252_v11, %v162_v33 }
 0x19a   :  { %v188_v37 = vmul.f32 %v166_v36, %v330_v47 }
 0x19b   :  { %v198_v38 = vmul.f32 %v241_v14, %v190_v35 }
 0x19c   :  { %v196_v39 = vmul.f32 %v241_v14, %v188_v37 }
 0x19d   :  { %v206_v40 = vadd.f32 %v242_v19, %v198_v38 }
 0x19e   :  { %v204_v41 = vadd.f32 %v242_v19, %v196_v39 }
 0x19f   :  { %210 = vst.msk [vmem:[%s369_s6 + $0x18] sm:$0xff] %vm54_vm0, %v206_v40 }
 0x1a0   :  { %208 = vst.msk [vmem:[%s369_s6 + $0x8] sm:$0xff] %vm54_vm0, %v204_v41 }

// kernel: text_encoder_forward.13
= control target key start
LH: loop header
LB: loop body
LE: loop exit
PB: predicated region body
PF: predicated region fallthrough
CT: control target
= control target key end

     0   :  { %vm41_vm0 = vcmask 261120   ;;  %vm71_vm1 = vcmask 781312   ;;  %s148_s1 = inlined_call_operand.vmem [shape: bf16[32,96], index: 1, kind: input, shape index: {}]   ;;  %s149_s0 = inlined_call_operand.vmem [shape: f32[32,32], index: 0, kind: input, shape index: {}]   ;;  %s150_s2 = inlined_call_operand.vmem [shape: f32[1,96], index: 2, kind: input, shape index: {}]   ;;  %s151_s3 = inlined_call_operand.vmem [shape: bf16[32,96], index: 3, kind: output, shape index: {}]  }
   0x1   :  { %v91_v0 = vld [vmem:[%s148_s1 + $0x8] sm:$0xff]  ;;  %v90_v1 = vld [vmem:[%s148_s1] sm:$0xff]  ;;  %v17_v4 = vld [vmem:[%s149_s0 + $0x10] sm:$0xff] }
   0x2   :  { %v15_v2 = vld [vmem:[%s149_s0] sm:$0xff]  ;;  %v16_v3 = vld [vmem:[%s149_s0 + $0x8] sm:$0xff]  ;;  %54 = vmatpush.bf16.msra.mxu0 %v91_v0  ;;  %92 = vmatpush.bf16.msra.mxu1 %v91_v0  ;;  %v18_v5 = vld [vmem:[%s149_s0 + $0x18] sm:$0xff] }
   0x3   :  { %v19_v6 = vpack.c.bf16 %v16_v3, %v15_v2  ;;  %v20_v7 = vpack.c.bf16 %v18_v5, %v17_v4  ;;  %v94_v8 = vld [vmem:[%s150_s2] ss:$0 sm:$0xff] }
   0x6   :  { %55 = vmatpush.bf16.msra.mxu0 %v90_v1  ;;  %93 = vmatpush.bf16.msra.mxu1 %v90_v1 }
   0x9   :  { %88 = vmatmul.msk.bf16.vlgmr.msra.gmra.mxu0 %vm41_vm0, %v19_v6  ;;  %89 = vmatmul.msk.bf16.vlgmr.msra.gmra.mxu1 %vm41_vm0, %v20_v7 }
  0x86   :  { %v57_v9 = vpop.f32.mrf.mxu0  ;;  %v62_v10 = vpop.f32.mrf.mxu1 }
  0x87   :  { %v58_v11 = vadd.f32 %v94_v8, %v57_v9  ;;  %v63_v12 = vadd.f32 %v94_v8, %v62_v10 }
  0x89   :  { %v67_v13 = vpack.c.bf16 %v58_v11, %v58_v11  ;;  %v69_v14 = vpack.c.bf16 %v63_v12, %v63_v12 }
  0x8b   :  { %72 = vst.msk [vmem:[%s151_s3] sm:$0xf] %vm71_vm1, %v67_v13 }
  0x8c   :  { %74 = vst.msk [vmem:[%s151_s3 + $0x8] sm:$0xf] %vm71_vm1, %v69_v14 }
  0x8e   :  { %v59_v15 = vpop.f32.mrf.mxu0  ;;  %v64_v16 = vpop.f32.mrf.mxu1 }
  0x8f   :  { %v60_v17 = vadd.f32 %v94_v8, %v59_v15  ;;  %v65_v18 = vadd.f32 %v94_v8, %v64_v16 }
  0x91   :  { %v68_v19 = vpack.c.bf16 %v60_v17, %v60_v17  ;;  %v70_v20 = vpack.c.bf16 %v65_v18, %v65_v18 }
  0x93   :  { %73 = vst.msk [vmem:[%s151_s3 + $0x4] sm:$0xf] %vm71_vm1, %v68_v19 }
  0x94   :  { %75 = vst.msk [vmem:[%s151_s3 + $0xc] sm:$0xf] %vm71_vm1, %v70_v20 }

// kernel: text_encoder_forward.16
= control target key start
LH: loop header
LB: loop body
LE: loop exit
PB: predicated region body
PF: predicated region fallthrough
CT: control target
= control target key end

     0   :  { %s506_s18 = smov [#allocation3]   ;;  %s590_s0 = inlined_call_operand.vmem [shape: s32[2], index: 0, kind: input, shape index: {}]   ;;  %s591_s1 = inlined_call_operand.vmem [shape: f32[2,18,32], index: 1, kind: input, shape index: {}]   ;;  %s592_s2 = inlined_call_operand.vmem [shape: bf16[3,32,64], index: 2, kind: input, shape index: {}]   ;;  %s593_s3 = inlined_call_operand.vmem [shape: f32[1,64], index: 3, kind: input, shape index: {}]   ;;  %s594_s4 = inlined_call_operand.vmem [shape: bf16[2,16,64], index: 4, kind: output, shape index: {}]  }
   0x1   :  { %s10_s17 = sshll.u32 %s590_s0, 4  ;;  %s11_s17 = int_to_ptr.vmem [resolvable:$true] %s10_s17 }
   0x2   :  { %13 = dma.vmem_to_smem %s11_s17, 16, %s506_s18, [#allocation2] }
   0x3   :  { %500 = dma.done.wait [#allocation2], 16 }
   0x4   :  { %501 = vsyncadd [#allocation2], 4294967280 }
   0x5   :  { %16 = sfence }
   0x6   :  { %s535_s19 = smov 0  }
   0x7 LB: > { %s418_s20 = sadd.s32 4294967295, %s504_s19   ;;  %p422_p0 = scmp.ge.s32.totalorder %s504_s19, 1  ;;  %s504_s19 = sphi %s535_s19, %s22_s19  }
   0x8   : > { %p146_p1 = scmp.lt.s32.totalorder %s504_s19, 3 }
   0xa   : > { %p147_p2 = pnand %p422_p0, %p146_p1 }
   0xb   : > { %p170_p3 = scmp.lt.s32.totalorder (!%p147_p2), %s418_s20, 1  ;;  %s181_s24 = sld [smem:[#allocation3 + %s418_s20]] (!%p147_p2) }
   0xc   : > { %150 = sbr.rel (%p147_p2) target bundleno = 186 (0xba), region = 32 }
  0x11   : > { %v468_v0 = vld [vmem:[%s592_s2 + $0x8] sm:$0xff]  ;;  %v182_v2 = vlaneseq  ;;  %v470_v3 = vld [vmem:[%s592_s2 + $0x18] sm:$0xff]  ;;  %v467_v4 = vld [vmem:[%s592_s2] sm:$0xff]  ;;  %s596_s20 = smov (!%p170_p3, %s418_s20), 1  ;;  %v192_v12 = vstv %s181_s24  ;;  %vm256_vm5 = vcmask 261120   ;;  %vm307_vm6 = vcmask 1046528  }
  0x12   : > { %v472_v1 = vld [vmem:[%s592_s2 + $0x28] sm:$0xff]  ;;  %294 = vmatpush.bf16.msra.mxu1 %v468_v0  ;;  %v471_v6 = vld [vmem:[%s592_s2 + $0x20] sm:$0xff]  ;;  %266 = vmatpush.bf16.msra.mxu0 %v470_v3  ;;  %v469_v7 = vld [vmem:[%s592_s2 + $0x10] sm:$0xff]  ;;  %s473_s7 = smul.u32 24, %s596_s20  ;;  %vm231_vm7 = vsmask.f32 7424 }
  0x13   : > { %332 = vmatpush.bf16.msra.mxu2 %v472_v1  ;;  %v557_v5 = vshrl.u32 %v182_v2, 7  ;;  %v483_v41 = vld [vmem:[%s593_s3] ss:$0 sm:$0xff]  ;;  %s466_s13 = sshll.u32 %s596_s20, 3  ;;  %vm360_vm9 = vcmask 519168  }
  0x14   : > { %s174_s10 = scalar_lea.vmem %s591_s1, %s473_s7  ;;  %s179_s16 = scalar_lea.vmem %s594_s4, %s466_s13 }
  0x15   : > { %v567_v8 = vadd.s32 8, %v557_v5  ;;  %v426_v9 = vadd.s32 4294967295, %v557_v5  ;;  %v185_v10 = vadd.s32 16, %v557_v5  ;;  %v199_v14 = vld [vmem:[%s174_s10] sm:$0xff]  ;;  %v200_v15 = vld [vmem:[%s174_s10 + $0x8] sm:$0xff]  ;;  %vm350_vm8 = vcmp.lt.s32.totalorder %v557_v5, %v192_v12 }
  0x16   : > { %295 = vmatpush.bf16.msra.mxu1 %v467_v4  ;;  %v201_v16 = vld [vmem:[%s174_s10 + $0x10] sm:$0x3]  ;;  %267 = vmatpush.bf16.msra.mxu0 %v469_v7 }
  0x17   : > { %v427_v11 = vadd.s32 4294967295, %v567_v8  ;;  %vm189_vm0 = vcmp.ge.s32.totalorder %v426_v9, 0  ;;  %333 = vmatpush.bf16.msra.mxu2 %v471_v6  ;;  %v428_v13 = vadd.s32 4294967295, %v185_v10  ;;  %vm193_vm1 = vcmp.lt.s32.totalorder %v426_v9, %v192_v12 }
  0x18   : > { %vm196_vm3 = vmand %vm189_vm0, %vm193_vm1  ;;  %vm351_vm10 = vcmp.lt.s32.totalorder %v567_v8, %v192_v12 }
  0x19   : > { %vm194_vm2 = vcmp.lt.s32.totalorder %v427_v11, %v192_v12  ;;  %vm195_vm4 = vcmp.lt.s32.totalorder %v428_v13, %v192_v12  ;;  %v208_v17 = vsel %vm196_vm3, %v199_v14, 0.0 }
  0x1a   : > { %v209_v18 = vsel %vm194_vm2, %v200_v15, 0.0  ;;  %v210_v19 = vsel %vm195_vm4, %v201_v16, 0.0  ;;  %v211_v20 = vpack.c.bf16 %v208_v17, %v208_v17 }
  0x1b   : > { %v212_v21 = vpack.c.bf16 %v209_v18, %v209_v18  ;;  %v213_v22 = vpack.c.bf16 %v210_v19, %v210_v19 }
  0x1c   : > { %v226_v23 = vunpack.c.l.b16 %v211_v20 }
  0x1d   : > { %v227_v24 = vunpack.c.l.b16 %v212_v21  ;;  %v228_v25 = vunpack.c.l.b16 %v213_v22 }
  0x1f   : > { %v229_v26 = vpack.c.b16 %v227_v24, %v226_v23  ;;  %v230_v27 = vpack.c.b16 %v228_v25, %v228_v25 }
  0x21   : > { %450 = vmatmul.msk.bf16.vlgmr.msra.gmra.mxu1 %vm256_vm5, %v229_v26  ;;  %v308_v28 = vrot.slane %v229_v26, 1  ;;  %v309_v29 = vrot.slane %v230_v27, 1  ;;  %v233_v30 = vshrl.u32 %v229_v26, 16  ;;  %v235_v31 = vshll.u32 %v229_v26, 16 }
  0x22   : > { %v240_v32 = vshll.u32 %v230_v27, 16 }
  0x23   : > { %v310_v33 = vsel %vm307_vm6, %v308_v28, %v309_v29  ;;  %v237_v34 = vrot.slane %v235_v31, 1 }
  0x24   : > { %463 = vmatmul.msk.bf16.vlgmr.msra.gmra.mxu2 %vm256_vm5, %v310_v33  ;;  %v242_v35 = vrot.slane %v240_v32, 1 }
  0x25   : > { %v238_v36 = vor.u32 %v237_v34, %v233_v30 }
  0x27   : > { %v243_v37 = vsel %vm231_vm7, %v238_v36, %v242_v35 }
  0x28   : > { %441 = vmatmul.msk.bf16.vlgmr.msra.gmra.mxu0 %vm256_vm5, %v243_v37 }
  0x9e   : > { %v297_v38 = vpop.f32.mrf.mxu1 }
  0xa5   : > { %v269_v39 = vpop.f32.mrf.mxu0 }
  0xa6   : > { %v298_v40 = vadd.f32 %v297_v38, %v269_v39  ;;  %v299_v46 = vpop.f32.mrf.mxu1 }
  0xa7   : > { %v335_v42 = vpop.f32.mrf.mxu2 }
  0xa8   : > { %v340_v43 = vadd.f32 %v335_v42, %v298_v40 }
  0xaa   : > { %v346_v44 = vadd.f32 %v483_v41, %v340_v43 }
  0xac   : > { %v348_v45 = vmax.f32 %v346_v44, 0.0 }
  0xad   : > { %v271_v47 = vpop.f32.mrf.mxu0 }
  0xae   : > { %v356_v48 = vsel %vm350_vm8, %v348_v45, 0.0  ;;  %v300_v49 = vadd.f32 %v299_v46, %v271_v47 }
  0xaf   : > { %v358_v50 = vpack.c.bf16 %v356_v48, %v356_v48  ;;  %v337_v51 = vpop.f32.mrf.mxu2 }
  0xb0   : > { %v341_v52 = vadd.f32 %v337_v51, %v300_v49 }
  0xb1   : > { %361 = vst.msk [vmem:[%s179_s16] sm:$0xf] %vm360_vm9, %v358_v50 }
  0xb2   : > { %v347_v53 = vadd.f32 %v483_v41, %v341_v52 }
  0xb4   : > { %v349_v54 = vmax.f32 %v347_v53, 0.0 }
  0xb6   : > { %v357_v55 = vsel %vm351_vm10, %v349_v54, 0.0 }
  0xb7   : > { %v359_v56 = vpack.c.bf16 %v357_v55, %v357_v55 }
  0xb9   : > { %362 = vst.msk [vmem:[%s179_s16 + $0x4] sm:$0xf] %vm360_vm9, %v359_v56 }
  0xba PF: > { %s22_s19 = sadd.s32 1, %s504_s19  }
  0xbb   : > { %p19_p4 = scmp.ge.s32.totalorder %s22_s19, 4  }
  0xbd   :  { %21 = sbr.rel (!%p19_p4) target bundleno = 7 (0x7), region = 64 }

// kernel: text_encoder_forward.23
= control target key start
LH: loop header
LB: loop body
LE: loop exit
PB: predicated region body
PF: predicated region fallthrough
CT: control target
= control target key end

     0   :  { %vm41_vm0 = vcmask 261120   ;;  %vm67_vm1 = vcmask 130048   ;;  %s144_s1 = inlined_call_operand.vmem [shape: bf16[32,16], index: 1, kind: input, shape index: {}]   ;;  %s145_s0 = inlined_call_operand.vmem [shape: f32[32,32], index: 0, kind: input, shape index: {}]   ;;  %s146_s2 = inlined_call_operand.vmem [shape: f32[1,16], index: 2, kind: input, shape index: {}]   ;;  %s147_s3 = inlined_call_operand.vmem [shape: f32[32,16], index: 3, kind: output, shape index: {}]  }
   0x1   :  { %v87_v0 = vld [vmem:[%s144_s1 + $0x8] sm:$0xff]  ;;  %v86_v1 = vld [vmem:[%s144_s1] sm:$0xff]  ;;  %v17_v4 = vld [vmem:[%s145_s0 + $0x10] sm:$0xff] }
   0x2   :  { %v15_v2 = vld [vmem:[%s145_s0] sm:$0xff]  ;;  %v16_v3 = vld [vmem:[%s145_s0 + $0x8] sm:$0xff]  ;;  %54 = vmatpush.bf16.msra.mxu0 %v87_v0  ;;  %88 = vmatpush.bf16.msra.mxu1 %v87_v0  ;;  %v18_v5 = vld [vmem:[%s145_s0 + $0x18] sm:$0xff] }
   0x3   :  { %v19_v6 = vpack.c.bf16 %v16_v3, %v15_v2  ;;  %v20_v7 = vpack.c.bf16 %v18_v5, %v17_v4  ;;  %v90_v8 = vld [vmem:[%s146_s2] ss:$0 sm:$0xff] }
   0x6   :  { %55 = vmatpush.bf16.msra.mxu0 %v86_v1  ;;  %89 = vmatpush.bf16.msra.mxu1 %v86_v1 }
   0x9   :  { %84 = vmatmul.msk.bf16.vlgmr.msra.gmra.mxu0 %vm41_vm0, %v19_v6  ;;  %85 = vmatmul.msk.bf16.vlgmr.msra.gmra.mxu1 %vm41_vm0, %v20_v7 }
  0x86   :  { %v57_v9 = vpop.f32.mrf.mxu0  ;;  %v62_v10 = vpop.f32.mrf.mxu1 }
  0x87   :  { %v58_v11 = vadd.f32 %v90_v8, %v57_v9  ;;  %v63_v12 = vadd.f32 %v90_v8, %v62_v10 }
  0x89   :  { %68 = vst.msk [vmem:[%s147_s3] sm:$0xff] %vm67_vm1, %v58_v11 }
  0x8a   :  { %70 = vst.msk [vmem:[%s147_s3 + $0x10] sm:$0xff] %vm67_vm1, %v63_v12 }
  0x8e   :  { %v59_v13 = vpop.f32.mrf.mxu0  ;;  %v64_v14 = vpop.f32.mrf.mxu1 }
  0x8f   :  { %v60_v15 = vadd.f32 %v90_v8, %v59_v13  ;;  %v65_v16 = vadd.f32 %v90_v8, %v64_v14 }
  0x91   :  { %69 = vst.msk [vmem:[%s147_s3 + $0x8] sm:$0xff] %vm67_vm1, %v60_v15 }
  0x92   :  { %71 = vst.msk [vmem:[%s147_s3 + $0x18] sm:$0xff] %vm67_vm1, %v65_v16 }

// kernel: text_encoder_forward.17
= control target key start
LH: loop header
LB: loop body
LE: loop exit
PB: predicated region body
PF: predicated region fallthrough
CT: control target
= control target key end

     0   :  { %s756_s21 = smov 0   ;;  %s835_s0 = inlined_call_operand.vmem [shape: bf16[2,18,64], index: 0, kind: input, shape index: {}]   ;;  %s836_s1 = inlined_call_operand.vmem [shape: bf16[3,64,32], index: 1, kind: input, shape index: {}]   ;;  %s837_s2 = inlined_call_operand.vmem [shape: f32[1,32], index: 2, kind: input, shape index: {}]   ;;  %s838_s3 = inlined_call_operand.vmem [shape: f32[2,16,32], index: 3, kind: input, shape index: {}]   ;;  %s839_s4 = inlined_call_operand.vmem [shape: f32[1,32], index: 4, kind: input, shape index: {}]   ;;  %s840_s5 = inlined_call_operand.vmem [shape: f32[1,32], index: 5, kind: input, shape index: {}]   ;;  %s841_s6 = inlined_call_operand.vmem [shape: f32[2,16,32], index: 6, kind: output, shape index: {}]  }
   0x1 LB: > { %s595_s22 = sadd.s32 4294967295, %s718_s21   ;;  %p599_p0 = scmp.ge.s32.totalorder %s718_s21, 1  ;;  %s718_s21 = sphi %s756_s21, %s16_s21  }
   0x2   : > { %p222_p1 = scmp.lt.s32.totalorder %s718_s21, 3 }
   0x4   : > { %p223_p2 = pnand %p599_p0, %p222_p1 }
   0x5   : > { %p257_p3 = scmp.lt.s32.totalorder (!%p223_p2), %s595_s22, 1 }
   0x6   : > { %226 = sbr.rel (%p223_p2) target bundleno = 444 (0x1bc), region = 44 }
   0xb   : > { %v688_v0 = vld [vmem:[%s836_s1 + $0x38] sm:$0xff]  ;;  %v687_v3 = vld [vmem:[%s836_s1 + $0x30] sm:$0xff]  ;;  %s843_s22 = smov (!%p257_p3, %s595_s22), 1  ;;  %v686_v6 = vld [vmem:[%s836_s1 + $0x28] sm:$0xff]  ;;  %vm405_vm0 = vcmask 1046528   ;;  %vm338_vm2 = vcmask 523264  }
   0xc   : > { %v684_v1 = vld [vmem:[%s836_s1 + $0x18] sm:$0xff]  ;;  %346 = vmatpush.bf16.msra.mxu0 %v688_v0  ;;  %v683_v4 = vld [vmem:[%s836_s1 + $0x10] sm:$0xff]  ;;  %s693_s11 = smul.u32 12, %s843_s22  ;;  %v682_v7 = vld [vmem:[%s836_s1 + $0x8] sm:$0xff]  ;;  %vm301_vm1 = vsmask.f32 7424 }
   0xd   : > { %v692_v2 = vld [vmem:[%s836_s1 + $0x58] sm:$0xff]  ;;  %386 = vmatpush.bf16.msra.mxu1 %v684_v1  ;;  %v691_v5 = vld [vmem:[%s836_s1 + $0x50] sm:$0xff]  ;;  %v690_v8 = vld [vmem:[%s836_s1 + $0x48] sm:$0xff]  ;;  %s678_s29 = sshll.u32 %s843_s22, 4  ;;  %vm462_vm3 = vcmask 261120   ;;  %v720_v45 = vmov 32.0  }
   0xe   : > { %440 = vmatpush.bf16.msra.mxu2 %v692_v2  ;;  %s261_s18 = scalar_lea.vmem %s835_s0, %s693_s11  ;;  %v685_v14 = vld [vmem:[%s836_s1 + $0x20] sm:$0xff]  ;;  %s266_s8 = scalar_lea.vmem %s838_s3, %s678_s29  ;;  %706 = vrcp.f32 %v720_v45 }
   0xf   : > { %v680_v9 = vld [vmem:[%s261_s18] sm:$0xff]  ;;  %v275_v10 = vld [vmem:[%s261_s18 + $0x8] sm:$0x1]  ;;  %s271_s17 = scalar_lea.vmem %s841_s6, %s678_s29 }
  0x10   : > { %347 = vmatpush.bf16.msra.mxu0 %v687_v3  ;;  %v298_v11 = vunpack.c.l.b16 %v275_v10  ;;  %v303_v12 = vshrl.u32 %v680_v9, 16  ;;  %v305_v13 = vshll.u32 %v680_v9, 16  ;;  %v681_v15 = vld [vmem:[%s836_s1] sm:$0xff]  ;;  %v406_v19 = vrot.slane %v680_v9, 1  ;;  %v453_v40 = vld [vmem:[%s266_s8 + $0x8] sm:$0xff] }
  0x11   : > { %387 = vmatpush.bf16.msra.mxu1 %v683_v4  ;;  %v689_v17 = vld [vmem:[%s836_s1 + $0x40] sm:$0xff] }
  0x12   : > { %441 = vmatpush.bf16.msra.mxu2 %v691_v5  ;;  %v300_v16 = vpack.c.b16 %v298_v11, %v298_v11  ;;  %v307_v18 = vrot.slane %v305_v13, 1  ;;  %v452_v30 = vld [vmem:[%s266_s8] sm:$0xff] }
  0x13   : > { %v703_v32 = vld [vmem:[%s837_s2] ss:$0 sm:$0xff] }
  0x14   : > { %348 = vmatpush.bf16.msra.mxu0 %v686_v6  ;;  %v310_v20 = vshll.u32 %v300_v16, 16  ;;  %v407_v21 = vrot.slane %v300_v16, 1  ;;  %v308_v22 = vor.u32 %v307_v18, %v303_v12  ;;  %v707_v46 = vpop.eup %706  ;;  %v704_v12 = vld [vmem:[%s839_s4] ss:$0 sm:$0xff] }
  0x15   : > { %388 = vmatpush.bf16.msra.mxu1 %v682_v7  ;;  %v470_v47 = vmul.f32 32.0, %v707_v46  ;;  %vm474_vm4 = vweird.f32 %v707_v46 }
  0x16   : > { %442 = vmatpush.bf16.msra.mxu2 %v690_v8  ;;  %v312_v23 = vrot.slane %v310_v20, 1  ;;  %v408_v24 = vsel %vm405_vm0, %v406_v19, %v407_v21 }
  0x17   : > { %v471_v48 = vsub.f32 1.0, %v470_v47 }
  0x18   : > { %349 = vmatpush.bf16.msra.mxu0 %v685_v14  ;;  %v313_v25 = vsel %vm301_vm1, %v308_v22, %v312_v23 }
  0x19   : > { %389 = vmatpush.bf16.msra.mxu1 %v681_v15  ;;  %v472_v49 = vmul.f32 %v707_v46, %v471_v48  ;;  %v705_v15 = vld [vmem:[%s840_s5] ss:$0 sm:$0xff] }
  0x1a   : > { %443 = vmatpush.bf16.msra.mxu2 %v689_v17 }
  0x1b   : > { %633 = vmatmul.msk.bf16.vlgmr.msra.gmra.mxu0 %vm338_vm2, %v313_v25  ;;  %v473_v50 = vadd.f32 %v707_v46, %v472_v49 }
  0x1c   : > { %650 = vmatmul.msk.bf16.vlgmr.msra.gmra.mxu1 %vm338_vm2, %v680_v9 }
  0x1d   : > { %675 = vmatmul.msk.bf16.vlgmr.msra.gmra.mxu2 %vm338_vm2, %v408_v24  ;;  %v475_v51 = vsel %vm474_vm4, %v707_v46, %v473_v50 }
  0x98   : > { %v351_v26 = vpop.f32.mrf.mxu0 }
  0x99   : > { %v391_v27 = vpop.f32.mrf.mxu1 }
  0x9a   : > { %v392_v28 = vadd.f32 %v391_v27, %v351_v26 }
  0xa0   : > { %v445_v29 = vpop.f32.mrf.mxu2  ;;  %v353_v34 = vpop.f32.mrf.mxu0 }
  0xa1   : > { %v450_v31 = vadd.f32 %v445_v29, %v392_v28  ;;  %v393_v35 = vpop.f32.mrf.mxu1 }
  0xa2   : > { %v394_v37 = vadd.f32 %v393_v35, %v353_v34 }
  0xa3   : > { %v454_v33 = vadd.f32 %v452_v30, %v450_v31 }
  0xa5   : > { %v460_v36 = vadd.f32 %v703_v32, %v454_v33 }
  0xa7   : > { %v463_v38 = vsel %vm462_vm3, %v460_v36, 0.0 }
  0xa8   : > { %v447_v39 = vpop.f32.mrf.mxu2  ;;  %464 = vadd.xlane.f32.xlu0 %v463_v38 }
  0xa9   : > { %v451_v41 = vadd.f32 %v447_v39, %v394_v37 }
  0xab   : > { %v455_v42 = vadd.f32 %v453_v40, %v451_v41 }
  0xad   : > { %v461_v43 = vadd.f32 %v703_v32, %v455_v42 }
  0xaf   : > { %v466_v44 = vsel %vm462_vm3, %v461_v43, 0.0 }
  0xb0   : > { %467 = vadd.xlane.f32.xlu0 %v466_v44 }
 0x11b   : > { %v465_v52 = vpop.xlane.xlu0 %464 }
 0x11c   : > { %v476_v53 = vmul.f32 %v475_v51, %v465_v52 }
 0x11e   : > { %v478_v54 = vsub.f32 %v460_v36, %v476_v53 }
 0x120   : > { %v480_v55 = vmul.f32 %v478_v54, %v478_v54 }
 0x122   : > { %v482_v56 = vsel %vm462_vm3, %v480_v55, 0.0 }
 0x123   : > { %483 = vadd.xlane.f32.xlu1 %v482_v56  ;;  %v468_v57 = vpop.xlane.xlu0 %467 }
 0x124   : > { %v477_v58 = vmul.f32 %v475_v51, %v468_v57 }
 0x126   : > { %v479_v59 = vsub.f32 %v461_v43, %v477_v58 }
 0x128   : > { %v481_v60 = vmul.f32 %v479_v59, %v479_v59 }
 0x12a   : > { %v485_v61 = vsel %vm462_vm3, %v481_v60, 0.0 }
 0x12b   : > { %486 = vadd.xlane.f32.xlu1 %v485_v61 }
 0x196   : > { %v484_v62 = vpop.xlane.xlu1 %483 }
 0x197   : > { %v488_v63 = vmul.f32 %v484_v62, %v475_v51 }
 0x199   : > { %v490_v0 = vadd.f32 1e-05, %v488_v63 }
 0x19b   : > { %708 = vrsqrt.f32 %v490_v0  ;;  %vm498_vm6 = vweird.f32 %v490_v0 }
 0x19e   : > { %v487_v1 = vpop.xlane.xlu1 %486 }
 0x19f   : > { %v489_v2 = vmul.f32 %v487_v1, %v475_v51 }
 0x1a1   : > { %v709_v3 = vpop.eup %708  ;;  %v491_v4 = vadd.f32 1e-05, %v489_v2 }
 0x1a2   : > { %v493_v5 = vmul.f32 %v709_v3, %v490_v0  ;;  %vm499_vm5 = vweird.f32 %v709_v3 }
 0x1a3   : > { %710 = vrsqrt.f32 %v491_v4  ;;  %vm500_vm7 = vmor %vm498_vm6, %vm499_vm5  ;;  %vm508_vm9 = vweird.f32 %v491_v4 }
 0x1a4   : > { %v494_v6 = vmul.f32 %v709_v3, %v493_v5 }
 0x1a6   : > { %v495_v7 = vmul.f32 0.5, %v494_v6 }
 0x1a8   : > { %v496_v8 = vsub.f32 1.5, %v495_v7 }
 0x1a9   : > { %v711_v9 = vpop.eup %710 }
 0x1aa   : > { %v497_v10 = vmul.f32 %v709_v3, %v496_v8  ;;  %v503_v11 = vmul.f32 %v711_v9, %v491_v4  ;;  %vm509_vm8 = vweird.f32 %v711_v9 }
 0x1ab   : > { %vm510_vm10 = vmor %vm508_vm9, %vm509_vm8 }
 0x1ac   : > { %v501_v13 = vsel %vm500_vm7, %v709_v3, %v497_v10  ;;  %v504_v14 = vmul.f32 %v711_v9, %v503_v11 }
 0x1ad   : > { %v512_v16 = vmul.f32 %v501_v13, %v478_v54 }
 0x1ae   : > { %v505_v17 = vmul.f32 0.5, %v504_v14 }
 0x1af   : > { %v518_v18 = vmul.f32 %v704_v12, %v512_v16 }
 0x1b0   : > { %v506_v19 = vsub.f32 1.5, %v505_v17 }
 0x1b1   : > { %v524_v20 = vadd.f32 %v705_v15, %v518_v18 }
 0x1b2   : > { %v507_v21 = vmul.f32 %v711_v9, %v506_v19 }
 0x1b3   : > { %526 = vst.msk [vmem:[%s271_s17] sm:$0xff] %vm462_vm3, %v524_v20 }
 0x1b4   : > { %v511_v22 = vsel %vm510_vm10, %v711_v9, %v507_v21 }
 0x1b5   : > { %v513_v23 = vmul.f32 %v511_v22, %v479_v59 }
 0x1b7   : > { %v519_v24 = vmul.f32 %v704_v12, %v513_v23 }
 0x1b9   : > { %v525_v25 = vadd.f32 %v705_v15, %v519_v24 }
 0x1bb   : > { %527 = vst.msk [vmem:[%s271_s17 + $0x8] sm:$0xff] %vm462_vm3, %v525_v25 }
 0x1bc PF: > { %s16_s21 = sadd.s32 1, %s718_s21  }
 0x1bd   : > { %p13_p4 = scmp.ge.s32.totalorder %s16_s21, 4  }
 0x1bf   :  { %15 = sbr.rel (!%p13_p4) target bundleno = 1 (0x1), region = 79 }

// kernel: text_encoder_forward.14
= control target key start
LH: loop header
LB: loop body
LE: loop exit
PB: predicated region body
PF: predicated region fallthrough
CT: control target
= control target key end

     0   :  { %s1721_s18 = smov [#allocation3]   ;;  %s2870_s0 = inlined_call_operand.vmem [shape: s32[2], index: 0, kind: input, shape index: {}]   ;;  %s2871_s1 = inlined_call_operand.vmem [shape: bf16[2,16,96], index: 1, kind: input, shape index: {}]   ;;  %s2872_s2 = inlined_call_operand.vmem [shape: bf16[21,16], index: 2, kind: input, shape index: {}]   ;;  %s2873_s3 = inlined_call_operand.vmem [shape: bf16[21,16], index: 3, kind: input, shape index: {}]   ;;  %s2874_s4 = inlined_call_operand.vmem [shape: bf16[2,16,32], index: 4, kind: output, shape index: {}]  }
   0x1   :  { %s10_s17 = sshll.u32 %s2870_s0, 4  ;;  %s11_s17 = int_to_ptr.vmem [resolvable:$true] %s10_s17 }
   0x2   :  { %13 = dma.vmem_to_smem %s11_s17, 16, %s1721_s18, [#allocation2] }
   0x3   :  { %1715 = dma.done.wait [#allocation2], 16 }
   0x4   :  { %1716 = vsyncadd [#allocation2], 4294967280 }
   0x5   :  { %16 = sfence }
   0x6   :  { %s1778_s19 = smov 0  }
   0x7 LB: > { %s1784_s20 = sadd.s32 4294967295, %s1719_s19   ;;  %p1533_p0 = scmp.ge.s32.totalorder %s1719_s19, 1  ;;  %s1719_s19 = sphi %s1778_s19, %s22_s19  }
   0x8   : > { %p146_p1 = scmp.lt.s32.totalorder %s1719_s19, 3 }
   0xa   : > { %p147_p2 = pnand %p1533_p0, %p146_p1 }
   0xc   : > { %150 = sbr.rel (%p147_p2) target bundleno = 1460 (0x5b4), region = 32 }
  0x11   : > { %v193_v0 = vld [vmem:[%s2872_s2 + $0x8] sm:$0x7]  ;;  %p170_p3 = scmp.lt.s32.totalorder %s1784_s20, 1  ;;  %vm215_vm0 = vcmask 130048   ;;  %v1556_v6 = vld [vmem:[%s2872_s2] sm:$0xff]  ;;  %s1722_s29 = smov 96   ;;  %v182_v39 = vlaneseq }
  0x12   : > { %v212_v1 = vunpack.c.l.b16 %v193_v0  ;;  %v220_v9 = vsel %vm215_vm0, %v1556_v6, 0  ;;  %v1723_v13 = vmov 5   ;;  %v1724_v14 = vmov 4   ;;  %s1744_s30 = smov 112   ;;  %s181_s5 = sld [smem:[#allocation3 + %s1784_s20]] }
  0x13   : > { %s1793_s22 = scalar_select %p170_p3, %s1784_s20, 1  ;;  %1601 = vset.pattern.permute.xlu0 %v1723_v13  ;;  %1600 = vset.pattern.permute.xlu1 %v1724_v14  ;;  %v1725_v15 = vmov 3   ;;  %v1726_v19 = vmov 10   ;;  %v1727_v20 = vmov 8   ;;  %v1728_v21 = vmov 6  }
  0x14   : > { %v214_v2 = vpack.c.b16 %v212_v1, %v212_v1  ;;  %1599 = vset.pattern.permute.xlu2 %v1725_v15  ;;  %v1729_v22 = vmov 15   ;;  %v1730_v23 = vmov 9   ;;  %v1731_v24 = vmov 7   ;;  %s1745_s6 = smov 64   ;;  %s1747_s7 = smov 80  }
  0x15   : > { %s1554_s23 = sshll.u32 %s1793_s22, 3  ;;  %v1732_v25 = vmov 0   ;;  %v1733_v26 = vmov 13   ;;  %v1734_v28 = vmov 11   ;;  %v1735_v29 = vmov 14   ;;  %s1748_s12 = smov 48  }
  0x16   : > { %v223_v3 = vsel %vm215_vm0, %v214_v2, 0  ;;  %s1802_s26 = scalar_lea.vmem %s2871_s1, %s1554_s23  ;;  %v1736_v30 = vmov 12   ;;  %v1737_v31 = vmov 18   ;;  %v1738_v32 = vmov 16   ;;  %s1749_s13 = smov 16  }
  0x17   : > { %231 = vmatpush.bf16.xpose.msra.mxu0 %v223_v3  ;;  %v1805_v4 = vld [vmem:[%s1802_s26] sm:$0xff]  ;;  %885 = vmatpush.bf16.xpose.msra.mxu3 %v223_v3  ;;  %v1739_v33 = vmov 19   ;;  %v1740_v34 = vmov 17   ;;  %v1741_v35 = vmov 1   ;;  %v1742_v36 = vmov 20   ;;  %s179_s16 = scalar_lea.vmem %s2874_s4, %s1554_s23 }
  0x18   : > { %v200_v5 = vld [vmem:[%s1802_s26] sm:$0xff]   ;;  %258 = vrot.lane.b32.xlu0 %v1805_v4, %s1722_s29  ;;  %v1743_v37 = vmov 2   ;;  %v1871_v40 = vshrl.u32 %v182_v39, 7  ;;  %v1873_v41 = vand.u32 127, %v182_v39 }
  0x19   : > { %v202_v7 = vunpack.c.l.bf16 %v200_v5  ;;  %v203_v8 = vunpack.c.h.bf16 %v200_v5 }
  0x1a   : > { %v1877_v44 = vsub.s32 %v1873_v41, %v1871_v40 }
  0x1b   : > { %v204_v10 = vmul.f32 0.25, %v202_v7  ;;  %v205_v11 = vmul.f32 0.25, %v203_v8 }
  0x1c   : > { %vm305_vm1 = vcmp.eq.s32.totalorder %v1877_v44, 4294967289  ;;  %vm319_vm2 = vcmp.eq.s32.totalorder %v1877_v44, 4294967290  ;;  %vm333_vm3 = vcmp.eq.s32.totalorder %v1877_v44, 4294967291  ;;  %vm2878_vm4 = vcmp.eq.s32.totalorder %v1877_v44, 4294967292 }
  0x1d   : > { %v1813_v12 = vpack.c.bf16 %v205_v11, %v204_v10  ;;  %vm361_vm5 = vcmp.eq.s32.totalorder %v1877_v44, 4294967293  ;;  %vm375_vm6 = vcmp.eq.s32.totalorder %v1877_v44, 4294967294  ;;  %vm2877_vm7 = vcmp.eq.s32.totalorder %v1877_v44, 4294967295 }
  0x1e   : > { %vm403_vm8 = vcmp.eq.s32.totalorder %v1877_v44, 0  ;;  %vm2884_vm9 = vcmp.eq.s32.totalorder %v1877_v44, 1  ;;  %vm2875_vm10 = vcmp.eq.s32.totalorder %v1877_v44, 2  ;;  %vm2903_vm11 = vcmp.eq.s32.totalorder %v1877_v44, 3 }
  0x1f   : > { %232 = vmatpush.bf16.xpose.msra.mxu0 %v220_v9  ;;  %886 = vmatpush.bf16.xpose.msra.mxu3 %v220_v9  ;;  %vm2882_vm12 = vcmp.eq.s32.totalorder %v1877_v44, 4  ;;  %vm2876_vm13 = vcmp.eq.s32.totalorder %v1877_v44, 5  ;;  %vm2902_vm14 = vcmp.eq.s32.totalorder %v1877_v44, 6  ;;  %vm2881_vm15 = vcmp.eq.s32.totalorder %v1877_v44, 7 }
  0x26   : > { %1542 = vmatmul.msk.bf16.vlgmr.msra.gmra.mxu0 %vm215_vm0, %v1813_v12 }
  0x8a   : > { %v259_v16 = vpop.permute.xlu0 %258 }
  0x8b   : > { %v261_v17 = vsel %vm215_vm0, %v259_v16, 0 }
  0x8c   : > { %270 = vmatpush.bf16.xpose.msra.mxu1 %v261_v17 }
  0x93   : > { %1547 = vmatmul.msk.bf16.vlgmr.msra.gmra.mxu1 %vm215_vm0, %v1813_v12 }
  0xa3   : > { %v234_v18 = vpop.f32.mrf.mxu0 }
  0xa4   : > { %336 = vperm.xlu0 %1601, %v234_v18   ;;  %322 = vperm.xlu1 %1600, %v234_v18  }
  0xa5   : > { %308 = vperm.xlu2 %1599, %v234_v18  }
  0xab   : > { %v1831_v27 = vpop.f32.mrf.mxu0 }
  0xac   : > { %1606 = vset.pattern.permute.xlu0 %v1726_v19  ;;  %1604 = vset.pattern.permute.xlu1 %v1727_v20 }
  0xad   : > { %1602 = vset.pattern.permute.xlu2 %v1728_v21  ;;  %406 = vperm.xlu0 %1606, %v234_v18  }
  0xae   : > { %378 = vperm.xlu1 %1604, %v234_v18   ;;  %350 = vperm.xlu2 %1602, %v234_v18  }
  0xb5   : > { %1611 = vset.pattern.permute.xlu0 %v1729_v22 }
  0xb6   : > { %1605 = vset.pattern.permute.xlu1 %v1730_v23  ;;  %1603 = vset.pattern.permute.xlu2 %v1731_v24 }
  0xb7   : > { %476 = vperm.xlu0 %1611, %v234_v18   ;;  %392 = vperm.xlu1 %1605, %v234_v18  }
  0xb8   : > { %364 = vperm.xlu2 %1603, %v234_v18  }
  0xbf   : > { %1616 = vset.pattern.permute.xlu0 %v1732_v25  ;;  %1609 = vset.pattern.permute.xlu1 %v1733_v26 }
  0xc0   : > { %1607 = vset.pattern.permute.xlu2 %v1734_v28  ;;  %448 = vperm.xlu1 %1609, %v234_v18  }
  0xc1   : > { %420 = vperm.xlu2 %1607, %v234_v18   ;;  %248 = vperm.xlu0 %1616, %v1831_v27  }
  0xc8   : > { %1610 = vset.pattern.permute.xlu1 %v1735_v29 }
  0xc9   : > { %1608 = vset.pattern.permute.xlu2 %v1736_v30  ;;  %1623 = vset.pattern.permute.xlu0 %v1731_v24 }
  0xca   : > { %462 = vperm.xlu1 %1610, %v234_v18   ;;  %434 = vperm.xlu2 %1608, %v234_v18  }
  0xcb   : > { %368 = vperm.xlu0 %1623, %v1831_v27  }
  0xd2   : > { %1614 = vset.pattern.permute.xlu1 %v1737_v31  ;;  %1612 = vset.pattern.permute.xlu2 %v1738_v32 }
  0xd3   : > { %1628 = vset.pattern.permute.xlu0 %v1736_v30  ;;  %518 = vperm.xlu1 %1614, %v234_v18  }
  0xd4   : > { %490 = vperm.xlu2 %1612, %v234_v18   ;;  %438 = vperm.xlu0 %1628, %v1831_v27  }
  0xdb   : > { %1615 = vset.pattern.permute.xlu1 %v1739_v33 }
  0xdc   : > { %1613 = vset.pattern.permute.xlu2 %v1740_v34  ;;  %1633 = vset.pattern.permute.xlu0 %v1740_v34 }
  0xdd   : > { %532 = vperm.xlu1 %1615, %v234_v18   ;;  %504 = vperm.xlu2 %1613, %v234_v18  }
  0xde   : > { %508 = vperm.xlu0 %1633, %v1831_v27  }
  0xe5   : > { %1617 = vset.pattern.permute.xlu1 %v1741_v35  ;;  %1619 = vset.pattern.permute.xlu2 %v1725_v15 }
  0xe6   : > { %1634 = vset.pattern.permute.xlu0 %v1742_v36  ;;  %312 = vperm.xlu2 %1619, %v1831_v27  }
  0xe7   : > { %284 = vperm.xlu1 %1617, %v1831_v27   ;;  %546 = vperm.xlu0 %1634, %v234_v18  }
  0xee   : > { %1620 = vset.pattern.permute.xlu2 %v1724_v14 }
  0xef   : > { %1618 = vset.pattern.permute.xlu1 %v1743_v37  ;;  %874 = vrot.lane.b32.xlu0 %v1813_v12, %s1744_s30 }
  0xf0   : > { %326 = vperm.xlu2 %1620, %v1831_v27   ;;  %298 = vperm.xlu1 %1618, %v1831_v27  }
  0xf1   : > { %1639 = vset.pattern.permute.xlu0 %v1741_v35 }
  0xf8   : > { %1624 = vset.pattern.permute.xlu2 %v1727_v20  ;;  %1621 = vset.pattern.permute.xlu1 %v1723_v13 }
  0xf9   : > { %382 = vperm.xlu2 %1624, %v1831_v27   ;;  %340 = vperm.xlu1 %1621, %v1831_v27  }
  0xff   : > { %v309_v38 = vpop.permute.xlu2 %308 }
 0x100   : > { %v315_v48 = vsel %vm305_vm1, %v309_v38, 0.0 }
 0x101   : > { %1625 = vset.pattern.permute.xlu2 %v1730_v23  ;;  %1622 = vset.pattern.permute.xlu1 %v1728_v21 }
 0x102   : > { %396 = vperm.xlu2 %1625, %v1831_v27   ;;  %354 = vperm.xlu1 %1622, %v1831_v27  }
 0x108   : > { %v351_v45 = vpop.permute.xlu2 %350 }
 0x109   : > { %v357_v58 = vsel %vm2878_vm4, %v351_v45, 0.0 }
 0x10a   : > { %1629 = vset.pattern.permute.xlu2 %v1733_v26  ;;  %1626 = vset.pattern.permute.xlu1 %v1726_v19 }
 0x10b   : > { %452 = vperm.xlu2 %1629, %v1831_v27   ;;  %410 = vperm.xlu1 %1626, %v1831_v27  }
 0x110   : > { %v272_v46 = vpop.f32.mrf.mxu1 }
 0x111   : > { %v317_v51 = vadd.f32 %v315_v48, %v272_v46 }
 0x112   : > { %v365_v53 = vpop.permute.xlu2 %364 }
 0x113   : > { %1630 = vset.pattern.permute.xlu2 %v1735_v29  ;;  %1627 = vset.pattern.permute.xlu1 %v1734_v28  ;;  %v371_v60 = vsel %vm361_vm5, %v365_v53, 0.0 }
 0x114   : > { %466 = vperm.xlu2 %1630, %v1831_v27   ;;  %424 = vperm.xlu1 %1627, %v1831_v27  }
 0x116   : > { %v337_v42 = vpop.permute.xlu0 %336  ;;  %v323_v43 = vpop.permute.xlu1 %322 }
 0x117   : > { %v329_v49 = vsel %vm319_vm2, %v323_v43, 0.0  ;;  %v343_v54 = vsel %vm333_vm3, %v337_v42, 0.0 }
 0x118   : > { %v331_v52 = vadd.f32 %v329_v49, %v317_v51 }
 0x11a   : > { %v345_v55 = vadd.f32 %v343_v54, %v331_v52 }
 0x11b   : > { %v421_v61 = vpop.permute.xlu2 %420 }
 0x11c   : > { %1635 = vset.pattern.permute.xlu2 %v1737_v31  ;;  %1631 = vset.pattern.permute.xlu1 %v1729_v22  ;;  %v359_v59 = vadd.f32 %v357_v58, %v345_v55  ;;  %v427_v9 = vsel %vm2884_vm9, %v421_v61, 0.0 }
 0x11d   : > { %522 = vperm.xlu2 %1635, %v1831_v27   ;;  %480 = vperm.xlu1 %1631, %v1831_v27  }
 0x11e   : > { %v373_v62 = vadd.f32 %v371_v60, %v359_v59 }
 0x11f   : > { %v407_v47 = vpop.permute.xlu0 %406 }
 0x120   : > { %v379_v50 = vpop.permute.xlu1 %378  ;;  %v413_v6 = vsel %vm403_vm8, %v407_v47, 0.0 }
 0x121   : > { %v385_v63 = vsel %vm375_vm6, %v379_v50, 0.0 }
 0x122   : > { %v387_v2 = vadd.f32 %v385_v63, %v373_v62 }
 0x124   : > { %v435_v7 = vpop.permute.xlu2 %434 }
 0x125   : > { %1636 = vset.pattern.permute.xlu2 %v1739_v33  ;;  %1632 = vset.pattern.permute.xlu1 %v1738_v32  ;;  %v441_v16 = vsel %vm2875_vm10, %v435_v7, 0.0  ;;  %vm2879_vm10 = vcmp.eq.s32.totalorder %v1877_v44, 8  ;;  %v274_v7 = vpop.f32.mrf.mxu1 }
 0x126   : > { %536 = vperm.xlu2 %1636, %v1831_v27   ;;  %494 = vperm.xlu1 %1632, %v1831_v27  }
 0x129   : > { %v477_v56 = vpop.permute.xlu0 %476  ;;  %v393_v57 = vpop.permute.xlu1 %392 }
 0x12a   : > { %v399_v0 = vsel %vm2877_vm7, %v393_v57, 0.0  ;;  %v483_v42 = vsel %vm2876_vm13, %v477_v56, 0.0  ;;  %vm2901_vm13 = vcmp.eq.s32.totalorder %v1877_v44, 9  ;;  %vm2880_vm7 = vcmp.eq.s32.totalorder %v1877_v44, 10 }
 0x12b   : > { %v401_v5 = vadd.f32 %v399_v0, %v387_v2  ;;  %v189_v56 = vstv %s181_s5  ;;  %v184_v57 = vadd.s32 8, %v1871_v40 }
 0x12c   : > { %vm1953_vm4 = vcmp.lt.s32.totalorder %v1873_v41, %v189_v56 }
 0x12d   : > { %v415_v8 = vadd.f32 %v413_v6, %v401_v5  ;;  %v1958_v0 = vsub.s32 %v1873_v41, %v184_v57 }
 0x12e   : > { %1637 = vset.pattern.permute.xlu1 %v1742_v36  ;;  %1640 = vset.pattern.permute.xlu2 %v1743_v37  ;;  %v491_v18 = vpop.permute.xlu2 %490 }
 0x12f   : > { %550 = vperm.xlu1 %1637, %v1831_v27   ;;  %v429_v11 = vadd.f32 %v427_v9, %v415_v8  ;;  %v497_v46 = vsel %vm2902_vm14, %v491_v18, 0.0  ;;  %vm2888_vm9 = vcmp.eq.s32.totalorder %v1958_v0, 4294967291 }
 0x131   : > { %v443_v17 = vadd.f32 %v441_v16, %v429_v11 }
 0x132   : > { %v449_v1 = vpop.permute.xlu1 %448 }
 0x133   : > { %v249_v3 = vpop.permute.xlu0 %248 }
 0x137   : > { %1638 = vset.pattern.permute.xlu1 %v1732_v25  ;;  %v455_v25 = vsel %vm2903_vm11, %v449_v1, 0.0  ;;  %v505_v45 = vpop.permute.xlu2 %504 }
 0x138   : > { %v457_v35 = vadd.f32 %v455_v25, %v443_v17  ;;  %v511_v50 = vsel %vm2881_vm15, %v505_v45, 0.0  ;;  %vm2886_vm15 = vcmp.eq.s32.totalorder %v1958_v0, 4294967288 }
 0x13c   : > { %v463_v10 = vpop.permute.xlu1 %462 }
 0x13d   : > { %v1918_v12 = vpop.permute.xlu0 %368  ;;  %v469_v27 = vsel %vm2882_vm12, %v463_v10, 0.0  ;;  %vm2891_vm12 = vcmp.eq.s32.totalorder %v1958_v0, 4294967289 }
 0x13e   : > { %v471_v39 = vadd.f32 %v469_v27, %v457_v35 }
 0x140   : > { %v485_v43 = vadd.f32 %v483_v42, %v471_v39  ;;  %v313_v53 = vpop.permute.xlu2 %312 }
 0x141   : > { %v316_v25 = vsel %vm2891_vm12, %v313_v53, 0.0  ;;  %vm2895_vm12 = vcmp.eq.s32.totalorder %v1958_v0, 2 }
 0x142   : > { %v499_v47 = vadd.f32 %v497_v46, %v485_v43 }
 0x144   : > { %v513_v51 = vadd.f32 %v511_v50, %v499_v47 }
 0x145   : > { %v519_v37 = vpop.permute.xlu1 %518 }
 0x146   : > { %v1928_v38 = vpop.permute.xlu0 %438  ;;  %v525_v52 = vsel %vm2879_vm10, %v519_v37, 0.0  ;;  %vm2883_vm10 = vcmp.eq.s32.totalorder %v1958_v0, 4294967286 }
 0x147   : > { %v527_v55 = vadd.f32 %v525_v52, %v513_v51  ;;  %v252_v41 = vsel %vm2883_vm10, %v249_v3, 0.0  ;;  %vm2887_vm10 = vcmp.eq.s32.totalorder %v1958_v0, 4294967290 }
 0x148   : > { %v275_v9 = vadd.f32 %v274_v7, %v252_v41 }
 0x14a   : > { %v327_v2 = vpop.permute.xlu2 %326 }
 0x14b   : > { %v330_v27 = vsel %vm2887_vm10, %v327_v2, 0.0  ;;  %vm2897_vm10 = vcmp.eq.s32.totalorder %v1958_v0, 4294967294 }
 0x14f   : > { %v533_v48 = vpop.permute.xlu1 %532 }
 0x150   : > { %v1938_v49 = vpop.permute.xlu0 %508  ;;  %v539_v54 = vsel %vm2901_vm13, %v533_v48, 0.0 }
 0x151   : > { %v541_v58 = vadd.f32 %v539_v54, %v527_v55 }
 0x153   : > { %v383_v16 = vpop.permute.xlu2 %382 }
 0x154   : > { %v386_v50 = vsel %vm2897_vm10, %v383_v16, 0.0  ;;  %vm516_vm10 = vcmp.eq.s32.totalorder %v1958_v0, 8 }
 0x159   : > { %v285_v59 = vpop.permute.xlu1 %284  ;;  %v547_v60 = vpop.permute.xlu0 %546 }
 0x15a   : > { %v553_v61 = vsel %vm2880_vm7, %v547_v60, 0.0  ;;  %vm2885_vm7 = vcmp.eq.s32.totalorder %v1958_v0, 4294967287 }
 0x15b   : > { %v555_v63 = vadd.f32 %v553_v61, %v541_v58  ;;  %v288_v8 = vsel %vm2885_vm7, %v285_v59, 0.0  ;;  %vm2889_vm7 = vcmp.eq.s32.totalorder %v1958_v0, 4294967292  ;;  %v2904_v61 = vmov 0.0  }
 0x15c   : > { %v290_v11 = vadd.f32 %v288_v8, %v275_v9  ;;  %v397_v39 = vpop.permute.xlu2 %396  ;;  %585 = vadd.xlane.f32.xlu0 %v2904_v61 }
 0x15d   : > { %v1962_v1 = vsel %vm1953_vm4, %v555_v63, -10000.0  ;;  %v442_v63 = vsel %vm2895_vm12, %v1928_v38, 0.0  ;;  %vm2899_vm12 = vcmp.eq.s32.totalorder %v1958_v0, 6 }
 0x15e   : > { %v559_v40 = vsel %vm215_vm0, %v1962_v1, -inf }
 0x15f   : > { %560 = vmax.xlane.f32.xlu2 %v559_v40 }
 0x161   : > { %v1967_v5 = vpop.permute.xlu0 %874 }
 0x162   : > { %v299_v6 = vpop.permute.xlu1 %298  ;;  %1549 = vmatmul.msk.bf16.vlgmr.msra.gmra.mxu3 %vm215_vm0, %v1967_v5 }
 0x163   : > { %v302_v10 = vsel %vm2886_vm15, %v299_v6, 0.0  ;;  %vm2890_vm15 = vcmp.eq.s32.totalorder %v1958_v0, 4294967293 }
 0x164   : > { %v304_v17 = vadd.f32 %v302_v10, %v290_v11  ;;  %v372_v47 = vsel %vm2890_vm15, %v1918_v12, 0.0  ;;  %vm2894_vm15 = vcmp.eq.s32.totalorder %v1958_v0, 1  ;;  %616 = vadd.xlane.f32.xlu0 %v2904_v61 }
 0x165   : > { %v453_v52 = vpop.permute.xlu2 %452 }
 0x166   : > { %v318_v3 = vadd.f32 %v316_v25, %v304_v17 }
 0x168   : > { %v332_v37 = vadd.f32 %v330_v27, %v318_v3 }
 0x16b   : > { %v341_v18 = vpop.permute.xlu1 %340 }
 0x16c   : > { %v344_v35 = vsel %vm2888_vm9, %v341_v18, 0.0  ;;  %vm2893_vm9 = vcmp.eq.s32.totalorder %v1958_v0, 4294967295  ;;  %629 = vadd.xlane.f32.xlu0 %v2904_v61 }
 0x16d   : > { %v346_v42 = vadd.f32 %v344_v35, %v332_v37  ;;  %v400_v54 = vsel %vm2893_vm9, %v397_v39, 0.0  ;;  %vm460_vm9 = vcmp.eq.s32.totalorder %v1958_v0, 4 }
 0x16e   : > { %v467_v59 = vpop.permute.xlu2 %466 }
 0x16f   : > { %v470_v8 = vsel %vm460_vm9, %v467_v59, 0.0 }
 0x174   : > { %v355_v43 = vpop.permute.xlu1 %354 }
 0x175   : > { %v358_v45 = vsel %vm2889_vm7, %v355_v43, 0.0  ;;  %vm2892_vm7 = vcmp.eq.s32.totalorder %v1958_v0, 0 }
 0x176   : > { %v360_v46 = vadd.f32 %v358_v45, %v346_v42 }
 0x177   : > { %593 = vrot.lane.b32.xlu2 %v1805_v4, %s1745_s6  ;;  %v523_v7 = vpop.permute.xlu2 %522 }
 0x178   : > { %v374_v48 = vadd.f32 %v372_v47, %v360_v46  ;;  %v526_v27 = vsel %vm516_vm10, %v523_v7, 0.0 }
 0x17a   : > { %v388_v53 = vadd.f32 %v386_v50, %v374_v48 }
 0x17c   : > { %v402_v12 = vadd.f32 %v400_v54, %v388_v53 }
 0x17d   : > { %v411_v51 = vpop.permute.xlu1 %410 }
 0x17e   : > { %v414_v55 = vsel %vm2892_vm7, %v411_v51, 0.0  ;;  %vm2896_vm7 = vcmp.eq.s32.totalorder %v1958_v0, 3 }
 0x17f   : > { %v416_v56 = vadd.f32 %v414_v55, %v402_v12  ;;  %v456_v2 = vsel %vm2896_vm7, %v453_v52, 0.0  ;;  %vm502_vm7 = vcmp.eq.s32.totalorder %v1958_v0, 7 }
 0x180   : > { %v512_v18 = vsel %vm502_vm7, %v1938_v49, 0.0  ;;  %v537_v25 = vpop.permute.xlu2 %536 }
 0x186   : > { %v425_v57 = vpop.permute.xlu1 %424 }
 0x187   : > { %v428_v58 = vsel %vm2894_vm15, %v425_v57, 0.0  ;;  %vm2898_vm15 = vcmp.eq.s32.totalorder %v1958_v0, 5 }
 0x188   : > { %v430_v60 = vadd.f32 %v428_v58, %v416_v56 }
 0x18a   : > { %v444_v40 = vadd.f32 %v442_v63, %v430_v60 }
 0x18c   : > { %v458_v41 = vadd.f32 %v456_v2, %v444_v40 }
 0x18e   : > { %v472_v9 = vadd.f32 %v470_v8, %v458_v41 }
 0x18f   : > { %v481_v6 = vpop.permute.xlu1 %480 }
 0x190   : > { %v484_v38 = vsel %vm2898_vm15, %v481_v6, 0.0  ;;  %vm530_vm15 = vcmp.eq.s32.totalorder %v1958_v0, 9 }
 0x191   : > { %v486_v10 = vadd.f32 %v484_v38, %v472_v9  ;;  %v540_v37 = vsel %vm530_vm15, %v537_v25, 0.0 }
 0x198   : > { %v495_v11 = vpop.permute.xlu1 %494 }
 0x199   : > { %v498_v16 = vsel %vm2899_vm12, %v495_v11, 0.0  ;;  %vm2900_vm12 = vcmp.eq.s32.totalorder %v1958_v0, 10 }
 0x19a   : > { %v500_v17 = vadd.f32 %v498_v16, %v486_v10 }
 0x19c   : > { %v514_v3 = vadd.f32 %v512_v18, %v500_v17 }
 0x19e   : > { %v528_v35 = vadd.f32 %v526_v27, %v514_v3 }
 0x1a0   : > { %v542_v39 = vadd.f32 %v540_v37, %v528_v35 }
 0x1a1   : > { %v551_v42 = vpop.permute.xlu1 %550 }
 0x1a2   : > { %v554_v43 = vsel %vm2900_vm12, %v551_v42, 0.0  ;;  %vm2918_vm12 = vcmp.eq.s32.totalorder %v1958_v0, 4294967288 }
 0x1a3   : > { %v556_v45 = vadd.f32 %v554_v43, %v542_v39 }
 0x1a5   : > { %v558_v49 = vsel %vm1953_vm4, %v556_v45, -10000.0 }
 0x1a6   : > { %v562_v46 = vsel %vm215_vm0, %v558_v49, -inf }
 0x1a7   : > { %563 = vmax.xlane.f32.xlu1 %v562_v46 }
 0x1c0   : > { %905 = vrot.lane.b32.xlu1 %v1805_v4, %s1747_s7 }
 0x1cf   : > { %v2091_v55 = vpop.xlane.xlu0 %585 }
 0x1d2   : > { %v561_v47 = vpop.xlane.xlu2 %560 }
 0x1d3   : > { %v565_v48 = vsub.f32 %v1962_v1, %v561_v47 }
 0x1d5   : > { %v567_v50 = vmul.f32 1.442695, %v565_v48 }
 0x1d7   : > { %1682 = vpow2.f32 %v567_v50  ;;  %v2096_v56 = vpop.xlane.xlu0 %616 }
 0x1dd   : > { %v2045_v51 = vpop.eup %1682 }
 0x1de   : > { %v571_v52 = vsel %vm215_vm0, %v2045_v51, 0.0 }
 0x1df   : > { %572 = vadd.xlane.f32.xlu0 %v571_v52 }
 0x1e5   : > { %v2049_v53 = vpop.f32.mrf.mxu3 }
 0x1ed   : > { %v2051_v54 = vpop.f32.mrf.mxu3 }
 0x1ee   : > { %941 = vperm.xlu2 %1640, %v2051_v54   ;;  %900 = vperm.xlu1 %1638, %v2051_v54  }
 0x1f3   : > { %929 = vperm.xlu0 %1639, %v2051_v54  }
 0x1f6   : > { %1642 = vset.pattern.permute.xlu2 %v1725_v15  ;;  %1641 = vset.pattern.permute.xlu1 %v1725_v15  ;;  %v594_v15 = vpop.permute.xlu2 %593 }
 0x1f7   : > { %953 = vperm.xlu2 %1642, %v2051_v54   ;;  %949 = vperm.xlu1 %1641, %v2049_v53  }
 0x1f8   : > { %606 = vmatpush.bf16.msra.mxu2 %v594_v15 }
 0x1fb   : > { %1646 = vset.pattern.permute.xlu0 %v1723_v13 }
 0x1fc   : > { %977 = vperm.xlu0 %1646, %v2051_v54  }
 0x1ff   : > { %1643 = vset.pattern.permute.xlu1 %v1724_v14  ;;  %1644 = vset.pattern.permute.xlu2 %v1724_v14 }
 0x200   : > { %961 = vperm.xlu1 %1643, %v2049_v53  }
 0x204   : > { %1651 = vset.pattern.permute.xlu0 %v1727_v20 }
 0x205   : > { %1009 = vperm.xlu0 %1651, %v2049_v53  }
 0x208   : > { %1645 = vset.pattern.permute.xlu1 %v1723_v13 }
 0x209   : > { %973 = vperm.xlu1 %1645, %v2049_v53  }
 0x20d   : > { %1656 = vset.pattern.permute.xlu0 %v1726_v19 }
 0x20e   : > { %1037 = vperm.xlu0 %1656, %v2051_v54  }
 0x211   : > { %1648 = vset.pattern.permute.xlu1 %v1728_v21 }
 0x212   : > { %989 = vperm.xlu1 %1648, %v2051_v54  }
 0x216   : > { %1661 = vset.pattern.permute.xlu0 %v1733_v26 }
 0x217   : > { %1069 = vperm.xlu0 %1661, %v2049_v53  }
 0x21a   : > { %v564_v4 = vpop.xlane.xlu1 %563  ;;  %1650 = vset.pattern.permute.xlu1 %v1731_v24 }
 0x21b   : > { %v566_v14 = vsub.f32 %v558_v49, %v564_v4  ;;  %1001 = vperm.xlu1 %1650, %v2051_v54  }
 0x21d   : > { %v569_v13 = vmul.f32 1.442695, %v566_v14 }
 0x21f   : > { %1684 = vpow2.f32 %v569_v13  ;;  %1666 = vset.pattern.permute.xlu0 %v1729_v22 }
 0x220   : > { %1097 = vperm.xlu0 %1666, %v2051_v54  }
 0x223   : > { %1653 = vset.pattern.permute.xlu1 %v1730_v23 }
 0x224   : > { %1021 = vperm.xlu1 %1653, %v2049_v53  }
 0x225   : > { %v2081_v1 = vpop.eup %1684 }
 0x226   : > { %v574_v12 = vsel %vm215_vm0, %v2081_v1, 0.0 }
 0x227   : > { %575 = vadd.xlane.f32.xlu2 %v574_v12 }
 0x228   : > { %1671 = vset.pattern.permute.xlu0 %v1737_v31 }
 0x229   : > { %1129 = vperm.xlu0 %1671, %v2049_v53  }
 0x22c   : > { %1655 = vset.pattern.permute.xlu1 %v1726_v19  ;;  %v2104_v19 = vpop.xlane.xlu0 %629 }
 0x22d   : > { %1033 = vperm.xlu1 %1655, %v2049_v53  }
 0x231   : > { %1676 = vset.pattern.permute.xlu0 %v1742_v36 }
 0x232   : > { %1157 = vperm.xlu0 %1676, %v2051_v54  }
 0x235   : > { %1658 = vset.pattern.permute.xlu1 %v1734_v28 }
 0x236   : > { %1049 = vperm.xlu1 %1658, %v2051_v54  }
 0x23e   : > { %1660 = vset.pattern.permute.xlu1 %v1736_v30 }
 0x23f   : > { %965 = vperm.xlu2 %1644, %v2051_v54   ;;  %1061 = vperm.xlu1 %1660, %v2051_v54  }
 0x247   : > { %1647 = vset.pattern.permute.xlu2 %v1728_v21  ;;  %1663 = vset.pattern.permute.xlu1 %v1735_v29 }
 0x248   : > { %985 = vperm.xlu2 %1647, %v2049_v53   ;;  %1081 = vperm.xlu1 %1663, %v2049_v53  }
 0x250   : > { %1649 = vset.pattern.permute.xlu2 %v1731_v24  ;;  %1665 = vset.pattern.permute.xlu1 %v1729_v22 }
 0x251   : > { %997 = vperm.xlu2 %1649, %v2049_v53   ;;  %1093 = vperm.xlu1 %1665, %v2049_v53  }
 0x252   : > { %v573_v57 = vpop.xlane.xlu0 %572 }
 0x253   : > { %1686 = vrcp.f32 %v573_v57 }
 0x259   : > { %v1687_v58 = vpop.eup %1686  ;;  %1652 = vset.pattern.permute.xlu2 %v1727_v20  ;;  %1668 = vset.pattern.permute.xlu1 %v1738_v32 }
 0x25a   : > { %v2113_v21 = vmul.f32 %v1687_v58, %v2045_v51  ;;  %1013 = vperm.xlu2 %1652, %v2051_v54   ;;  %1109 = vperm.xlu1 %1668, %v2051_v54  }
 0x25c   : > { %2916 = vst [vmem:[#allocation5_spill] sm:$0xff] %v2113_v21  ;;  %v639_v22 = vsel %vm305_vm1, %v2113_v21, 0.0  ;;  %v652_v20 = vsel %vm319_vm2, %v2113_v21, 0.0  ;;  %v691_v60 = vsel %vm361_vm5, %v2113_v21, 0.0  ;;  %v730_v63 = vsel %vm403_vm8, %v2113_v21, 0.0 }
 0x25d   : > { %v641_v24 = vsel %vm215_vm0, %v639_v22, 0.0  ;;  %v654_v59 = vsel %vm215_vm0, %v652_v20, 0.0  ;;  %v769_v40 = vsel %vm2903_vm11, %v2113_v21, 0.0  ;;  %v847_v7 = vsel %vm2901_vm13, %v2113_v21, 0.0 }
 0x25e   : > { %642 = vadd.xlane.f32.xlu0 %v641_v24  ;;  %v771_v2 = vsel %vm215_vm0, %v769_v40, 0.0  ;;  %v849_v8 = vsel %vm215_vm0, %v847_v7, 0.0  ;;  %v665_v11 = vsel %vm333_vm3, %v2113_v21, 0.0  ;;  %vm2919_vm13 = vcmp.eq.s32.totalorder %v1958_v0, 4294967289 }
 0x25f   : > { %vm2926_vm11 = vcmp.eq.s32.totalorder %v1958_v0, 4294967287 }
 0x262   : > { %1654 = vset.pattern.permute.xlu2 %v1730_v23  ;;  %1670 = vset.pattern.permute.xlu1 %v1740_v34  ;;  %v693_v23 = vsel %vm215_vm0, %v691_v60, 0.0 }
 0x263   : > { %1025 = vperm.xlu2 %1654, %v2051_v54   ;;  %1121 = vperm.xlu1 %1670, %v2051_v54  }
 0x265   : > { %v2240_v15 = vpop.permute.xlu0 %929 }
 0x266   : > { %655 = vadd.xlane.f32.xlu0 %v654_v59 }
 0x26b   : > { %1657 = vset.pattern.permute.xlu2 %v1734_v28  ;;  %1673 = vset.pattern.permute.xlu1 %v1739_v33  ;;  %v732_v28 = vsel %vm215_vm0, %v730_v63, 0.0 }
 0x26c   : > { %1045 = vperm.xlu2 %1657, %v2049_v53   ;;  %1141 = vperm.xlu1 %1673, %v2049_v53  }
 0x26e   : > { %694 = vadd.xlane.f32.xlu0 %v693_v23  ;;  %v2260_v60 = vpop.permute.xlu0 %977 }
 0x274   : > { %1659 = vset.pattern.permute.xlu2 %v1736_v30  ;;  %1675 = vset.pattern.permute.xlu1 %v1742_v36  ;;  %v808_v30 = vsel %vm2902_vm14, %v2113_v21, 0.0  ;;  %v906_v36 = vpop.permute.xlu1 %905  ;;  %vm2921_vm14 = vcmp.eq.s32.totalorder %v1958_v0, 4294967291 }
 0x275   : > { %1057 = vperm.xlu2 %1659, %v2049_v53   ;;  %1153 = vperm.xlu1 %1675, %v2049_v53   ;;  %v810_v6 = vsel %vm215_vm0, %v808_v30, 0.0  ;;  %v908_v41 = vsel %vm215_vm0, %v906_v36, 0 }
 0x276   : > { %733 = vadd.xlane.f32.xlu0 %v732_v28  ;;  %917 = vmatpush.bf16.xpose.msrb.mxu2 %v908_v41 }
 0x277   : > { %v2279_v7 = vpop.permute.xlu0 %1009 }
 0x27c   : > { %v2166_v9 = vpop.permute.xlu1 %900 }
 0x27d   : > { %1662 = vset.pattern.permute.xlu2 %v1733_v26  ;;  %v2158_v26 = vpop.permute.xlu2 %941 }
 0x27e   : > { %1073 = vperm.xlu2 %1662, %v2051_v54   ;;  %772 = vadd.xlane.f32.xlu0 %v771_v2 }
 0x284   : > { %v2172_v10 = vpop.permute.xlu1 %949 }
 0x286   : > { %1664 = vset.pattern.permute.xlu2 %v1735_v29  ;;  %811 = vadd.xlane.f32.xlu0 %v810_v6  ;;  %v2168_v29 = vpop.permute.xlu2 %953 }
 0x287   : > { %1085 = vperm.xlu2 %1664, %v2051_v54  }
 0x28c   : > { %v2191_v3 = vpop.permute.xlu1 %961 }
 0x28e   : > { %850 = vadd.xlane.f32.xlu0 %v849_v8 }
 0x28f   : > { %1667 = vset.pattern.permute.xlu2 %v1738_v32  ;;  %v667_v32 = vsel %vm215_vm0, %v665_v11, 0.0 }
 0x290   : > { %1105 = vperm.xlu2 %1667, %v2049_v53  }
 0x294   : > { %v2206_v43 = vpop.permute.xlu1 %973 }
 0x298   : > { %1669 = vset.pattern.permute.xlu2 %v1740_v34  ;;  %v704_v34 = vsel %vm375_vm6, %v2113_v21, 0.0 }
 0x299   : > { %1117 = vperm.xlu2 %1669, %v2049_v53   ;;  %v706_v27 = vsel %vm215_vm0, %v704_v34, 0.0 }
 0x29a   : > { %v576_v38 = vpop.xlane.xlu2 %575 }
 0x29b   : > { %1688 = vrcp.f32 %v576_v38 }
 0x29c   : > { %v2218_v47 = vpop.permute.xlu1 %989 }
 0x29f   : > { %668 = vadd.xlane.f32.xlu1 %v667_v32 }
 0x2a1   : > { %v1689_v16 = vpop.eup %1688  ;;  %1672 = vset.pattern.permute.xlu2 %v1737_v31 }
 0x2a2   : > { %v2180_v17 = vmul.f32 %v1689_v16, %v2081_v1  ;;  %1133 = vperm.xlu2 %1672, %v2051_v54   ;;  %v2238_v13 = vpop.permute.xlu2 %965 }
 0x2a4   : > { %2917 = vst [vmem:[#allocation6_spill] sm:$0xff] %v2180_v17  ;;  %v627_v18 = vsel %vm2918_vm12, %v2180_v17, 0.0  ;;  %v581_v25 = vpack.c.bf16 %v2180_v17, %v2113_v21  ;;  %v640_v35 = vsel %vm2919_vm13, %v2180_v17, 0.0  ;;  %vm2920_vm12 = vcmp.eq.s32.totalorder %v1877_v44, 1  ;;  %v2231_v53 = vpop.permute.xlu1 %1001 }
 0x2a5   : > { %v631_v31 = vsel %vm215_vm0, %v627_v18, 0.0  ;;  %v743_v37 = vsel %vm2920_vm12, %v2113_v21, 0.0  ;;  %v644_v39 = vsel %vm215_vm0, %v640_v35, 0.0  ;;  %vm2922_vm13 = vcmp.eq.s32.totalorder %v1877_v44, 4 }
 0x2a6   : > { %632 = vadd.xlane.f32.xlu0 %v631_v31  ;;  %1548 = vmatmul.msk.bf16.vlgmr.msra.gmra.mxu2 %vm215_vm0, %v581_v25  ;;  %v745_v42 = vsel %vm215_vm0, %v743_v37, 0.0  ;;  %v782_v45 = vsel %vm2922_vm13, %v2113_v21, 0.0  ;;  %vm2923_vm12 = vcmp.eq.s32.totalorder %v1958_v0, 4294967294  ;;  %vm2925_vm13 = vcmp.eq.s32.totalorder %v1958_v0, 1  ;;  %v2294_v25 = vpop.permute.xlu0 %1037 }
 0x2a7   : > { %707 = vadd.xlane.f32.xlu1 %v706_v27  ;;  %v784_v46 = vsel %vm215_vm0, %v782_v45, 0.0  ;;  %v705_v48 = vsel %vm2923_vm12, %v2180_v17, 0.0  ;;  %v783_v1 = vsel %vm460_vm9, %v2180_v17, 0.0  ;;  %vm2927_vm12 = vcmp.eq.s32.totalorder %v1958_v0, 4294967292 }
 0x2a8   : > { %v709_v51 = vsel %vm215_vm0, %v705_v48, 0.0  ;;  %v679_v12 = vsel %vm2927_vm12, %v2180_v17, 0.0  ;;  %v787_v58 = vsel %vm215_vm0, %v783_v1, 0.0  ;;  %v822_v59 = vsel %vm502_vm7, %v2180_v17, 0.0 }
 0x2a9   : > { %v683_v22 = vsel %vm215_vm0, %v679_v12, 0.0  ;;  %v826_v28 = vsel %vm215_vm0, %v822_v59, 0.0  ;;  %vm2931_vm12 = vcmp.eq.s32.totalorder %v1958_v0, 2  ;;  %v835_v37 = vsel %vm516_vm10, %v2180_v17, 0.0 }
 0x2aa   : > { %1674 = vset.pattern.permute.xlu2 %v1739_v33  ;;  %v666_v33 = vsel %vm2921_vm14, %v2180_v17, 0.0  ;;  %vm2924_vm14 = vcmp.eq.s32.totalorder %v1877_v44, 7  ;;  %v2255_v20 = vpop.permute.xlu2 %985  ;;  %v757_v41 = vsel %vm2931_vm12, %v2180_v17, 0.0  ;;  %vm2935_vm12 = vcmp.eq.s32.totalorder %v1877_v44, 8 }
 0x2ab   : > { %1145 = vperm.xlu2 %1674, %v2051_v54   ;;  %v670_v49 = vsel %vm215_vm0, %v666_v33, 0.0  ;;  %v821_v50 = vsel %vm2924_vm14, %v2113_v21, 0.0  ;;  %v614_v54 = vsel %vm2926_vm11, %v2180_v17, 0.0  ;;  %vm2928_vm11 = vcmp.eq.s32.totalorder %v1877_v44, 4294967292 }
 0x2ac   : > { %v823_v52 = vsel %vm215_vm0, %v821_v50, 0.0  ;;  %v618_v14 = vsel %vm215_vm0, %v614_v54, 0.0  ;;  %v2248_v57 = vpop.permute.xlu1 %1021  ;;  %v678_v24 = vsel %vm2928_vm11, %v2113_v21, 0.0  ;;  %vm2929_vm14 = vcmp.eq.s32.totalorder %v1958_v0, 4294967295 }
 0x2ad   : > { %v680_v23 = vsel %vm215_vm0, %v678_v24, 0.0  ;;  %v718_v63 = vsel %vm2929_vm14, %v2180_v17, 0.0  ;;  %v761_v8 = vsel %vm215_vm0, %v757_v41, 0.0  ;;  %vm2932_vm11 = vcmp.eq.s32.totalorder %v1877_v44, 2 }
 0x2ae   : > { %645 = vadd.xlane.f32.xlu0 %v644_v39  ;;  %v722_v40 = vsel %vm215_vm0, %v718_v63, 0.0  ;;  %v756_v38 = vsel %vm2932_vm11, %v2113_v21, 0.0  ;;  %vm2933_vm14 = vcmp.eq.s32.totalorder %v1958_v0, 5  ;;  %v839_v39 = vsel %vm215_vm0, %v835_v37, 0.0  ;;  %v2311_v45 = vpop.permute.xlu0 %1069 }
 0x2af   : > { %746 = vadd.xlane.f32.xlu1 %v745_v42  ;;  %v758_v32 = vsel %vm215_vm0, %v756_v38, 0.0  ;;  %v796_v16 = vsel %vm2933_vm14, %v2180_v17, 0.0  ;;  %v834_v33 = vsel %vm2935_vm12, %v2113_v21, 0.0  ;;  %vm2936_vm11 = vcmp.eq.s32.totalorder %v1958_v0, 4294967286 }
 0x2b0   : > { %v800_v18 = vsel %vm215_vm0, %v796_v16, 0.0  ;;  %v583_v48 = vsel %vm2936_vm11, %v2180_v17, 0.0  ;;  %vm2937_vm14 = vcmp.eq.s32.totalorder %v1958_v0, 4294967290  ;;  %vm2939_vm12 = vcmp.eq.s32.totalorder %v1958_v0, 0 }
 0x2b1   : > { %v653_v54 = vsel %vm2937_vm14, %v2180_v17, 0.0  ;;  %vm2940_vm11 = vcmp.eq.s32.totalorder %v1958_v0, 3  ;;  %vm2941_vm14 = vcmp.eq.s32.totalorder %v1958_v0, 6 }
 0x2b2   : > { %v2273_v36 = vpop.permute.xlu2 %997  ;;  %v809_v16 = vsel %vm2941_vm14, %v2180_v17, 0.0  ;;  %vm2948_vm14 = vcmp.eq.s32.totalorder %v1958_v0, 4294967288 }
 0x2b4   : > { %v2268_v2 = vpop.permute.xlu1 %1033 }
 0x2b6   : > { %671 = vadd.xlane.f32.xlu0 %v670_v49  ;;  %1550 = vmatmul.msk.bf16.vlgmr.msrb.gmra.mxu2 %vm215_vm0, %v1967_v5  ;;  %v744_v5 = vsel %vm2925_vm13, %v2180_v17, 0.0  ;;  %vm2930_vm13 = vcmp.eq.s32.totalorder %v1877_v44, 4294967295  ;;  %v836_v49 = vsel %vm215_vm0, %v834_v33, 0.0 }
 0x2b7   : > { %785 = vadd.xlane.f32.xlu1 %v784_v46  ;;  %v748_v4 = vsel %vm215_vm0, %v744_v5, 0.0  ;;  %v717_v30 = vsel %vm2930_vm13, %v2113_v21, 0.0  ;;  %vm2934_vm13 = vcmp.eq.s32.totalorder %v1877_v44, 5 }
 0x2b8   : > { %v719_v6 = vsel %vm215_vm0, %v717_v30, 0.0  ;;  %v795_v31 = vsel %vm2934_vm13, %v2113_v21, 0.0  ;;  %vm2938_vm13 = vcmp.eq.s32.totalorder %v1958_v0, 4294967293 }
 0x2b9   : > { %v797_v35 = vsel %vm215_vm0, %v795_v31, 0.0  ;;  %v692_v12 = vsel %vm2938_vm13, %v2180_v17, 0.0  ;;  %vm2945_vm13 = vcmp.eq.s32.totalorder %v1877_v44, 4294967292 }
 0x2ba   : > { %v2291_v34 = vpop.permute.xlu2 %1013 }
 0x2bc   : > { %v2285_v11 = vpop.permute.xlu1 %1049 }
 0x2be   : > { %710 = vadd.xlane.f32.xlu0 %v709_v51  ;;  %v2321_v51 = vpop.permute.xlu0 %1097 }
 0x2bf   : > { %824 = vadd.xlane.f32.xlu1 %v823_v52  ;;  %v587_v52 = vsel %vm215_vm0, %v583_v48, 0.0 }
 0x2c2   : > { %v2306_v42 = vpop.permute.xlu2 %1025 }
 0x2c4   : > { %v2299_v27 = vpop.permute.xlu1 %1061 }
 0x2c6   : > { %749 = vadd.xlane.f32.xlu0 %v748_v4  ;;  %v2332_v1 = vpop.permute.xlu0 %1129 }
 0x2c7   : > { %619 = vadd.xlane.f32.xlu1 %v618_v14  ;;  %v657_v14 = vsel %vm215_vm0, %v653_v54, 0.0 }
 0x2ca   : > { %v2319_v50 = vpop.permute.xlu2 %1045 }
 0x2cc   : > { %v2314_v46 = vpop.permute.xlu1 %1081 }
 0x2ce   : > { %788 = vadd.xlane.f32.xlu0 %v787_v58  ;;  %v2342_v59 = vpop.permute.xlu0 %1157 }
 0x2cf   : > { %684 = vadd.xlane.f32.xlu1 %v683_v22  ;;  %v696_v22 = vsel %vm215_vm0, %v692_v12, 0.0 }
 0x2d2   : > { %v2329_v4 = vpop.permute.xlu2 %1057 }
 0x2d4   : > { %681 = vadd.xlane.f32.xlu2 %v680_v23  ;;  %v2324_v5 = vpop.permute.xlu1 %1093  ;;  %v731_v23 = vsel %vm2939_vm12, %v2180_v17, 0.0  ;;  %vm2946_vm12 = vcmp.eq.s32.totalorder %v1958_v0, 4294967286 }
 0x2d6   : > { %827 = vadd.xlane.f32.xlu0 %v826_v28  ;;  %v735_v28 = vsel %vm215_vm0, %v731_v23, 0.0 }
 0x2d7   : > { %723 = vadd.xlane.f32.xlu1 %v722_v40  ;;  %v643_v40 = vpop.xlane.xlu0 %642 }
 0x2da   : > { %v2340_v24 = vpop.permute.xlu2 %1073 }
 0x2dc   : > { %720 = vadd.xlane.f32.xlu2 %v719_v6  ;;  %v2337_v58 = vpop.permute.xlu1 %1109  ;;  %v770_v6 = vsel %vm2940_vm11, %v2180_v17, 0.0  ;;  %vm2947_vm11 = vcmp.eq.s32.totalorder %v1958_v0, 4294967287 }
 0x2dd   : > { %v774_v41 = vsel %vm215_vm0, %v770_v6, 0.0 }
 0x2df   : > { %762 = vadd.xlane.f32.xlu1 %v761_v8  ;;  %v1559_v8 = vld [vmem:[%s2873_s3] sm:$0xff]  }
 0x2e2   : > { %v2350_v30 = vpop.permute.xlu2 %1085 }
 0x2e4   : > { %759 = vadd.xlane.f32.xlu2 %v758_v32  ;;  %v2347_v63 = vpop.permute.xlu1 %1121  ;;  %v1560_v32 = vunpack.c.l.bf16 %v1559_v8 }
 0x2e6   : > { %v2367_v37 = vperm.slane %v1560_v32, 0  ;;  %v2375_v48 = vperm.slane %v1560_v32, 2  ;;  %v2382_v12 = vperm.slane %v1560_v32, 3  ;;  %v2392_v61 = vperm.slane %v1560_v32, 5 }
 0x2e7   : > { %801 = vadd.xlane.f32.xlu1 %v800_v18  ;;  %v656_v18 = vpop.xlane.xlu0 %655 }
 0x2e8   : > { %2942 = vst [vmem:[#allocation7_spill] sm:$0xff] %v2367_v37 }
 0x2e9   : > { %2944 = vst [vmem:[#allocation9_spill] sm:$0xff] %v2375_v48 }
 0x2ea   : > { %v2364_v31 = vpop.permute.xlu2 %1105 }
 0x2ec   : > { %798 = vadd.xlane.f32.xlu2 %v797_v35  ;;  %v2359_v38 = vpop.permute.xlu1 %1141  ;;  %v813_v35 = vsel %vm215_vm0, %v809_v16, 0.0 }
 0x2ef   : > { %840 = vadd.xlane.f32.xlu1 %v839_v39  ;;  %v2369_v39 = vperm.slane %v1560_v32, 1  ;;  %v695_v23 = vpop.xlane.xlu0 %694 }
 0x2f1   : > { %2943 = vst [vmem:[#allocation8_spill] sm:$0xff] %v2369_v39 }
 0x2f4   : > { %837 = vadd.xlane.f32.xlu2 %v836_v49  ;;  %v2371_v33 = vpop.permute.xlu1 %1153  ;;  %v591_v49 = vmul.f32 %v2367_v37, %v2091_v55  ;;  %v635_v55 = vmul.f32 %v2375_v48, %v2104_v19 }
 0x2f7   : > { %v2398_v19 = vpop.xlane.xlu0 %733 }
 0x2fc   : > { %588 = vadd.xlane.f32.xlu2 %v587_v52  ;;  %v848_v52 = vsel %vm530_vm15, %v2180_v17, 0.0 }
 0x2fd   : > { %v852_v6 = vsel %vm215_vm0, %v848_v52, 0.0 }
 0x304   : > { %658 = vadd.xlane.f32.xlu2 %v657_v14  ;;  %v622_v14 = vmul.f32 %v2369_v39, %v2096_v56 }
 0x30c   : > { %697 = vadd.xlane.f32.xlu2 %v696_v22 }
 0x312   : > { %v669_v17 = vpop.xlane.xlu1 %668 }
 0x313   : > { %v674_v52 = vmul.f32 %v2392_v61, %v669_v17  ;;  %v980_v17 = vsel %vm333_vm3, %v2206_v43, 0.0 }
 0x314   : > { %736 = vadd.xlane.f32.xlu2 %v735_v28  ;;  %v2384_v28 = vpop.permute.xlu2 %1117 }
 0x31c   : > { %775 = vadd.xlane.f32.xlu2 %v774_v41  ;;  %v2389_v41 = vperm.slane %v1560_v32, 4  ;;  %v2400_v48 = vpop.permute.xlu2 %1133 }
 0x324   : > { %814 = vadd.xlane.f32.xlu2 %v813_v35  ;;  %v648_v35 = vmul.f32 %v2382_v12, %v643_v40  ;;  %v956_v40 = vsel %vm305_vm1, %v2172_v10, 0.0 }
 0x329   : > { %v608_v54 = vpop.f32.mrf.mxu2 }
 0x32a   : > { %v609_v22 = vadd.f32 %v608_v54, %v591_v49  ;;  %v661_v49 = vmul.f32 %v2389_v41, %v656_v18  ;;  %v968_v18 = vsel %vm319_vm2, %v2191_v3, 0.0  ;;  %v1004_v3 = vsel %vm361_vm5, %v2273_v36, 0.0 }
 0x32c   : > { %v624_v16 = vadd.f32 %v622_v14, %v609_v22  ;;  %853 = vadd.xlane.f32.xlu2 %v852_v6 }
 0x32e   : > { %v637_v56 = vadd.f32 %v635_v55, %v624_v16  ;;  %v992_v55 = vsel %vm2945_vm13, %v2255_v20, 0.0  ;;  %v2414_v16 = vpop.xlane.xlu0 %772  ;;  %v933_v20 = vsel %vm2947_vm11, %v2240_v15, 0.0  ;;  %vm2949_vm13 = vcmp.eq.s32.totalorder %v1877_v44, 4294967295 }
 0x32f   : > { %v1028_v36 = vsel %vm2949_vm13, %v2248_v57, 0.0  ;;  %vm2951_vm11 = vcmp.eq.s32.totalorder %v1958_v0, 4294967290  ;;  %vm2953_vm13 = vcmp.eq.s32.totalorder %v1958_v0, 4294967291 }
 0x330   : > { %v650_v54 = vadd.f32 %v648_v35, %v637_v56  ;;  %v2416_v35 = vpop.permute.xlu2 %1145  ;;  %v904_v56 = vsel %vm2946_vm12, %v2166_v9, 0.0  ;;  %v945_v9 = vsel %vm2948_vm14, %v2158_v26, 0.0  ;;  %vm2950_vm12 = vcmp.eq.s32.totalorder %v1958_v0, 4294967289 }
 0x331   : > { %v2395_v21 = vpop.f32.mrf.mxu2  ;;  %v1040_v26 = vsel %vm403_vm8, %v2268_v2, 0.0  ;;  %vm2952_vm14 = vcmp.eq.s32.totalorder %v1877_v44, 1 }
 0x332   : > { %v663_v39 = vadd.f32 %v661_v49, %v650_v54  ;;  %v708_v49 = vpop.xlane.xlu1 %707 }
 0x334   : > { %v676_v37 = vadd.f32 %v674_v52, %v663_v39 }
 0x339   : > { %v919_v14 = vpop.f32.mrf.mxu2 }
 0x33a   : > { %v958_v22 = vadd.f32 %v956_v40, %v919_v14  ;;  %v1016_v40 = vsel %vm375_vm6, %v2279_v7, 0.0  ;;  %v957_v7 = vsel %vm2950_vm12, %v2168_v29, 0.0  ;;  %v1052_v29 = vsel %vm2952_vm14, %v2319_v50, 0.0 }
 0x33b   : > { %vm2954_vm12 = vcmp.eq.s32.totalorder %v1877_v44, 2  ;;  %vm2956_vm14 = vcmp.eq.s32.totalorder %v1877_v44, 3 }
 0x33c   : > { %v970_v6 = vadd.f32 %v968_v18, %v958_v22  ;;  %v2436_v18 = vperm.slane %v1560_v32, 7 }
 0x33e   : > { %v982_v39 = vadd.f32 %v980_v17, %v970_v6  ;;  %v2438_v6 = vunpack.c.h.bf16 %v1559_v8  ;;  %v700_v2 = vmul.f32 %v2436_v18, %v695_v23 }
 0x340   : > { %v994_v10 = vadd.f32 %v992_v55, %v982_v39  ;;  %v2440_v39 = vperm.slane %v1560_v32, 6  ;;  %v969_v32 = vsel %vm2951_vm11, %v2238_v13, 0.0  ;;  %v747_v13 = vpop.xlane.xlu1 %746  ;;  %vm2955_vm11 = vcmp.eq.s32.totalorder %v1958_v0, 4294967292 }
 0x341   : > { %v921_v43 = vpop.f32.mrf.mxu2  ;;  %v993_v23 = vsel %vm2955_vm11, %v2218_v47, 0.0  ;;  %vm2959_vm11 = vcmp.eq.s32.totalorder %v1958_v0, 4294967294 }
 0x342   : > { %v1006_v54 = vadd.f32 %v1004_v3, %v994_v10  ;;  %v922_v52 = vadd.f32 %v921_v43, %v904_v56  ;;  %v2449_v10 = vperm.slane %v2438_v6, 0  ;;  %v2458_v3 = vpop.xlane.xlu0 %811 }
 0x344   : > { %v1018_v14 = vadd.f32 %v1016_v40, %v1006_v54  ;;  %v935_v22 = vadd.f32 %v933_v20, %v922_v52  ;;  %v981_v20 = vsel %vm2953_vm13, %v2260_v60, 0.0  ;;  %v1064_v40 = vsel %vm2954_vm12, %v2329_v4, 0.0 }
 0x345   : > { %v2475_v60 = vperm.slane %v2438_v6, 2  ;;  %v2478_v4 = vperm.slane %v2438_v6, 1  ;;  %vm2957_vm13 = vcmp.eq.s32.totalorder %v1958_v0, 4294967293  ;;  %vm2958_vm12 = vcmp.eq.s32.totalorder %v1877_v44, 4 }
 0x346   : > { %v1030_v17 = vadd.f32 %v1028_v36, %v1018_v14  ;;  %v947_v15 = vadd.f32 %v945_v9, %v935_v22  ;;  %v713_v14 = vmul.f32 %v2449_v10, %v708_v49  ;;  %v1088_v47 = vsel %vm2958_vm12, %v2314_v46, 0.0 }
 0x347   : > { %v682_v55 = vpop.xlane.xlu2 %681  ;;  %vm2962_vm12 = vcmp.eq.s32.totalorder %v1877_v44, 6 }
 0x348   : > { %v1042_v57 = vadd.f32 %v1040_v26, %v1030_v17  ;;  %v959_v56 = vadd.f32 %v957_v7, %v947_v15  ;;  %v687_v8 = vmul.f32 %v2440_v39, %v682_v55  ;;  %v1005_v15 = vsel %vm2957_vm13, %v2231_v53, 0.0 }
 0x349   : > { %vm2961_vm13 = vcmp.eq.s32.totalorder %v1958_v0, 4294967295 }
 0x34a   : > { %v1054_v43 = vadd.f32 %v1052_v29, %v1042_v57  ;;  %v971_v54 = vadd.f32 %v969_v32, %v959_v56  ;;  %v689_v52 = vadd.f32 %v687_v8, %v676_v37  ;;  %v1076_v37 = vsel %vm2956_vm14, %v2311_v45, 0.0 }
 0x34b   : > { %v2487_v45 = vperm.slane %v2438_v6, 3  ;;  %v1017_v56 = vsel %vm2959_vm11, %v2291_v34, 0.0  ;;  %vm2960_vm14 = vcmp.eq.s32.totalorder %v1877_v44, 5  ;;  %v739_v8 = vmul.f32 %v2475_v60, %v2398_v19 }
 0x34c   : > { %v1066_v22 = vadd.f32 %v1064_v40, %v1054_v43  ;;  %v983_v50 = vadd.f32 %v981_v20, %v971_v54  ;;  %v702_v9 = vadd.f32 %v700_v2, %v689_v52  ;;  %v1100_v53 = vsel %vm2960_vm14, %v2324_v5, 0.0  ;;  %v2504_v54 = vpop.xlane.xlu0 %850 }
 0x34d   : > { %v1029_v2 = vsel %vm2961_vm13, %v2306_v42, 0.0  ;;  %v1112_v43 = vsel %vm2962_vm12, %v2364_v31, 0.0  ;;  %v752_v34 = vmul.f32 %v2487_v45, %v747_v13  ;;  %vm2963_vm11 = vcmp.eq.s32.totalorder %v1958_v0, 0  ;;  %v196_v31 = vld [vmem:[%s2873_s3 + $0x8] sm:$0x7] }
 0x34e   : > { %v995_v36 = vadd.f32 %v993_v23, %v983_v50  ;;  %v715_v17 = vadd.f32 %v713_v14, %v702_v9  ;;  %v1078_v49 = vadd.f32 %v1076_v37, %v1066_v22  ;;  %v1041_v19 = vsel %vm2963_vm11, %v2294_v25, 0.0  ;;  %v786_v14 = vpop.xlane.xlu1 %785 }
 0x34f   : > { %v721_v7 = vpop.xlane.xlu2 %720  ;;  %v2511_v40 = vperm.slane %v2438_v6, 5  ;;  %vm2964_vm14 = vcmp.eq.s32.totalorder %v1877_v44, 7  ;;  %v2520_v22 = vperm.slane %v2438_v6, 4  ;;  %vm2965_vm13 = vcmp.eq.s32.totalorder %v1877_v44, 8 }
 0x350   : > { %v1007_v26 = vadd.f32 %v1005_v15, %v995_v36  ;;  %v726_v55 = vmul.f32 %v2478_v4, %v721_v7  ;;  %v1090_v57 = vadd.f32 %v1088_v47, %v1078_v49  ;;  %v1124_v42 = vsel %vm2964_vm14, %v2384_v28, 0.0 }
 0x351   : > { %v1136_v25 = vsel %vm2965_vm13, %v2332_v1, 0.0  ;;  %vm2966_vm12 = vcmp.eq.s32.totalorder %v1958_v0, 1  ;;  %v2529_v37 = vperm.slane %v2438_v6, 6  ;;  %vm2967_vm11 = vcmp.eq.s32.totalorder %v1958_v0, 2 }
 0x352   : > { %v1019_v46 = vadd.f32 %v1017_v56, %v1007_v26  ;;  %v728_v32 = vadd.f32 %v726_v55, %v715_v17  ;;  %v1102_v29 = vadd.f32 %v1100_v53, %v1090_v57  ;;  %v1053_v23 = vsel %vm2966_vm12, %v2285_v11, 0.0 }
 0x353   : > { %v1065_v15 = vsel %vm2967_vm11, %v2299_v27, 0.0  ;;  %vm2968_vm14 = vcmp.eq.s32.totalorder %v1877_v44, 9  ;;  %v2538_v47 = vunpack.c.l.bf16 %v196_v31  ;;  %v778_v11 = vmul.f32 %v2511_v40, %v2414_v16 }
 0x354   : > { %v1031_v52 = vadd.f32 %v1029_v2, %v1019_v46  ;;  %v741_v5 = vadd.f32 %v739_v8, %v728_v32  ;;  %v1114_v20 = vadd.f32 %v1112_v43, %v1102_v29  ;;  %v1148_v1 = vsel %vm2968_vm14, %v2359_v38, 0.0  ;;  %v633_v56 = vpop.xlane.xlu0 %632 }
 0x355   : > { %vm2969_vm13 = vcmp.eq.s32.totalorder %v1958_v0, 3  ;;  %vm2970_vm12 = vcmp.eq.s32.totalorder %v1877_v44, 10  ;;  %v791_v53 = vmul.f32 %v2529_v37, %v786_v14  ;;  %v1089_v16 = vsel %vm460_vm9, %v2350_v30, 0.0 }
 0x356   : > { %v1043_v13 = vadd.f32 %v1041_v19, %v1031_v52  ;;  %v754_v50 = vadd.f32 %v752_v34, %v741_v5  ;;  %v1126_v9 = vadd.f32 %v1124_v42, %v1114_v20  ;;  %v1077_v57 = vsel %vm2969_vm13, %v2340_v24, 0.0  ;;  %v825_v34 = vpop.xlane.xlu1 %824 }
 0x357   : > { %v760_v28 = vpop.xlane.xlu2 %759  ;;  %v1160_v27 = vsel %vm2970_vm12, %v2371_v33, 0.0  ;;  %v2553_v32 = vperm.slane %v2538_v47, 0  ;;  %v2556_v29 = vperm.slane %v2438_v6, 7  ;;  %vm2971_vm11 = vcmp.eq.s32.totalorder %v1958_v0, 5 }
 0x358   : > { %v765_v36 = vmul.f32 %v2520_v22, %v760_v28  ;;  %v1138_v17 = vadd.f32 %v1136_v25, %v1126_v9  ;;  %v1055_v49 = vadd.f32 %v1053_v23, %v1043_v13  ;;  %v1101_v43 = vsel %vm2971_vm11, %v2321_v51, 0.0 }
 0x359   : > { %v2568_v5 = vperm.slane %v2538_v47, 1  ;;  %vm2972_vm14 = vcmp.eq.s32.totalorder %v1958_v0, 6  ;;  %v817_v42 = vmul.f32 %v2553_v32, %v2458_v3  ;;  %v1125_v31 = vsel %vm502_vm7, %v2347_v63, 0.0 }
 0x35a   : > { %v767_v7 = vadd.f32 %v765_v36, %v754_v50  ;;  %v1150_v26 = vadd.f32 %v1148_v1, %v1138_v17  ;;  %v1067_v55 = vadd.f32 %v1065_v15, %v1055_v49  ;;  %v1113_v19 = vsel %vm2972_vm14, %v2337_v58, 0.0 }
 0x35b   : > { %v830_v13 = vmul.f32 %v2568_v5, %v825_v34  ;;  %v1137_v25 = vsel %vm516_vm10, %v2400_v48, 0.0  ;;  %v2584_v58 = vperm.slane %v2538_v47, 3  ;;  %v2587_v3 = vperm.slane %v2538_v47, 2 }
 0x35c   : > { %v780_v38 = vadd.f32 %v778_v11, %v767_v7  ;;  %v1162_v8 = vadd.f32 %v1160_v27, %v1150_v26  ;;  %v1079_v46 = vadd.f32 %v1077_v57, %v1067_v55  ;;  %v646_v23 = vpop.xlane.xlu0 %645  ;;  %v1149_v63 = vsel %vm530_vm15, %v2416_v35, 0.0 }
 0x35d   : > { %vm2973_vm13 = vcmp.eq.s32.totalorder %v1958_v0, 10  ;;  %v856_v11 = vmul.f32 %v2584_v58, %v2504_v54  ;;  %vm2981_vm11 = vcmp.eq.s32.totalorder %v1877_v44, 2  ;;  %vm2985_vm14 = vcmp.eq.s32.totalorder %v1877_v44, 8 }
 0x35e   : > { %v793_v24 = vadd.f32 %v791_v53, %v780_v38  ;;  %v2560_v33 = vsel %vm1953_vm4, %v1162_v8, -10000.0  ;;  %v1091_v2 = vadd.f32 %v1089_v16, %v1079_v46  ;;  %v1161_v48 = vsel %vm2973_vm13, %v2342_v59, 0.0  ;;  %v620_v1 = vpop.xlane.xlu1 %619  ;;  %v2974_v38 = vld [vmem:[#allocation7_spill] sm:$0xff]  ;;  %v2975_v8 = vld [vmem:[#allocation8_spill] sm:$0xff] }
 0x35f   : > { %v799_v52 = vpop.xlane.xlu2 %798  ;;  %v1166_v30 = vsel %vm215_vm0, %v2560_v33, -inf  ;;  %v623_v46 = vmul.f32 %v2975_v8, %v620_v1  ;;  %vm2986_vm13 = vcmp.eq.s32.totalorder %v1877_v44, 7 }
 0x360   : > { %v804_v6 = vmul.f32 %v2556_v29, %v799_v52  ;;  %1167 = vmax.xlane.f32.xlu2 %v1166_v30  ;;  %v1103_v20 = vadd.f32 %v1101_v43, %v1091_v2  ;;  %v649_v43 = vmul.f32 %v2382_v12, %v646_v23 }
 0x362   : > { %v806_v51 = vadd.f32 %v804_v6, %v793_v24  ;;  %v1115_v14 = vadd.f32 %v1113_v19, %v1103_v20  ;;  %v2976_v24 = vld [vmem:[#allocation9_spill] sm:$0xff] }
 0x363   : > { %v636_v2 = vmul.f32 %v2976_v24, %v633_v56 }
 0x364   : > { %v819_v50 = vadd.f32 %v817_v42, %v806_v51  ;;  %v1127_v9 = vadd.f32 %v1125_v31, %v1115_v14  ;;  %v672_v27 = vpop.xlane.xlu0 %671 }
 0x365   : > { %v675_v19 = vmul.f32 %v2392_v61, %v672_v27 }
 0x366   : > { %v832_v28 = vadd.f32 %v830_v13, %v819_v50  ;;  %v1139_v36 = vadd.f32 %v1137_v25, %v1127_v9  ;;  %v685_v16 = vpop.xlane.xlu1 %684 }
 0x367   : > { %v838_v17 = vpop.xlane.xlu2 %837  ;;  %v688_v51 = vmul.f32 %v2440_v39, %v685_v16 }
 0x368   : > { %v843_v49 = vmul.f32 %v2587_v3, %v838_v17  ;;  %v1151_v15 = vadd.f32 %v1149_v63, %v1139_v36 }
 0x36a   : > { %v845_v7 = vadd.f32 %v843_v49, %v832_v28  ;;  %v1163_v26 = vadd.f32 %v1161_v48, %v1151_v15  ;;  %v1698_v49 = vld [vmem:[%s1802_s26] sm:$0xff] }
 0x36c   : > { %v2600_v55 = vsel %vm1953_vm4, %v1163_v26, -10000.0  ;;  %v2602_v57 = vadd.f32 %v856_v11, %v845_v7  ;;  %v711_v20 = vpop.xlane.xlu0 %710  ;;  %vm2979_vm4 = vmmov %vm2970_vm12  ;;  %vm2980_vm12 = vcmp.eq.s32.totalorder %v1877_v44, 4294967295 }
 0x36d   : > { %v1169_v35 = vsel %vm215_vm0, %v2600_v55, -inf  ;;  %v714_v50 = vmul.f32 %v2449_v10, %v711_v20 }
 0x36e   : > { %1170 = vmax.xlane.f32.xlu1 %v1169_v35 }
 0x36f   : > { %v589_v53 = vpop.xlane.xlu2 %588 }
 0x370   : > { %v592_v59 = vmul.f32 %v2974_v38, %v589_v53 }
 0x372   : > { %v611_v54 = vadd.f32 %v2395_v21, %v592_v59  ;;  %v724_v21 = vpop.xlane.xlu1 %723 }
 0x373   : > { %v727_v23 = vmul.f32 %v2478_v4, %v724_v21 }
 0x374   : > { %v625_v62 = vadd.f32 %v623_v46, %v611_v54  ;;  %v750_v25 = vpop.xlane.xlu0 %749 }
 0x375   : > { %v753_v48 = vmul.f32 %v2487_v45, %v750_v25 }
 0x376   : > { %v638_v34 = vadd.f32 %v636_v2, %v625_v62 }
 0x377   : > { %v659_v52 = vpop.xlane.xlu2 %658 }
 0x378   : > { %v651_v30 = vadd.f32 %v649_v43, %v638_v34  ;;  %v662_v6 = vmul.f32 %v2389_v41, %v659_v52 }
 0x37a   : > { %v664_v42 = vadd.f32 %v662_v6, %v651_v30  ;;  %v763_v63 = vpop.xlane.xlu1 %762 }
 0x37b   : > { %v766_v11 = vmul.f32 %v2520_v22, %v763_v63 }
 0x37c   : > { %v677_v14 = vadd.f32 %v675_v19, %v664_v42  ;;  %v789_v26 = vpop.xlane.xlu0 %788 }
 0x37d   : > { %v792_v46 = vmul.f32 %v2529_v37, %v789_v26 }
 0x37e   : > { %v690_v31 = vadd.f32 %v688_v51, %v677_v14 }
 0x37f   : > { %v698_v13 = vpop.xlane.xlu2 %697 }
 0x380   : > { %v701_v56 = vmul.f32 %v2436_v18, %v698_v13  ;;  %v2977_v13 = vmov 0.0  }
 0x382   : > { %v703_v9 = vadd.f32 %v701_v56, %v690_v31  ;;  %v802_v59 = vpop.xlane.xlu1 %801 }
 0x383   : > { %v805_v16 = vmul.f32 %v2556_v29, %v802_v59 }
 0x384   : > { %v716_v28 = vadd.f32 %v714_v50, %v703_v9  ;;  %v828_v43 = vpop.xlane.xlu0 %827 }
 0x385   : > { %v831_v30 = vmul.f32 %v2568_v5, %v828_v43 }
 0x386   : > { %v729_v36 = vadd.f32 %v727_v23, %v716_v28 }
 0x387   : > { %v737_v17 = vpop.xlane.xlu2 %736  ;;  %1199 = vrot.lane.b32.xlu1 %v1698_v49, %s1748_s12 }
 0x388   : > { %v740_v15 = vmul.f32 %v2475_v60, %v737_v17 }
 0x38a   : > { %v742_v1 = vadd.f32 %v740_v15, %v729_v36  ;;  %v841_v20 = vpop.xlane.xlu1 %840  ;;  %v2978_v15 = vld [vmem:[#allocation5_spill] sm:$0xff] }
 0x38b   : > { %v844_v42 = vmul.f32 %v2587_v3, %v841_v20 }
 0x38c   : > { %v755_v7 = vadd.f32 %v753_v48, %v742_v1  ;;  %v860_v48 = vsel %vm2979_vm4, %v2978_v15, 0.0  ;;  %vm2988_vm4 = vcmp.eq.s32.totalorder %v1958_v0, 4294967293 }
 0x38e   : > { %v768_v35 = vadd.f32 %v766_v11, %v755_v7 }
 0x38f   : > { %v776_v27 = vpop.xlane.xlu2 %775 }
 0x390   : > { %v779_v53 = vmul.f32 %v2511_v40, %v776_v27 }
 0x392   : > { %v781_v54 = vadd.f32 %v779_v53, %v768_v35 }
 0x394   : > { %v794_v2 = vadd.f32 %v792_v46, %v781_v54 }
 0x396   : > { %v807_v62 = vadd.f32 %v805_v16, %v794_v2 }
 0x397   : > { %v815_v34 = vpop.xlane.xlu2 %814 }
 0x398   : > { %v818_v52 = vmul.f32 %v2553_v32, %v815_v34 }
 0x39a   : > { %v820_v6 = vadd.f32 %v818_v52, %v807_v62  ;;  %v2667_v52 = vperm.slane %v2538_v47, 4 }
 0x39c   : > { %v833_v19 = vadd.f32 %v831_v30, %v820_v6 }
 0x39e   : > { %v846_v14 = vadd.f32 %v844_v42, %v833_v19 }
 0x39f   : > { %v854_v51 = vpop.xlane.xlu2 %853 }
 0x3a0   : > { %v857_v21 = vmul.f32 %v2584_v58, %v854_v51 }
 0x3a2   : > { %v2628_v31 = vadd.f32 %v857_v21, %v846_v14 }
 0x3b1   : > { %1234 = vadd.xlane.f32.xlu1 %v2977_v13 }
 0x3d3   : > { %v1168_v56 = vpop.xlane.xlu2 %1167 }
 0x3d4   : > { %v1172_v50 = vsub.f32 %v2560_v33, %v1168_v56  ;;  %v862_v33 = vsel %vm215_vm0, %v860_v48, 0.0 }
 0x3d6   : > { %v1174_v9 = vmul.f32 1.442695, %v1172_v50 }
 0x3d8   : > { %1690 = vpow2.f32 %v1174_v9 }
 0x3de   : > { %v1691_v25 = vpop.eup %1690 }
 0x3df   : > { %v1178_v23 = vsel %vm215_vm0, %v1691_v25, 0.0 }
 0x3e0   : > { %1179 = vadd.xlane.f32.xlu0 %v1178_v23 }
 0x3e1   : > { %v1171_v28 = vpop.xlane.xlu1 %1170 }
 0x3e2   : > { %v1173_v36 = vsub.f32 %v2600_v55, %v1171_v28 }
 0x3e4   : > { %v1176_v63 = vmul.f32 1.442695, %v1173_v36 }
 0x3e6   : > { %1692 = vpow2.f32 %v1176_v63 }
 0x3ec   : > { %v1693_v17 = vpop.eup %1692 }
 0x3ed   : > { %v1181_v49 = vsel %vm215_vm0, %v1693_v17, 0.0 }
 0x3ee   : > { %1182 = vadd.xlane.f32.xlu2 %v1181_v49 }
 0x3f6   : > { %863 = vadd.xlane.f32.xlu2 %v862_v33 }
 0x3f9   : > { %v1200_v1 = vpop.permute.xlu1 %1199 }
 0x3fa   : > { %1212 = vmatpush.bf16.msrb.mxu1 %v1200_v1 }
 0x3fe   : > { %1192 = vadd.xlane.f32.xlu2 %v2977_v13 }
 0x406   : > { %1222 = vadd.xlane.f32.xlu2 %v2977_v13 }
 0x453   : > { %v1180_v55 = vpop.xlane.xlu0 %1179 }
 0x454   : > { %1694 = vrcp.f32 %v1180_v55 }
 0x45a   : > { %v1695_v11 = vpop.eup %1694 }
 0x45b   : > { %v2641_v7 = vmul.f32 %v1695_v11, %v1691_v25 }
 0x45d   : > { %v1315_v26 = vsel %vm2980_vm12, %v2641_v7, 0.0  ;;  %v1303_v35 = vsel %vm375_vm6, %v2641_v7, 0.0  ;;  %v1243_v27 = vsel %vm305_vm1, %v2641_v7, 0.0  ;;  %v1351_v16 = vsel %vm2981_vm11, %v2641_v7, 0.0 }
 0x45e   : > { %v1317_v53 = vsel %vm215_vm0, %v1315_v26, 0.0  ;;  %v1305_v59 = vsel %vm215_vm0, %v1303_v35, 0.0  ;;  %v1245_v46 = vsel %vm215_vm0, %v1243_v27, 0.0  ;;  %vm2982_vm6 = vcmp.eq.s32.totalorder %v1877_v44, 1 }
 0x45f   : > { %1318 = vadd.xlane.f32.xlu1 %v1317_v53  ;;  %1306 = vadd.xlane.f32.xlu2 %v1305_v59  ;;  %v1339_v2 = vsel %vm2982_vm6, %v2641_v7, 0.0  ;;  %v1255_v62 = vsel %vm319_vm2, %v2641_v7, 0.0  ;;  %v1353_v43 = vsel %vm215_vm0, %v1351_v16, 0.0  ;;  %vm2983_vm1 = vcmp.eq.s32.totalorder %v1877_v44, 5 }
 0x460   : > { %1246 = vadd.xlane.f32.xlu0 %v1245_v46  ;;  %v1341_v34 = vsel %vm215_vm0, %v1339_v2, 0.0  ;;  %v1257_v30 = vsel %vm215_vm0, %v1255_v62, 0.0  ;;  %v1387_v14 = vsel %vm2983_vm1, %v2641_v7, 0.0  ;;  %vm2984_vm2 = vcmp.eq.s32.totalorder %v1877_v44, 4 }
 0x461   : > { %v1183_v54 = vpop.xlane.xlu2 %1182  ;;  %v1375_v47 = vsel %vm2984_vm2, %v2641_v7, 0.0  ;;  %v1267_v13 = vsel %vm333_vm3, %v2641_v7, 0.0  ;;  %v1389_v56 = vsel %vm215_vm0, %v1387_v14, 0.0  ;;  %v1411_v25 = vsel %vm2986_vm13, %v2641_v7, 0.0 }
 0x462   : > { %1696 = vrcp.f32 %v1183_v54  ;;  %v1377_v50 = vsel %vm215_vm0, %v1375_v47, 0.0  ;;  %v1269_v9 = vsel %vm215_vm0, %v1267_v13, 0.0  ;;  %vm2987_vm3 = vcmp.eq.s32.totalorder %v1877_v44, 4294967292 }
 0x463   : > { %v1279_v23 = vsel %vm2987_vm3, %v2641_v7, 0.0  ;;  %v1413_v36 = vsel %vm215_vm0, %v1411_v25, 0.0  ;;  %vm2989_vm12 = vcmp.eq.s32.totalorder %v1958_v0, 4294967288  ;;  %v1291_v15 = vsel %vm361_vm5, %v2641_v7, 0.0 }
 0x464   : > { %v1281_v63 = vsel %vm215_vm0, %v1279_v23, 0.0  ;;  %v1293_v1 = vsel %vm215_vm0, %v1291_v15, 0.0  ;;  %vm2990_vm11 = vcmp.eq.s32.totalorder %v1958_v0, 0  ;;  %vm2991_vm6 = vcmp.eq.s32.totalorder %v1958_v0, 4294967289 }
 0x465   : > { %v1327_v26 = vsel %vm403_vm8, %v2641_v7, 0.0  ;;  %vm2992_vm5 = vcmp.eq.s32.totalorder %v1958_v0, 3  ;;  %vm2993_vm1 = vcmp.eq.s32.totalorder %v1958_v0, 4294967290  ;;  %vm2994_vm8 = vcmp.eq.s32.totalorder %v1877_v44, 3 }
 0x466   : > { %v1329_v53 = vsel %vm215_vm0, %v1327_v26, 0.0  ;;  %v1363_v54 = vsel %vm2994_vm8, %v2641_v7, 0.0  ;;  %vm2995_vm2 = vcmp.eq.s32.totalorder %v1958_v0, 6  ;;  %vm2997_vm13 = vcmp.eq.s32.totalorder %v1877_v44, 6 }
 0x467   : > { %1354 = vadd.xlane.f32.xlu1 %v1353_v43  ;;  %1342 = vadd.xlane.f32.xlu2 %v1341_v34  ;;  %v1365_v62 = vsel %vm215_vm0, %v1363_v54, 0.0  ;;  %vm2998_vm3 = vcmp.eq.s32.totalorder %v1958_v0, 4294967292  ;;  %vm3007_vm8 = vcmp.eq.s32.totalorder %v1958_v0, 4294967294 }
 0x468   : > { %v1697_v6 = vpop.eup %1696  ;;  %1258 = vadd.xlane.f32.xlu0 %v1257_v30  ;;  %v1399_v30 = vsel %vm2997_vm13, %v2641_v7, 0.0 }
 0x469   : > { %v2670_v20 = vmul.f32 %v1697_v6, %v1693_v17  ;;  %v864_v19 = vpop.xlane.xlu2 %863 }
 0x46a   : > { %v869_v42 = vmul.f32 %v2667_v52, %v864_v19 }
 0x46b   : > { %v1188_v51 = vpack.c.bf16 %v2670_v20, %v2641_v7  ;;  %v1292_v17 = vsel %vm2988_vm4, %v2670_v20, 0.0  ;;  %v1232_v49 = vsel %vm2989_vm12, %v2670_v20, 0.0  ;;  %v1328_v55 = vsel %vm2990_vm11, %v2670_v20, 0.0 }
 0x46c   : > { %v2682_v21 = vadd.f32 %v869_v42, %v2602_v57  ;;  %v1423_v57 = vsel %vm2985_vm14, %v2641_v7, 0.0  ;;  %v1296_v48 = vsel %vm215_vm0, %v1292_v17, 0.0  ;;  %v1236_v33 = vsel %vm215_vm0, %v1232_v49, 0.0 }
 0x46d   : > { %1551 = vmatmul.msk.bf16.vlgmr.msrb.gmra.mxu1 %vm215_vm0, %v1188_v51  ;;  %v1425_v28 = vsel %vm215_vm0, %v1423_v57, 0.0  ;;  %v1244_v11 = vsel %vm2991_vm6, %v2670_v20, 0.0  ;;  %v1332_v35 = vsel %vm215_vm0, %v1328_v55, 0.0  ;;  %v1364_v59 = vsel %vm2992_vm5, %v2670_v20, 0.0 }
 0x46e   : > { %v1248_v27 = vsel %vm215_vm0, %v1244_v11, 0.0  ;;  %v1256_v46 = vsel %vm2993_vm1, %v2670_v20, 0.0  ;;  %v1368_v16 = vsel %vm215_vm0, %v1364_v59, 0.0  ;;  %v1400_v43 = vsel %vm2995_vm2, %v2670_v20, 0.0 }
 0x46f   : > { %1390 = vadd.xlane.f32.xlu1 %v1389_v56  ;;  %1378 = vadd.xlane.f32.xlu2 %v1377_v50  ;;  %v1260_v2 = vsel %vm215_vm0, %v1256_v46, 0.0  ;;  %vm2996_vm14 = vcmp.eq.s32.totalorder %v1958_v0, 4294967291  ;;  %v1404_v6 = vsel %vm215_vm0, %v1400_v43, 0.0  ;;  %v1401_v42 = vsel %vm215_vm0, %v1399_v30, 0.0 }
 0x470   : > { %1270 = vadd.xlane.f32.xlu0 %v1269_v9  ;;  %v1268_v34 = vsel %vm2996_vm14, %v2670_v20, 0.0  ;;  %v1436_v51 = vsel %vm530_vm15, %v2670_v20, 0.0  ;;  %v1280_v14 = vsel %vm2998_vm3, %v2670_v20, 0.0  ;;  %vm2999_vm4 = vcmp.eq.s32.totalorder %v1877_v44, 9  ;;  %v3000_v9 = vld [vmem:[#allocation6_spill] sm:$0xff] }
 0x471   : > { %v1272_v19 = vsel %vm215_vm0, %v1268_v34, 0.0  ;;  %v1435_v47 = vsel %vm2999_vm4, %v2641_v7, 0.0  ;;  %v1440_v13 = vsel %vm215_vm0, %v1436_v51, 0.0  ;;  %v1284_v56 = vsel %vm215_vm0, %v1280_v14, 0.0 }
 0x472   : > { %v1437_v50 = vsel %vm215_vm0, %v1435_v47, 0.0  ;;  %vm3001_vm15 = vcmp.eq.s32.totalorder %v1958_v0, 10  ;;  %vm3002_vm12 = vcmp.eq.s32.totalorder %v1958_v0, 4294967295  ;;  %vm3003_vm11 = vcmp.eq.s32.totalorder %v1958_v0, 4294967286  ;;  %v1235_v47 = vpop.xlane.xlu1 %1234 }
 0x473   : > { %v861_v57 = vsel %vm3001_vm15, %v3000_v9, 0.0  ;;  %v1316_v25 = vsel %vm3002_vm12, %v2670_v20, 0.0  ;;  %v1190_v23 = vsel %vm3003_vm11, %v2670_v20, 0.0  ;;  %vm3004_vm6 = vcmp.eq.s32.totalorder %v1958_v0, 2 }
 0x474   : > { %v1352_v17 = vsel %vm3004_vm6, %v2670_v20, 0.0  ;;  %vm3005_vm5 = vcmp.eq.s32.totalorder %v1958_v0, 4294967287  ;;  %vm3006_vm1 = vcmp.eq.s32.totalorder %v1958_v0, 5  ;;  %v1424_v26 = vsel %vm516_vm10, %v2670_v20, 0.0  ;;  %vm3010_vm10 = vmmov %vm3001_vm15 }
 0x475   : > { %v1220_v49 = vsel %vm3005_vm5, %v2670_v20, 0.0  ;;  %v1356_v15 = vsel %vm215_vm0, %v1352_v17, 0.0  ;;  %vm3008_vm2 = vcmp.eq.s32.totalorder %v1958_v0, 1  ;;  %vm3009_vm14 = vcmp.eq.s32.totalorder %v1877_v44, 10 }
 0x476   : > { %v1447_v46 = vsel %vm3009_vm14, %v2641_v7, 0.0  ;;  %v1376_v54 = vsel %vm460_vm9, %v2670_v20, 0.0  ;;  %v1412_v43 = vsel %vm502_vm7, %v2670_v20, 0.0  ;;  %v1448_v30 = vsel %vm3010_vm10, %v2670_v20, 0.0 }
 0x477   : > { %1426 = vadd.xlane.f32.xlu1 %v1425_v28  ;;  %1414 = vadd.xlane.f32.xlu2 %v1413_v36  ;;  %v865_v28 = vsel %vm215_vm0, %v861_v57, 0.0  ;;  %v1320_v36 = vsel %vm215_vm0, %v1316_v25, 0.0  ;;  %v1416_v34 = vsel %vm215_vm0, %v1412_v43, 0.0  ;;  %v1239_v25 = vmul.f32 %v1235_v47, %v2976_v24 }
 0x478   : > { %1282 = vadd.xlane.f32.xlu0 %v1281_v63  ;;  %v1194_v63 = vsel %vm215_vm0, %v1190_v23, 0.0  ;;  %vm1471_vm7 = vcmask 257024  }
 0x47f   : > { %1297 = vadd.xlane.f32.xlu1 %v1296_v48  ;;  %1237 = vadd.xlane.f32.xlu2 %v1236_v33  ;;  %v1224_v48 = vsel %vm215_vm0, %v1220_v49, 0.0  ;;  %v1388_v33 = vsel %vm3006_vm1, %v2670_v20, 0.0 }
 0x480   : > { %1294 = vadd.xlane.f32.xlu0 %v1293_v1  ;;  %v1304_v1 = vsel %vm3007_vm8, %v2670_v20, 0.0  ;;  %v1392_v55 = vsel %vm215_vm0, %v1388_v33, 0.0 }
 0x481   : > { %v1308_v11 = vsel %vm215_vm0, %v1304_v1, 0.0 }
 0x487   : > { %1333 = vadd.xlane.f32.xlu1 %v1332_v35  ;;  %1249 = vadd.xlane.f32.xlu2 %v1248_v27  ;;  %v1340_v35 = vsel %vm3008_vm2, %v2670_v20, 0.0  ;;  %v1428_v27 = vsel %vm215_vm0, %v1424_v26, 0.0 }
 0x488   : > { %1330 = vadd.xlane.f32.xlu0 %v1329_v53  ;;  %v1193_v53 = vpop.xlane.xlu2 %1192  ;;  %v1344_v59 = vsel %vm215_vm0, %v1340_v35, 0.0 }
 0x48f   : > { %1369 = vadd.xlane.f32.xlu1 %v1368_v16  ;;  %1261 = vadd.xlane.f32.xlu2 %v1260_v2  ;;  %v1449_v16 = vsel %vm215_vm0, %v1447_v46, 0.0  ;;  %v1380_v2 = vsel %vm215_vm0, %v1376_v54, 0.0 }
 0x490   : > { %1366 = vadd.xlane.f32.xlu0 %v1365_v62  ;;  %v1223_v62 = vpop.xlane.xlu2 %1222 }
 0x491   : > { %v1227_v57 = vmul.f32 %v1223_v62, %v2975_v8 }
 0x497   : > { %1405 = vadd.xlane.f32.xlu1 %v1404_v6  ;;  %1273 = vadd.xlane.f32.xlu2 %v1272_v19  ;;  %v1452_v6 = vsel %vm215_vm0, %v1448_v30, 0.0 }
 0x498   : > { %1402 = vadd.xlane.f32.xlu0 %v1401_v42 }
 0x49f   : > { %1441 = vadd.xlane.f32.xlu1 %v1440_v13  ;;  %1285 = vadd.xlane.f32.xlu2 %v1284_v56  ;;  %v1197_v13 = vmul.f32 %v1193_v53, %v2974_v38 }
 0x4a0   : > { %1438 = vadd.xlane.f32.xlu0 %v1437_v50 }
 0x4a7   : > { %866 = vadd.xlane.f32.xlu1 %v865_v28  ;;  %1321 = vadd.xlane.f32.xlu2 %v1320_v36 }
 0x4a8   : > { %1195 = vadd.xlane.f32.xlu0 %v1194_v63 }
 0x4af   : > { %1357 = vadd.xlane.f32.xlu2 %v1356_v15 }
 0x4b0   : > { %1225 = vadd.xlane.f32.xlu0 %v1224_v48 }
 0x4b7   : > { %1393 = vadd.xlane.f32.xlu2 %v1392_v55 }
 0x4b8   : > { %1309 = vadd.xlane.f32.xlu0 %v1308_v11 }
 0x4bf   : > { %1429 = vadd.xlane.f32.xlu2 %v1428_v27 }
 0x4c0   : > { %1345 = vadd.xlane.f32.xlu0 %v1344_v59 }
 0x4c7   : > { %1450 = vadd.xlane.f32.xlu2 %v1449_v16 }
 0x4c8   : > { %1381 = vadd.xlane.f32.xlu0 %v1380_v2 }
 0x4d0   : > { %1417 = vadd.xlane.f32.xlu0 %v1416_v34 }
 0x4d2   : > { %v1307_v44 = vpop.xlane.xlu2 %1306  ;;  %v1319_v49 = vpop.xlane.xlu1 %1318 }
 0x4d3   : > { %v1247_v7 = vpop.xlane.xlu0 %1246  ;;  %v1311_v35 = vmul.f32 %v1307_v44, %v2449_v10  ;;  %v1323_v46 = vmul.f32 %v1319_v49, %v2478_v4 }
 0x4d4   : > { %v1251_v20 = vmul.f32 %v1247_v7, %v2382_v12 }
 0x4d8   : > { %1453 = vadd.xlane.f32.xlu0 %v1452_v6 }
 0x4da   : > { %v1343_v19 = vpop.xlane.xlu2 %1342  ;;  %v1355_v16 = vpop.xlane.xlu1 %1354 }
 0x4db   : > { %v1259_v42 = vpop.xlane.xlu0 %1258  ;;  %v1347_v43 = vmul.f32 %v1343_v19, %v2487_v45  ;;  %v1359_v7 = vmul.f32 %v1355_v16, %v2520_v22 }
 0x4dc   : > { %v1263_v36 = vmul.f32 %v1259_v42, %v2389_v41 }
 0x4e2   : > { %v1379_v51 = vpop.xlane.xlu2 %1378 }
 0x4e3   : > { %v1271_v14 = vpop.xlane.xlu0 %1270  ;;  %v1383_v47 = vmul.f32 %v1379_v51, %v2529_v37 }
 0x4e4   : > { %v1275_v48 = vmul.f32 %v1271_v14, %v2392_v61 }
 0x4ea   : > { %v1415_v56 = vpop.xlane.xlu2 %1414  ;;  %v1214_v9 = vpop.f32.mrf.mxu1 }
 0x4eb   : > { %v1283_v50 = vpop.xlane.xlu0 %1282  ;;  %v1215_v23 = vadd.f32 %v1214_v9, %v1197_v13 }
 0x4ec   : > { %v1287_v1 = vmul.f32 %v1283_v50, %v2440_v39  ;;  %v1391_v50 = vpop.xlane.xlu1 %1390 }
 0x4ed   : > { %v1229_v0 = vadd.f32 %v1227_v57, %v1215_v23  ;;  %v1395_v57 = vmul.f32 %v1391_v50, %v2556_v29 }
 0x4ef   : > { %v1241_v28 = vadd.f32 %v1239_v25, %v1229_v0 }
 0x4f1   : > { %v1253_v63 = vadd.f32 %v1251_v20, %v1241_v28  ;;  %v1419_v20 = vmul.f32 %v1415_v56, %v2568_v5 }
 0x4f2   : > { %v1238_v17 = vpop.xlane.xlu2 %1237 }
 0x4f3   : > { %v1295_v15 = vpop.xlane.xlu0 %1294  ;;  %v1265_v33 = vadd.f32 %v1263_v36, %v1253_v63 }
 0x4f4   : > { %v1299_v26 = vmul.f32 %v1295_v15, %v2436_v18  ;;  %v1427_v49 = vpop.xlane.xlu1 %1426 }
 0x4f5   : > { %v1277_v55 = vadd.f32 %v1275_v48, %v1265_v33 }
 0x4f7   : > { %v1289_v11 = vadd.f32 %v1287_v1, %v1277_v55  ;;  %v1216_v55 = vpop.f32.mrf.mxu1 }
 0x4f9   : > { %v1301_v27 = vadd.f32 %v1299_v26, %v1289_v11 }
 0x4fa   : > { %v1250_v53 = vpop.xlane.xlu2 %1249 }
 0x4fb   : > { %v1331_v59 = vpop.xlane.xlu0 %1330  ;;  %v1313_v54 = vadd.f32 %v1311_v35, %v1301_v27  ;;  %v1240_v27 = vmul.f32 %v1238_v17, %v2976_v24  ;;  %v1252_v56 = vmul.f32 %v1250_v53, %v2382_v12 }
 0x4fc   : > { %v1335_v62 = vmul.f32 %v1331_v59, %v2475_v60  ;;  %v1298_v33 = vpop.xlane.xlu1 %1297 }
 0x4fd   : > { %v1325_v2 = vadd.f32 %v1323_v46, %v1313_v54 }
 0x4ff   : > { %v1337_v34 = vadd.f32 %v1335_v62, %v1325_v2 }
 0x501   : > { %v1349_v30 = vadd.f32 %v1347_v43, %v1337_v34 }
 0x502   : > { %v1262_v6 = vpop.xlane.xlu2 %1261 }
 0x503   : > { %v1367_v42 = vpop.xlane.xlu0 %1366  ;;  %v1361_v14 = vadd.f32 %v1359_v7, %v1349_v30  ;;  %v1264_v2 = vmul.f32 %v1262_v6, %v2389_v41 }
 0x504   : > { %v1371_v44 = vmul.f32 %v1367_v42, %v2511_v40  ;;  %v1334_v46 = vpop.xlane.xlu1 %1333 }
 0x505   : > { %v1336_v6 = vmul.f32 %v1334_v46, %v2475_v60 }
 0x506   : > { %v1373_v13 = vadd.f32 %v1371_v44, %v1361_v14 }
 0x508   : > { %v1385_v9 = vadd.f32 %v1383_v47, %v1373_v13 }
 0x50a   : > { %v1274_v25 = vpop.xlane.xlu2 %1273  ;;  %v1397_v0 = vadd.f32 %v1395_v57, %v1385_v9 }
 0x50b   : > { %v1403_v23 = vpop.xlane.xlu0 %1402  ;;  %v1276_v34 = vmul.f32 %v1274_v25, %v2392_v61 }
 0x50c   : > { %v1407_v19 = vmul.f32 %v1403_v23, %v2553_v32  ;;  %v1370_v24 = vpop.xlane.xlu1 %1369 }
 0x50d   : > { %v1372_v9 = vmul.f32 %v1370_v24, %v2511_v40 }
 0x50e   : > { %v1409_v28 = vadd.f32 %v1407_v19, %v1397_v0 }
 0x510   : > { %v1421_v36 = vadd.f32 %v1419_v20, %v1409_v28 }
 0x512   : > { %v1286_v15 = vpop.xlane.xlu2 %1285 }
 0x513   : > { %v1439_v63 = vpop.xlane.xlu0 %1438  ;;  %v1288_v7 = vmul.f32 %v1286_v15, %v2440_v39 }
 0x514   : > { %v1406_v25 = vpop.xlane.xlu1 %1405 }
 0x515   : > { %v1408_v60 = vmul.f32 %v1406_v25, %v2553_v32 }
 0x51a   : > { %v1322_v51 = vpop.xlane.xlu2 %1321 }
 0x51b   : > { %v1196_v48 = vpop.xlane.xlu0 %1195  ;;  %v1324_v44 = vmul.f32 %v1322_v51, %v2478_v4  ;;  %v1431_v51 = vmul.f32 %v1427_v49, %v2587_v3 }
 0x51c   : > { %v1198_v1 = vmul.f32 %v1196_v48, %v2974_v38  ;;  %v1442_v40 = vpop.xlane.xlu1 %1441 }
 0x51e   : > { %v1217_v26 = vadd.f32 %v1216_v55, %v1198_v1  ;;  %v1443_v1 = vmul.f32 %v1439_v63, %v2584_v58  ;;  %v1433_v55 = vadd.f32 %v1431_v51, %v1421_v36 }
 0x522   : > { %v1358_v16 = vpop.xlane.xlu2 %1357 }
 0x523   : > { %v1226_v11 = vpop.xlane.xlu0 %1225  ;;  %v1360_v39 = vmul.f32 %v1358_v16, %v2520_v22 }
 0x524   : > { %v1228_v35 = vmul.f32 %v1226_v11, %v2975_v8  ;;  %v1300_v8 = vmul.f32 %v1298_v33, %v2436_v18 }
 0x526   : > { %v1230_v59 = vadd.f32 %v1228_v35, %v1217_v26  ;;  %v1445_v26 = vadd.f32 %v1443_v1, %v1433_v55 }
 0x528   : > { %v1242_v54 = vadd.f32 %v1240_v27, %v1230_v59 }
 0x52a   : > { %v1254_v62 = vadd.f32 %v1252_v56, %v1242_v54  ;;  %v1394_v12 = vpop.xlane.xlu2 %1393 }
 0x52b   : > { %v1310_v43 = vpop.xlane.xlu0 %1309  ;;  %v1396_v4 = vmul.f32 %v1394_v12, %v2556_v29  ;;  %v1444_v29 = vmul.f32 %v1442_v40, %v2584_v58 }
 0x52c   : > { %v1266_v38 = vadd.f32 %v1264_v2, %v1254_v62  ;;  %v1312_v14 = vmul.f32 %v1310_v43, %v2449_v10 }
 0x52e   : > { %v1278_v30 = vadd.f32 %v1276_v34, %v1266_v38 }
 0x530   : > { %v1290_v42 = vadd.f32 %v1288_v7, %v1278_v30 }
 0x532   : > { %v1302_v17 = vadd.f32 %v1300_v8, %v1290_v42  ;;  %v1430_v10 = vpop.xlane.xlu2 %1429 }
 0x533   : > { %v1346_v53 = vpop.xlane.xlu0 %1345  ;;  %v1432_v15 = vmul.f32 %v1430_v10, %v2587_v3  ;;  %v867_v3 = vpop.xlane.xlu1 %866 }
 0x534   : > { %v1314_v41 = vadd.f32 %v1312_v14, %v1302_v17  ;;  %v1348_v13 = vmul.f32 %v1346_v53, %v2487_v45  ;;  %v870_v63 = vmul.f32 %v2667_v52, %v867_v3 }
 0x536   : > { %v1326_v47 = vadd.f32 %v1324_v44, %v1314_v41  ;;  %v872_v58 = vadd.f32 %v870_v63, %v2628_v31 }
 0x538   : > { %v1338_v61 = vadd.f32 %v1336_v6, %v1326_v47 }
 0x53a   : > { %v1350_v50 = vadd.f32 %v1348_v13, %v1338_v61  ;;  %v1451_v33 = vpop.xlane.xlu2 %1450 }
 0x53b   : > { %v1382_v18 = vpop.xlane.xlu0 %1381  ;;  %v1455_v32 = vmul.f32 %v1451_v33, %v2667_v52 }
 0x53c   : > { %v1362_v57 = vadd.f32 %v1360_v39, %v1350_v50  ;;  %v1384_v0 = vmul.f32 %v1382_v18, %v2529_v37 }
 0x53d   : > { %v1457_v27 = vadd.f32 %v1455_v32, %v1445_v26 }
 0x53e   : > { %v1374_v23 = vadd.f32 %v1372_v9, %v1362_v57 }
 0x540   : > { %v1386_v19 = vadd.f32 %v1384_v0, %v1374_v23 }
 0x542   : > { %v1398_v20 = vadd.f32 %v1396_v4, %v1386_v19 }
 0x543   : > { %v1418_v28 = vpop.xlane.xlu0 %1417 }
 0x544   : > { %v1410_v45 = vadd.f32 %v1408_v60, %v1398_v20  ;;  %v1420_v22 = vmul.f32 %v1418_v28, %v2568_v5 }
 0x546   : > { %v1422_v48 = vadd.f32 %v1420_v22, %v1410_v45 }
 0x548   : > { %v1434_v37 = vadd.f32 %v1432_v15, %v1422_v48 }
 0x54a   : > { %v1446_v35 = vadd.f32 %v1444_v29, %v1434_v37 }
 0x54b   : > { %v1454_v11 = vpop.xlane.xlu0 %1453 }
 0x54c   : > { %v1456_v5 = vmul.f32 %v1454_v11, %v2667_v52 }
 0x54e   : > { %v1458_v59 = vadd.f32 %v1456_v5, %v1446_v35 }
 0x550   : > { %v1677_v46 = vpack.i.bf16 %v1458_v59, %v1457_v27 }
 0x552   : > { %1678 = vrot.lane.b32.xlu2 %v1677_v46, %s1749_s13 }
 0x5ac   : > { %v1679_v49 = vpop.permute.xlu2 %1678 }
 0x5ad   : > { %v1681_v36 = vunpack.i.h.bf16 %v1679_v49  ;;  %v1680_v56 = vunpack.i.l.bf16 %v1679_v49 }
 0x5af   : > { %v1468_v54 = vsel %vm215_vm0, %v872_v58, %v1681_v36  ;;  %v1467_v16 = vsel %vm215_vm0, %v2682_v21, %v1680_v56 }
 0x5b0   : > { %v1470_v2 = vpack.c.bf16 %v1468_v54, %v1468_v54  ;;  %v1469_v62 = vpack.c.bf16 %v1467_v16, %v1467_v16 }
 0x5b2   : > { %1473 = vst.msk [vmem:[%s179_s16 + $0x4] sm:$0xf] %vm1471_vm7, %v1470_v2 }
 0x5b3   : > { %1472 = vst.msk [vmem:[%s179_s16] sm:$0xf] %vm1471_vm7, %v1469_v62 }
 0x5b4 PF: > { %s22_s19 = sadd.s32 1, %s1719_s19  }
 0x5b5   : > { %p19_p4 = scmp.ge.s32.totalorder %s22_s19, 4  }
 0x5b7   :  { %21 = sbr.rel (!%p19_p4) target bundleno = 7 (0x7), region = 62 }

</bundles_post_ra>
